<compile_context>
chip_gen: v7x
topology: tpu7x:2x2x1
jax: 0.10.0
libtpu: 0.0.40
codegen_flags: <defaults>
</compile_context>

<pallas_src>
import jax
import jax.numpy as jnp
from jax.experimental import pallas as pl
from jax.experimental.pallas import tpu as pltpu


# -----------------------------------------------------------------------------
# Pallas kernel 1: per-tap matmul accumulation + BatchNorm2d(train) + ReLU
# -----------------------------------------------------------------------------
def conv_bn_relu_kernel(x_ref, w_ref, gamma_ref, beta_ref, o_ref, acc_ref):
    # x_ref:     (M, Cin)   bf16  one im2col tap (tap axis squeezed)
    # w_ref:     (Cin, TC)  bf16  that tap's weight slice for this Cout tile
    # gamma_ref: (1, TC)    f32   BN weight
    # beta_ref:  (1, TC)    f32   BN bias
    # o_ref:     (M, TC)    out dtype
    # acc_ref:   (M, TC)    f32   VMEM accumulator (resident across taps)
    t = pl.program_id(1)

    @pl.when(t == 0)
    def _init():
        acc_ref[...] = jnp.zeros_like(acc_ref)

    acc_ref[...] += jnp.dot(x_ref[...], w_ref[...],
                            preferred_element_type=jnp.float32)

    @pl.when(t == pl.num_programs(1) - 1)
    def _finalize():
        acc = acc_ref[...]
        # BatchNorm2d in training mode: per-channel batch statistics over
        # M = N*Ho*Wo, biased variance, eps = 1e-5 (PyTorch defaults).
        mean = jnp.mean(acc, axis=0, keepdims=True)
        centered = acc - mean
        var = jnp.mean(centered * centered, axis=0, keepdims=True)
        # Folded epilogue: one FMA + max instead of 4 full (M, TC) passes.
        scale = gamma_ref[...] * jax.lax.rsqrt(var + 1e-5)
        shift = beta_ref[...] - mean * scale
        o_ref[...] = jnp.maximum(acc * scale + shift, 0.0).astype(o_ref.dtype)


# -----------------------------------------------------------------------------
# Pallas kernel 2: MaxPool2d(3, stride=2) == elementwise max over 9 taps (VPU)
# -----------------------------------------------------------------------------
def maxpool_kernel(t_ref, o_ref):
    # t_ref: (KT, TM, C),  o_ref: (TM, C)
    o_ref[...] = jnp.max(t_ref[...], axis=0)


# -----------------------------------------------------------------------------
# Helpers
# -----------------------------------------------------------------------------
def _round_up(x, m):
    return ((x + m - 1) // m) * m


def _largest_divisor(n, align, cap):
    """Largest multiple of `align` that divides `n` and is <= cap (or None)."""
    best = None
    d = align
    limit = min(n, cap)
    while d <= limit:
        if n % d == 0:
            best = d
        d += align
    return best


def _extract_taps(x_nhwc, KH, KW, stride, pad):
    """Return the KH*KW shifted/strided taps, shape (KH*KW, N, Ho, Wo, C)."""
    ph, pw = pad
    xp = jnp.pad(x_nhwc, ((0, 0), (ph, ph), (pw, pw), (0, 0)))
    N, Hp, Wp, C = xp.shape
    Ho = (Hp - KH) // stride + 1
    Wo = (Wp - KW) // stride + 1
    taps = []
    for i in range(KH):
        for j in range(KW):
            taps.append(jax.lax.slice(
                xp,
                (0, i, j, 0),
                (N, i + stride * (Ho - 1) + 1, j + stride * (Wo - 1) + 1, C),
                (1, stride, stride, 1)))
    return jnp.stack(taps, axis=0), (N, Ho, Wo)


# -----------------------------------------------------------------------------
# Wrappers
# -----------------------------------------------------------------------------
def conv_bn_relu(x_nhwc, w_oihw, gamma, beta, *, stride=1, pad=(0, 0),
                 out_dtype=jnp.float32, keep_padded=False):
    """Conv2d(bias=False) + BatchNorm2d(train) + ReLU.

    x_nhwc: (N, H, W, Cin)  (may carry zero-padded trailing channels);
    w_oihw: (Cout, Cin_w, KH, KW) (PyTorch layout), Cin_w <= Cin.
    Returns NHWC with Cout padded to a multiple of 128 if keep_padded=True.
    """
    Cout, Cin_w, KH, KW = w_oihw.shape
    Cin = x_nhwc.shape[-1]
    assert Cin_w <= Cin

    # Lane-dense output channels: pad Cout up to a multiple of 128.  Zero
    # gamma/beta on the padded channels make their output exactly zero.
    Cp = _round_up(Cout, 128)
    tc = 256 if Cp % 256 == 0 else 128   # 256-wide tiles fill v6e/v7x MXU

    # Weights -> (KT, Cin, Cp); zero-pad both the input-channel axis (padded
    # activation channels are zero anyway) and the output-channel axis.
    KT = KH * KW
    w = jnp.transpose(w_oihw, (2, 3, 1, 0)).reshape(KT, Cin_w, Cout)
    w = jnp.pad(w, ((0, 0), (0, Cin - Cin_w), (0, Cp - Cout))).astype(jnp.bfloat16)
    gamma_p = jnp.pad(gamma, (0, Cp - Cout)).reshape(1, Cp).astype(jnp.float32)
    beta_p = jnp.pad(beta, (0, Cp - Cout)).reshape(1, Cp).astype(jnp.float32)

    # Tap-indexed im2col: bf16 cast first, then stack; (KT, M, Cin) is a
    # contiguous reshape (no big (M, KT*Cin) transpose materialised).
    taps, (N, Ho, Wo) = _extract_taps(
        x_nhwc.astype(jnp.bfloat16), KH, KW, stride, pad)
    M = N * Ho * Wo
    taps = taps.reshape(KT, M, Cin)

    grid = (Cp // tc, KT)
    out_bytes = jnp.dtype(out_dtype).itemsize
    cost = pl.CostEstimate(
        flops=2 * M * KT * Cin * Cp,
        transcendentals=Cp,
        bytes_accessed=(grid[0] * KT * M * Cin * 2      # taps (re-read per c)
                        + KT * Cin * Cp * 2              # weights
                        + M * Cp * out_bytes),           # output
    )

    out = pl.pallas_call(
        conv_bn_relu_kernel,
        out_shape=jax.ShapeDtypeStruct((M, Cp), out_dtype),
        grid_spec=pltpu.PrefetchScalarGridSpec(
            num_scalar_prefetch=0,
            grid=grid,
            in_specs=[
                # One conv tap per reduction step (leading tap dim squeezed).
                pl.BlockSpec((None, M, Cin), lambda c, t: (t, 0, 0)),
                # Matching weight slice for this tap / Cout tile.
                pl.BlockSpec((None, Cin, tc), lambda c, t: (t, 0, c)),
                pl.BlockSpec((1, tc), lambda c, t: (0, c)),
                pl.BlockSpec((1, tc), lambda c, t: (0, c)),
            ],
            out_specs=pl.BlockSpec((M, tc), lambda c, t: (0, c)),
            scratch_shapes=[pltpu.VMEM((M, tc), jnp.float32)],
        ),
        compiler_params=pltpu.CompilerParams(
            dimension_semantics=("parallel", "arbitrary"),
            vmem_limit_bytes=32 * 1024 * 1024),
        cost_estimate=cost,
    )(taps, w, gamma_p, beta_p)

    out = out.reshape(N, Ho, Wo, Cp)
    if not keep_padded and Cp != Cout:
        out = out[..., :Cout]
    return out


def maxpool_3x3_s2(x_nhwc):
    """MaxPool2d(kernel=3, stride=2, padding=0), gridded over M tiles."""
    taps, (N, Ho, Wo) = _extract_taps(x_nhwc, 3, 3, 2, (0, 0))
    KT = taps.shape[0]
    C = x_nhwc.shape[-1]
    M = N * Ho * Wo
    t = taps.reshape(KT, M, C)

    tm = _largest_divisor(M, 8, 1024) or M
    grid = (M // tm,)

    out = pl.pallas_call(
        maxpool_kernel,
        out_shape=jax.ShapeDtypeStruct((M, C), x_nhwc.dtype),
        grid_spec=pltpu.PrefetchScalarGridSpec(
            num_scalar_prefetch=0,
            grid=grid,
            in_specs=[pl.BlockSpec((KT, tm, C), lambda m: (0, m, 0))],
            out_specs=pl.BlockSpec((tm, C), lambda m: (m, 0)),
        ),
        compiler_params=pltpu.CompilerParams(
            dimension_semantics=("parallel",),
            vmem_limit_bytes=32 * 1024 * 1024),
    )(t)
    return out.reshape(N, Ho, Wo, C)


# -----------------------------------------------------------------------------
# InceptionBlockB forward (glue in plain JAX, compute in Pallas kernels)
# -----------------------------------------------------------------------------
def make_conv_params(key, cout, cin, kh, kw):
    w = jax.random.normal(key, (cout, cin, kh, kw), jnp.float32)
    w = w / jnp.sqrt(jnp.float32(cin * kh * kw))
    gamma = jnp.ones((cout,), jnp.float32)   # BatchNorm2d default init
    beta = jnp.zeros((cout,), jnp.float32)
    return (w, gamma, beta)


def init_inception_block_b(key, in_channels):
    keys = jax.random.split(key, 4)
    return {
        "conv3x3_b1":        make_conv_params(keys[0], 384, in_channels, 3, 3),
        "conv3x3_b2_reduce": make_conv_params(keys[1], 64, in_channels, 1, 1),
        "conv3x3_b2_1":      make_conv_params(keys[2], 96, 64, 3, 3),
        "conv3x3_b2_2":      make_conv_params(keys[3], 96, 96, 3, 3),
    }


def inception_block_b(x_nchw, params):
    x = jnp.transpose(x_nchw, (0, 2, 3, 1))  # NCHW -> NHWC

    # Pool branch: MaxPool2d(3, stride=2).
    out_pool = maxpool_3x3_s2(x)

    # Branch 1: 3x3 stride-2 conv, 384 channels (already a multiple of 128).
    out_b1 = conv_bn_relu(x, *params["conv3x3_b1"], stride=2, pad=(0, 0),
                          out_dtype=jnp.float32)

    # Branch 2: 1x1 reduce (64) -> 3x3 pad=1 (96) -> 3x3 stride=2 (96).
    # Intermediates stay bf16 and channel-padded to 128 lanes; padded
    # channels are exactly zero and hit zero weight rows in the next conv.
    b2r = conv_bn_relu(x, *params["conv3x3_b2_reduce"], stride=1, pad=(0, 0),
                       out_dtype=jnp.bfloat16, keep_padded=True)
    b2_1 = conv_bn_relu(b2r, *params["conv3x3_b2_1"], stride=1, pad=(1, 1),
                        out_dtype=jnp.bfloat16, keep_padded=True)
    out_b2 = conv_bn_relu(b2_1, *params["conv3x3_b2_2"], stride=2, pad=(0, 0),
                          out_dtype=jnp.float32)

    # Concatenate along channels in the same order as the PyTorch module:
    # (out_3x3_b1, out_3x3_b2, out_pool).
    out = jnp.concatenate(
        [out_b1, out_b2, out_pool.astype(jnp.float32)], axis=-1)
    return jnp.transpose(out, (0, 3, 1, 2))  # NHWC -> NCHW


if __name__ == "__main__":
    key = jax.random.PRNGKey(0)
    k_x, k_p = jax.random.split(key)

    batch, in_channels, spatial = 2, 128, 17   # -> 8x8 output spatial
    x = jax.random.normal(k_x, (batch, in_channels, spatial, spatial),
                          jnp.float32)
    params = init_inception_block_b(k_p, in_channels)

    fwd = jax.jit(inception_block_b)
    out = jax.block_until_ready(fwd(x, params))

    out_spatial = (spatial - 3) // 2 + 1       # 8
    expected_channels = 384 + 96 + in_channels  # 608
    assert out.shape == (batch, expected_channels, out_spatial, out_spatial), out.shape
    assert bool(jnp.all(jnp.isfinite(out)))
    print("KERNEL_OK")
</pallas_src>

<mosaic_0001>
module attributes {stable_mosaic.version = 11 : i64} {
  func.func @conv_bn_relu_kernel(%arg0: i32, %arg1: i32, %arg2: memref<1x578x128xbf16, #tpu.memory_space<vmem>>, %arg3: memref<1x128x128xbf16, #tpu.memory_space<vmem>>, %arg4: memref<1x128xf32, #tpu.memory_space<vmem>>, %arg5: memref<1x128xf32, #tpu.memory_space<vmem>>, %arg6: memref<578x128xbf16, #tpu.memory_space<vmem>>, %arg7: memref<578x128xf32, #tpu.memory_space<vmem>>) attributes {dimension_semantics = [#tpu.dimension_semantics<parallel>, #tpu.dimension_semantics<arbitrary>], iteration_bounds = array<i64: 1, 1>, scalar_prefetch = 0 : i64, scratch_operands = 1 : i64, tpu.core_type = #tpu.core_type<tc>, window_params = [{transform_indices = @transform_0, window_bounds = array<i64: 1, 578, 128>}, {transform_indices = @transform_1, window_bounds = array<i64: 1, 128, 128>}, {transform_indices = @transform_2, window_bounds = array<i64: 1, 128>}, {transform_indices = @transform_3, window_bounds = array<i64: 1, 128>}, {transform_indices = @transform_4, window_bounds = array<i64: 578, 128>}]} {
    %c0_i32 = arith.constant 0 : i32
    %0 = arith.cmpi eq, %arg1, %c0_i32 : i32
    %1 = arith.extui %0 : i1 to i32
    %c0_i32_0 = arith.constant 0 : i32
    %2 = arith.cmpi ne, %1, %c0_i32_0 : i32
    scf.if %2 {
      %cst_12 = arith.constant 0.000000e+00 : f32
      %14 = vector.broadcast %cst_12 : f32 to vector<578x128xf32>
      %c0_13 = arith.constant 0 : index
      %c0_14 = arith.constant 0 : index
      %15 = vector.load %arg7[%c0_13, %c0_14] : memref<578x128xf32, #tpu.memory_space<vmem>>, vector<578x128xf32>
      tpu.vector_store %arg7[%c0_13, %c0_14], %14 {strides = array<i32>} : memref<578x128xf32, #tpu.memory_space<vmem>>, vector<578x128xf32>,
    } else {
    }
    %c0 = arith.constant 0 : index
    %c0_1 = arith.constant 0 : index
    %3 = vector.load %arg7[%c0, %c0_1] : memref<578x128xf32, #tpu.memory_space<vmem>>, vector<578x128xf32>
    %c0_2 = arith.constant 0 : index
    %c0_3 = arith.constant 0 : index
    %c0_4 = arith.constant 0 : index
    %4 = vector.load %arg2[%c0_2, %c0_3, %c0_4] : memref<1x578x128xbf16, #tpu.memory_space<vmem>>, vector<1x578x128xbf16>
    %5 = vector.shape_cast %4 : vector<1x578x128xbf16> to vector<578x128xbf16>
    %c0_5 = arith.constant 0 : index
    %c0_6 = arith.constant 0 : index
    %c0_7 = arith.constant 0 : index
    %6 = vector.load %arg3[%c0_5, %c0_6, %c0_7] : memref<1x128x128xbf16, #tpu.memory_space<vmem>>, vector<1x128x128xbf16>
    %7 = vector.shape_cast %6 : vector<1x128x128xbf16> to vector<128x128xbf16>
    %cst = arith.constant dense<0.000000e+00> : vector<578x128xf32>
    %8 = tpu.matmul %5, %7, %cst {dimension_numbers = #tpu.dot_dimension_numbers<[1], [0], [0], [1], [0, 0, 1, 1], [], []>} : vector<578x128xbf16>, vector<128x128xbf16>, vector<578x128xf32> -> vector<578x128xf32>
    %9 = arith.addf %3, %8 : vector<578x128xf32>
    %c0_8 = arith.constant 0 : index
    %c0_9 = arith.constant 0 : index
    %10 = vector.load %arg7[%c0_8, %c0_9] : memref<578x128xf32, #tpu.memory_space<vmem>>, vector<578x128xf32>
    tpu.vector_store %arg7[%c0_8, %c0_9], %9 {strides = array<i32>} : memref<578x128xf32, #tpu.memory_space<vmem>>, vector<578x128xf32>,
    %c0_i32_10 = arith.constant 0 : i32
    %11 = arith.cmpi eq, %arg1, %c0_i32_10 : i32
    %12 = arith.extui %11 : i1 to i32
    %c0_i32_11 = arith.constant 0 : i32
    %13 = arith.cmpi ne, %12, %c0_i32_11 : i32
    scf.if %13 {
      %c0_12 = arith.constant 0 : index
      %c0_13 = arith.constant 0 : index
      %14 = vector.load %arg7[%c0_12, %c0_13] : memref<578x128xf32, #tpu.memory_space<vmem>>, vector<578x128xf32>
      %cst_14 = arith.constant dense<0.000000e+00> : vector<128xf32>
      %15 = vector.multi_reduction <add>, %14, %cst_14 [0] : vector<578x128xf32> to vector<128xf32>
      %16 = vector.shape_cast %15 : vector<128xf32> to vector<1x128xf32>
      %cst_15 = arith.constant 5.780000e+02 : f32
      %17 = vector.broadcast %cst_15 : f32 to vector<1x128xf32>
      %18 = arith.divf %16, %17 : vector<1x128xf32>
      %19 = vector.broadcast %18 : vector<1x128xf32> to vector<578x128xf32>
      %20 = arith.subf %14, %19 : vector<578x128xf32>
      %21 = arith.mulf %20, %20 : vector<578x128xf32>
      %cst_16 = arith.constant dense<0.000000e+00> : vector<128xf32>
      %22 = vector.multi_reduction <add>, %21, %cst_16 [0] : vector<578x128xf32> to vector<128xf32>
      %23 = vector.shape_cast %22 : vector<128xf32> to vector<1x128xf32>
      %cst_17 = arith.constant 5.780000e+02 : f32
      %24 = vector.broadcast %cst_17 : f32 to vector<1x128xf32>
      %25 = arith.divf %23, %24 : vector<1x128xf32>
      %c0_18 = arith.constant 0 : index
      %c0_19 = arith.constant 0 : index
      %26 = vector.load %arg4[%c0_18, %c0_19] : memref<1x128xf32, #tpu.memory_space<vmem>>, vector<1x128xf32>
      %cst_20 = arith.constant 9.99999974E-6 : f32
      %27 = vector.broadcast %cst_20 : f32 to vector<1x128xf32>
      %28 = arith.addf %25, %27 : vector<1x128xf32>
      %29 = math.rsqrt %28 : vector<1x128xf32>
      %30 = arith.mulf %26, %29 : vector<1x128xf32>
      %c0_21 = arith.constant 0 : index
      %c0_22 = arith.constant 0 : index
      %31 = vector.load %arg5[%c0_21, %c0_22] : memref<1x128xf32, #tpu.memory_space<vmem>>, vector<1x128xf32>
      %32 = arith.mulf %18, %30 : vector<1x128xf32>
      %33 = arith.subf %31, %32 : vector<1x128xf32>
      %34 = vector.broadcast %30 : vector<1x128xf32> to vector<578x128xf32>
      %35 = arith.mulf %14, %34 : vector<578x128xf32>
      %36 = vector.broadcast %33 : vector<1x128xf32> to vector<578x128xf32>
      %37 = arith.addf %35, %36 : vector<578x128xf32>
      %cst_23 = arith.constant 0.000000e+00 : f32
      %38 = vector.broadcast %cst_23 : f32 to vector<578x128xf32>
      %39 = arith.maximumf %37, %38 : vector<578x128xf32>
      %40 = arith.truncf %39 : vector<578x128xf32> to vector<578x128xbf16>
      %c0_24 = arith.constant 0 : index
      %c0_25 = arith.constant 0 : index
      %41 = vector.load %arg6[%c0_24, %c0_25] : memref<578x128xbf16, #tpu.memory_space<vmem>>, vector<578x128xbf16>
      tpu.vector_store %arg6[%c0_24, %c0_25], %40 {strides = array<i32>} : memref<578x128xbf16, #tpu.memory_space<vmem>>, vector<578x128xbf16>,
    } else {
    }
    return
  }
  func.func @transform_0(%arg0: i32, %arg1: i32) -> (i32, i32, i32) {
    %c0_i32 = arith.constant 0 : i32
    %c0_i32_0 = arith.constant 0 : i32
    %c0_i32_1 = arith.constant 0 : i32
    return %arg1, %c0_i32, %c0_i32_0 : i32, i32, i32
  }
  func.func @transform_1(%arg0: i32, %arg1: i32) -> (i32, i32, i32) {
    %c0_i32 = arith.constant 0 : i32
    %c0_i32_0 = arith.constant 0 : i32
    return %arg1, %c0_i32, %arg0 : i32, i32, i32
  }
  func.func @transform_2(%arg0: i32, %arg1: i32) -> (i32, i32) {
    %c0_i32 = arith.constant 0 : i32
    %c0_i32_0 = arith.constant 0 : i32
    return %c0_i32, %arg0 : i32, i32
  }
  func.func @transform_3(%arg0: i32, %arg1: i32) -> (i32, i32) {
    %c0_i32 = arith.constant 0 : i32
    %c0_i32_0 = arith.constant 0 : i32
    return %c0_i32, %arg0 : i32, i32
  }
  func.func @transform_4(%arg0: i32, %arg1: i32) -> (i32, i32) {
    %c0_i32 = arith.constant 0 : i32
    %c0_i32_0 = arith.constant 0 : i32
    return %c0_i32, %arg0 : i32, i32
  }
}

module attributes {stable_mosaic.version = 11 : i64} {
  func.func @conv_bn_relu_kernel(%arg0: i32, %arg1: i32, %arg2: memref<1x578x128xbf16, #tpu.memory_space<vmem>>, %arg3: memref<1x128x128xbf16, #tpu.memory_space<vmem>>, %arg4: memref<1x128xf32, #tpu.memory_space<vmem>>, %arg5: memref<1x128xf32, #tpu.memory_space<vmem>>, %arg6: memref<578x128xbf16, #tpu.memory_space<vmem>>, %arg7: memref<578x128xf32, #tpu.memory_space<vmem>>) attributes {dimension_semantics = [#tpu.dimension_semantics<parallel>, #tpu.dimension_semantics<arbitrary>], iteration_bounds = array<i64: 1, 9>, scalar_prefetch = 0 : i64, scratch_operands = 1 : i64, tpu.core_type = #tpu.core_type<tc>, window_params = [{transform_indices = @transform_0, window_bounds = array<i64: 1, 578, 128>}, {transform_indices = @transform_1, window_bounds = array<i64: 1, 128, 128>}, {transform_indices = @transform_2, window_bounds = array<i64: 1, 128>}, {transform_indices = @transform_3, window_bounds = array<i64: 1, 128>}, {transform_indices = @transform_4, window_bounds = array<i64: 578, 128>}]} {
    %c0_i32 = arith.constant 0 : i32
    %0 = arith.cmpi eq, %arg1, %c0_i32 : i32
    %1 = arith.extui %0 : i1 to i32
    %c0_i32_0 = arith.constant 0 : i32
    %2 = arith.cmpi ne, %1, %c0_i32_0 : i32
    scf.if %2 {
      %cst_11 = arith.constant 0.000000e+00 : f32
      %14 = vector.broadcast %cst_11 : f32 to vector<578x128xf32>
      %c0_12 = arith.constant 0 : index
      %c0_13 = arith.constant 0 : index
      %15 = vector.load %arg7[%c0_12, %c0_13] : memref<578x128xf32, #tpu.memory_space<vmem>>, vector<578x128xf32>
      tpu.vector_store %arg7[%c0_12, %c0_13], %14 {strides = array<i32>} : memref<578x128xf32, #tpu.memory_space<vmem>>, vector<578x128xf32>,
    } else {
    }
    %c0 = arith.constant 0 : index
    %c0_1 = arith.constant 0 : index
    %3 = vector.load %arg7[%c0, %c0_1] : memref<578x128xf32, #tpu.memory_space<vmem>>, vector<578x128xf32>
    %c0_2 = arith.constant 0 : index
    %c0_3 = arith.constant 0 : index
    %c0_4 = arith.constant 0 : index
    %4 = vector.load %arg2[%c0_2, %c0_3, %c0_4] : memref<1x578x128xbf16, #tpu.memory_space<vmem>>, vector<1x578x128xbf16>
    %5 = vector.shape_cast %4 : vector<1x578x128xbf16> to vector<578x128xbf16>
    %c0_5 = arith.constant 0 : index
    %c0_6 = arith.constant 0 : index
    %c0_7 = arith.constant 0 : index
    %6 = vector.load %arg3[%c0_5, %c0_6, %c0_7] : memref<1x128x128xbf16, #tpu.memory_space<vmem>>, vector<1x128x128xbf16>
    %7 = vector.shape_cast %6 : vector<1x128x128xbf16> to vector<128x128xbf16>
    %cst = arith.constant dense<0.000000e+00> : vector<578x128xf32>
    %8 = tpu.matmul %5, %7, %cst {dimension_numbers = #tpu.dot_dimension_numbers<[1], [0], [0], [1], [0, 0, 1, 1], [], []>} : vector<578x128xbf16>, vector<128x128xbf16>, vector<578x128xf32> -> vector<578x128xf32>
    %9 = arith.addf %3, %8 : vector<578x128xf32>
    %c0_8 = arith.constant 0 : index
    %c0_9 = arith.constant 0 : index
    %10 = vector.load %arg7[%c0_8, %c0_9] : memref<578x128xf32, #tpu.memory_space<vmem>>, vector<578x128xf32>
    tpu.vector_store %arg7[%c0_8, %c0_9], %9 {strides = array<i32>} : memref<578x128xf32, #tpu.memory_space<vmem>>, vector<578x128xf32>,
    %c8_i32 = arith.constant 8 : i32
    %11 = arith.cmpi eq, %arg1, %c8_i32 : i32
    %12 = arith.extui %11 : i1 to i32
    %c0_i32_10 = arith.constant 0 : i32
    %13 = arith.cmpi ne, %12, %c0_i32_10 : i32
    scf.if %13 {
      %c0_11 = arith.constant 0 : index
      %c0_12 = arith.constant 0 : index
      %14 = vector.load %arg7[%c0_11, %c0_12] : memref<578x128xf32, #tpu.memory_space<vmem>>, vector<578x128xf32>
      %cst_13 = arith.constant dense<0.000000e+00> : vector<128xf32>
      %15 = vector.multi_reduction <add>, %14, %cst_13 [0] : vector<578x128xf32> to vector<128xf32>
      %16 = vector.shape_cast %15 : vector<128xf32> to vector<1x128xf32>
      %cst_14 = arith.constant 5.780000e+02 : f32
      %17 = vector.broadcast %cst_14 : f32 to vector<1x128xf32>
      %18 = arith.divf %16, %17 : vector<1x128xf32>
      %19 = vector.broadcast %18 : vector<1x128xf32> to vector<578x128xf32>
      %20 = arith.subf %14, %19 : vector<578x128xf32>
      %21 = arith.mulf %20, %20 : vector<578x128xf32>
      %cst_15 = arith.constant dense<0.000000e+00> : vector<128xf32>
      %22 = vector.multi_reduction <add>, %21, %cst_15 [0] : vector<578x128xf32> to vector<128xf32>
      %23 = vector.shape_cast %22 : vector<128xf32> to vector<1x128xf32>
      %cst_16 = arith.constant 5.780000e+02 : f32
      %24 = vector.broadcast %cst_16 : f32 to vector<1x128xf32>
      %25 = arith.divf %23, %24 : vector<1x128xf32>
      %c0_17 = arith.constant 0 : index
      %c0_18 = arith.constant 0 : index
      %26 = vector.load %arg4[%c0_17, %c0_18] : memref<1x128xf32, #tpu.memory_space<vmem>>, vector<1x128xf32>
      %cst_19 = arith.constant 9.99999974E-6 : f32
      %27 = vector.broadcast %cst_19 : f32 to vector<1x128xf32>
      %28 = arith.addf %25, %27 : vector<1x128xf32>
      %29 = math.rsqrt %28 : vector<1x128xf32>
      %30 = arith.mulf %26, %29 : vector<1x128xf32>
      %c0_20 = arith.constant 0 : index
      %c0_21 = arith.constant 0 : index
      %31 = vector.load %arg5[%c0_20, %c0_21] : memref<1x128xf32, #tpu.memory_space<vmem>>, vector<1x128xf32>
      %32 = arith.mulf %18, %30 : vector<1x128xf32>
      %33 = arith.subf %31, %32 : vector<1x128xf32>
      %34 = vector.broadcast %30 : vector<1x128xf32> to vector<578x128xf32>
      %35 = arith.mulf %14, %34 : vector<578x128xf32>
      %36 = vector.broadcast %33 : vector<1x128xf32> to vector<578x128xf32>
      %37 = arith.addf %35, %36 : vector<578x128xf32>
      %cst_22 = arith.constant 0.000000e+00 : f32
      %38 = vector.broadcast %cst_22 : f32 to vector<578x128xf32>
      %39 = arith.maximumf %37, %38 : vector<578x128xf32>
      %40 = arith.truncf %39 : vector<578x128xf32> to vector<578x128xbf16>
      %c0_23 = arith.constant 0 : index
      %c0_24 = arith.constant 0 : index
      %41 = vector.load %arg6[%c0_23, %c0_24] : memref<578x128xbf16, #tpu.memory_space<vmem>>, vector<578x128xbf16>
      tpu.vector_store %arg6[%c0_23, %c0_24], %40 {strides = array<i32>} : memref<578x128xbf16, #tpu.memory_space<vmem>>, vector<578x128xbf16>,
    } else {
    }
    return
  }
  func.func @transform_0(%arg0: i32, %arg1: i32) -> (i32, i32, i32) {
    %c0_i32 = arith.constant 0 : i32
    %c0_i32_0 = arith.constant 0 : i32
    %c0_i32_1 = arith.constant 0 : i32
    return %arg1, %c0_i32, %c0_i32_0 : i32, i32, i32
  }
  func.func @transform_1(%arg0: i32, %arg1: i32) -> (i32, i32, i32) {
    %c0_i32 = arith.constant 0 : i32
    %c0_i32_0 = arith.constant 0 : i32
    return %arg1, %c0_i32, %arg0 : i32, i32, i32
  }
  func.func @transform_2(%arg0: i32, %arg1: i32) -> (i32, i32) {
    %c0_i32 = arith.constant 0 : i32
    %c0_i32_0 = arith.constant 0 : i32
    return %c0_i32, %arg0 : i32, i32
  }
  func.func @transform_3(%arg0: i32, %arg1: i32) -> (i32, i32) {
    %c0_i32 = arith.constant 0 : i32
    %c0_i32_0 = arith.constant 0 : i32
    return %c0_i32, %arg0 : i32, i32
  }
  func.func @transform_4(%arg0: i32, %arg1: i32) -> (i32, i32) {
    %c0_i32 = arith.constant 0 : i32
    %c0_i32_0 = arith.constant 0 : i32
    return %c0_i32, %arg0 : i32, i32
  }
}

module attributes {stable_mosaic.version = 11 : i64} {
  func.func @conv_bn_relu_kernel(%arg0: i32, %arg1: i32, %arg2: memref<1x128x128xbf16, #tpu.memory_space<vmem>>, %arg3: memref<1x128x128xbf16, #tpu.memory_space<vmem>>, %arg4: memref<1x128xf32, #tpu.memory_space<vmem>>, %arg5: memref<1x128xf32, #tpu.memory_space<vmem>>, %arg6: memref<128x128xf32, #tpu.memory_space<vmem>>, %arg7: memref<128x128xf32, #tpu.memory_space<vmem>>) attributes {dimension_semantics = [#tpu.dimension_semantics<parallel>, #tpu.dimension_semantics<arbitrary>], iteration_bounds = array<i64: 1, 9>, scalar_prefetch = 0 : i64, scratch_operands = 1 : i64, tpu.core_type = #tpu.core_type<tc>, window_params = [{transform_indices = @transform_0, window_bounds = array<i64: 1, 128, 128>}, {transform_indices = @transform_1, window_bounds = array<i64: 1, 128, 128>}, {transform_indices = @transform_2, window_bounds = array<i64: 1, 128>}, {transform_indices = @transform_3, window_bounds = array<i64: 1, 128>}, {transform_indices = @transform_4, window_bounds = array<i64: 128, 128>}]} {
    %c0_i32 = arith.constant 0 : i32
    %0 = arith.cmpi eq, %arg1, %c0_i32 : i32
    %1 = arith.extui %0 : i1 to i32
    %c0_i32_0 = arith.constant 0 : i32
    %2 = arith.cmpi ne, %1, %c0_i32_0 : i32
    scf.if %2 {
      %cst_11 = arith.constant 0.000000e+00 : f32
      %14 = vector.broadcast %cst_11 : f32 to vector<128x128xf32>
      %c0_12 = arith.constant 0 : index
      %c0_13 = arith.constant 0 : index
      %15 = vector.load %arg7[%c0_12, %c0_13] : memref<128x128xf32, #tpu.memory_space<vmem>>, vector<128x128xf32>
      tpu.vector_store %arg7[%c0_12, %c0_13], %14 {strides = array<i32>} : memref<128x128xf32, #tpu.memory_space<vmem>>, vector<128x128xf32>,
    } else {
    }
    %c0 = arith.constant 0 : index
    %c0_1 = arith.constant 0 : index
    %3 = vector.load %arg7[%c0, %c0_1] : memref<128x128xf32, #tpu.memory_space<vmem>>, vector<128x128xf32>
    %c0_2 = arith.constant 0 : index
    %c0_3 = arith.constant 0 : index
    %c0_4 = arith.constant 0 : index
    %4 = vector.load %arg2[%c0_2, %c0_3, %c0_4] : memref<1x128x128xbf16, #tpu.memory_space<vmem>>, vector<1x128x128xbf16>
    %5 = vector.shape_cast %4 : vector<1x128x128xbf16> to vector<128x128xbf16>
    %c0_5 = arith.constant 0 : index
    %c0_6 = arith.constant 0 : index
    %c0_7 = arith.constant 0 : index
    %6 = vector.load %arg3[%c0_5, %c0_6, %c0_7] : memref<1x128x128xbf16, #tpu.memory_space<vmem>>, vector<1x128x128xbf16>
    %7 = vector.shape_cast %6 : vector<1x128x128xbf16> to vector<128x128xbf16>
    %cst = arith.constant dense<0.000000e+00> : vector<128x128xf32>
    %8 = tpu.matmul %5, %7, %cst {dimension_numbers = #tpu.dot_dimension_numbers<[1], [0], [0], [1], [0, 0, 1, 1], [], []>} : vector<128x128xbf16>, vector<128x128xbf16>, vector<128x128xf32> -> vector<128x128xf32>
    %9 = arith.addf %3, %8 : vector<128x128xf32>
    %c0_8 = arith.constant 0 : index
    %c0_9 = arith.constant 0 : index
    %10 = vector.load %arg7[%c0_8, %c0_9] : memref<128x128xf32, #tpu.memory_space<vmem>>, vector<128x128xf32>
    tpu.vector_store %arg7[%c0_8, %c0_9], %9 {strides = array<i32>} : memref<128x128xf32, #tpu.memory_space<vmem>>, vector<128x128xf32>,
    %c8_i32 = arith.constant 8 : i32
    %11 = arith.cmpi eq, %arg1, %c8_i32 : i32
    %12 = arith.extui %11 : i1 to i32
    %c0_i32_10 = arith.constant 0 : i32
    %13 = arith.cmpi ne, %12, %c0_i32_10 : i32
    scf.if %13 {
      %c0_11 = arith.constant 0 : index
      %c0_12 = arith.constant 0 : index
      %14 = vector.load %arg7[%c0_11, %c0_12] : memref<128x128xf32, #tpu.memory_space<vmem>>, vector<128x128xf32>
      %cst_13 = arith.constant dense<0.000000e+00> : vector<128xf32>
      %15 = vector.multi_reduction <add>, %14, %cst_13 [0] : vector<128x128xf32> to vector<128xf32>
      %16 = vector.shape_cast %15 : vector<128xf32> to vector<1x128xf32>
      %cst_14 = arith.constant 1.280000e+02 : f32
      %17 = vector.broadcast %cst_14 : f32 to vector<1x128xf32>
      %18 = arith.divf %16, %17 : vector<1x128xf32>
      %19 = vector.broadcast %18 : vector<1x128xf32> to vector<128x128xf32>
      %20 = arith.subf %14, %19 : vector<128x128xf32>
      %21 = arith.mulf %20, %20 : vector<128x128xf32>
      %cst_15 = arith.constant dense<0.000000e+00> : vector<128xf32>
      %22 = vector.multi_reduction <add>, %21, %cst_15 [0] : vector<128x128xf32> to vector<128xf32>
      %23 = vector.shape_cast %22 : vector<128xf32> to vector<1x128xf32>
      %cst_16 = arith.constant 1.280000e+02 : f32
      %24 = vector.broadcast %cst_16 : f32 to vector<1x128xf32>
      %25 = arith.divf %23, %24 : vector<1x128xf32>
      %c0_17 = arith.constant 0 : index
      %c0_18 = arith.constant 0 : index
      %26 = vector.load %arg4[%c0_17, %c0_18] : memref<1x128xf32, #tpu.memory_space<vmem>>, vector<1x128xf32>
      %cst_19 = arith.constant 9.99999974E-6 : f32
      %27 = vector.broadcast %cst_19 : f32 to vector<1x128xf32>
      %28 = arith.addf %25, %27 : vector<1x128xf32>
      %29 = math.rsqrt %28 : vector<1x128xf32>
      %30 = arith.mulf %26, %29 : vector<1x128xf32>
      %c0_20 = arith.constant 0 : index
      %c0_21 = arith.constant 0 : index
      %31 = vector.load %arg5[%c0_20, %c0_21] : memref<1x128xf32, #tpu.memory_space<vmem>>, vector<1x128xf32>
      %32 = arith.mulf %18, %30 : vector<1x128xf32>
      %33 = arith.subf %31, %32 : vector<1x128xf32>
      %34 = vector.broadcast %30 : vector<1x128xf32> to vector<128x128xf32>
      %35 = arith.mulf %14, %34 : vector<128x128xf32>
      %36 = vector.broadcast %33 : vector<1x128xf32> to vector<128x128xf32>
      %37 = arith.addf %35, %36 : vector<128x128xf32>
      %cst_22 = arith.constant 0.000000e+00 : f32
      %38 = vector.broadcast %cst_22 : f32 to vector<128x128xf32>
      %39 = arith.maximumf %37, %38 : vector<128x128xf32>
      %c0_23 = arith.constant 0 : index
      %c0_24 = arith.constant 0 : index
      %40 = vector.load %arg6[%c0_23, %c0_24] : memref<128x128xf32, #tpu.memory_space<vmem>>, vector<128x128xf32>
      tpu.vector_store %arg6[%c0_23, %c0_24], %39 {strides = array<i32>} : memref<128x128xf32, #tpu.memory_space<vmem>>, vector<128x128xf32>,
    } else {
    }
    return
  }
  func.func @transform_0(%arg0: i32, %arg1: i32) -> (i32, i32, i32) {
    %c0_i32 = arith.constant 0 : i32
    %c0_i32_0 = arith.constant 0 : i32
    %c0_i32_1 = arith.constant 0 : i32
    return %arg1, %c0_i32, %c0_i32_0 : i32, i32, i32
  }
  func.func @transform_1(%arg0: i32, %arg1: i32) -> (i32, i32, i32) {
    %c0_i32 = arith.constant 0 : i32
    %c0_i32_0 = arith.constant 0 : i32
    return %arg1, %c0_i32, %arg0 : i32, i32, i32
  }
  func.func @transform_2(%arg0: i32, %arg1: i32) -> (i32, i32) {
    %c0_i32 = arith.constant 0 : i32
    %c0_i32_0 = arith.constant 0 : i32
    return %c0_i32, %arg0 : i32, i32
  }
  func.func @transform_3(%arg0: i32, %arg1: i32) -> (i32, i32) {
    %c0_i32 = arith.constant 0 : i32
    %c0_i32_0 = arith.constant 0 : i32
    return %c0_i32, %arg0 : i32, i32
  }
  func.func @transform_4(%arg0: i32, %arg1: i32) -> (i32, i32) {
    %c0_i32 = arith.constant 0 : i32
    %c0_i32_0 = arith.constant 0 : i32
    return %c0_i32, %arg0 : i32, i32
  }
}

module attributes {stable_mosaic.version = 11 : i64} {
  func.func @conv_bn_relu_kernel(%arg0: i32, %arg1: i32, %arg2: memref<1x128x128xbf16, #tpu.memory_space<vmem>>, %arg3: memref<1x128x128xbf16, #tpu.memory_space<vmem>>, %arg4: memref<1x128xf32, #tpu.memory_space<vmem>>, %arg5: memref<1x128xf32, #tpu.memory_space<vmem>>, %arg6: memref<128x128xf32, #tpu.memory_space<vmem>>, %arg7: memref<128x128xf32, #tpu.memory_space<vmem>>) attributes {dimension_semantics = [#tpu.dimension_semantics<parallel>, #tpu.dimension_semantics<arbitrary>], iteration_bounds = array<i64: 3, 9>, scalar_prefetch = 0 : i64, scratch_operands = 1 : i64, tpu.core_type = #tpu.core_type<tc>, window_params = [{transform_indices = @transform_0, window_bounds = array<i64: 1, 128, 128>}, {transform_indices = @transform_1, window_bounds = array<i64: 1, 128, 128>}, {transform_indices = @transform_2, window_bounds = array<i64: 1, 128>}, {transform_indices = @transform_3, window_bounds = array<i64: 1, 128>}, {transform_indices = @transform_4, window_bounds = array<i64: 128, 128>}]} {
    %c0_i32 = arith.constant 0 : i32
    %0 = arith.cmpi eq, %arg1, %c0_i32 : i32
    %1 = arith.extui %0 : i1 to i32
    %c0_i32_0 = arith.constant 0 : i32
    %2 = arith.cmpi ne, %1, %c0_i32_0 : i32
    scf.if %2 {
      %cst_11 = arith.constant 0.000000e+00 : f32
      %14 = vector.broadcast %cst_11 : f32 to vector<128x128xf32>
      %c0_12 = arith.constant 0 : index
      %c0_13 = arith.constant 0 : index
      %15 = vector.load %arg7[%c0_12, %c0_13] : memref<128x128xf32, #tpu.memory_space<vmem>>, vector<128x128xf32>
      tpu.vector_store %arg7[%c0_12, %c0_13], %14 {strides = array<i32>} : memref<128x128xf32, #tpu.memory_space<vmem>>, vector<128x128xf32>,
    } else {
    }
    %c0 = arith.constant 0 : index
    %c0_1 = arith.constant 0 : index
    %3 = vector.load %arg7[%c0, %c0_1] : memref<128x128xf32, #tpu.memory_space<vmem>>, vector<128x128xf32>
    %c0_2 = arith.constant 0 : index
    %c0_3 = arith.constant 0 : index
    %c0_4 = arith.constant 0 : index
    %4 = vector.load %arg2[%c0_2, %c0_3, %c0_4] : memref<1x128x128xbf16, #tpu.memory_space<vmem>>, vector<1x128x128xbf16>
    %5 = vector.shape_cast %4 : vector<1x128x128xbf16> to vector<128x128xbf16>
    %c0_5 = arith.constant 0 : index
    %c0_6 = arith.constant 0 : index
    %c0_7 = arith.constant 0 : index
    %6 = vector.load %arg3[%c0_5, %c0_6, %c0_7] : memref<1x128x128xbf16, #tpu.memory_space<vmem>>, vector<1x128x128xbf16>
    %7 = vector.shape_cast %6 : vector<1x128x128xbf16> to vector<128x128xbf16>
    %cst = arith.constant dense<0.000000e+00> : vector<128x128xf32>
    %8 = tpu.matmul %5, %7, %cst {dimension_numbers = #tpu.dot_dimension_numbers<[1], [0], [0], [1], [0, 0, 1, 1], [], []>} : vector<128x128xbf16>, vector<128x128xbf16>, vector<128x128xf32> -> vector<128x128xf32>
    %9 = arith.addf %3, %8 : vector<128x128xf32>
    %c0_8 = arith.constant 0 : index
    %c0_9 = arith.constant 0 : index
    %10 = vector.load %arg7[%c0_8, %c0_9] : memref<128x128xf32, #tpu.memory_space<vmem>>, vector<128x128xf32>
    tpu.vector_store %arg7[%c0_8, %c0_9], %9 {strides = array<i32>} : memref<128x128xf32, #tpu.memory_space<vmem>>, vector<128x128xf32>,
    %c8_i32 = arith.constant 8 : i32
    %11 = arith.cmpi eq, %arg1, %c8_i32 : i32
    %12 = arith.extui %11 : i1 to i32
    %c0_i32_10 = arith.constant 0 : i32
    %13 = arith.cmpi ne, %12, %c0_i32_10 : i32
    scf.if %13 {
      %c0_11 = arith.constant 0 : index
      %c0_12 = arith.constant 0 : index
      %14 = vector.load %arg7[%c0_11, %c0_12] : memref<128x128xf32, #tpu.memory_space<vmem>>, vector<128x128xf32>
      %cst_13 = arith.constant dense<0.000000e+00> : vector<128xf32>
      %15 = vector.multi_reduction <add>, %14, %cst_13 [0] : vector<128x128xf32> to vector<128xf32>
      %16 = vector.shape_cast %15 : vector<128xf32> to vector<1x128xf32>
      %cst_14 = arith.constant 1.280000e+02 : f32
      %17 = vector.broadcast %cst_14 : f32 to vector<1x128xf32>
      %18 = arith.divf %16, %17 : vector<1x128xf32>
      %19 = vector.broadcast %18 : vector<1x128xf32> to vector<128x128xf32>
      %20 = arith.subf %14, %19 : vector<128x128xf32>
      %21 = arith.mulf %20, %20 : vector<128x128xf32>
      %cst_15 = arith.constant dense<0.000000e+00> : vector<128xf32>
      %22 = vector.multi_reduction <add>, %21, %cst_15 [0] : vector<128x128xf32> to vector<128xf32>
      %23 = vector.shape_cast %22 : vector<128xf32> to vector<1x128xf32>
      %cst_16 = arith.constant 1.280000e+02 : f32
      %24 = vector.broadcast %cst_16 : f32 to vector<1x128xf32>
      %25 = arith.divf %23, %24 : vector<1x128xf32>
      %c0_17 = arith.constant 0 : index
      %c0_18 = arith.constant 0 : index
      %26 = vector.load %arg4[%c0_17, %c0_18] : memref<1x128xf32, #tpu.memory_space<vmem>>, vector<1x128xf32>
      %cst_19 = arith.constant 9.99999974E-6 : f32
      %27 = vector.broadcast %cst_19 : f32 to vector<1x128xf32>
      %28 = arith.addf %25, %27 : vector<1x128xf32>
      %29 = math.rsqrt %28 : vector<1x128xf32>
      %30 = arith.mulf %26, %29 : vector<1x128xf32>
      %c0_20 = arith.constant 0 : index
      %c0_21 = arith.constant 0 : index
      %31 = vector.load %arg5[%c0_20, %c0_21] : memref<1x128xf32, #tpu.memory_space<vmem>>, vector<1x128xf32>
      %32 = arith.mulf %18, %30 : vector<1x128xf32>
      %33 = arith.subf %31, %32 : vector<1x128xf32>
      %34 = vector.broadcast %30 : vector<1x128xf32> to vector<128x128xf32>
      %35 = arith.mulf %14, %34 : vector<128x128xf32>
      %36 = vector.broadcast %33 : vector<1x128xf32> to vector<128x128xf32>
      %37 = arith.addf %35, %36 : vector<128x128xf32>
      %cst_22 = arith.constant 0.000000e+00 : f32
      %38 = vector.broadcast %cst_22 : f32 to vector<128x128xf32>
      %39 = arith.maximumf %37, %38 : vector<128x128xf32>
      %c0_23 = arith.constant 0 : index
      %c0_24 = arith.constant 0 : index
      %40 = vector.load %arg6[%c0_23, %c0_24] : memref<128x128xf32, #tpu.memory_space<vmem>>, vector<128x128xf32>
      tpu.vector_store %arg6[%c0_23, %c0_24], %39 {strides = array<i32>} : memref<128x128xf32, #tpu.memory_space<vmem>>, vector<128x128xf32>,
    } else {
    }
    return
  }
  func.func @transform_0(%arg0: i32, %arg1: i32) -> (i32, i32, i32) {
    %c0_i32 = arith.constant 0 : i32
    %c0_i32_0 = arith.constant 0 : i32
    %c0_i32_1 = arith.constant 0 : i32
    return %arg1, %c0_i32, %c0_i32_0 : i32, i32, i32
  }
  func.func @transform_1(%arg0: i32, %arg1: i32) -> (i32, i32, i32) {
    %c0_i32 = arith.constant 0 : i32
    %c0_i32_0 = arith.constant 0 : i32
    return %arg1, %c0_i32, %arg0 : i32, i32, i32
  }
  func.func @transform_2(%arg0: i32, %arg1: i32) -> (i32, i32) {
    %c0_i32 = arith.constant 0 : i32
    %c0_i32_0 = arith.constant 0 : i32
    return %c0_i32, %arg0 : i32, i32
  }
  func.func @transform_3(%arg0: i32, %arg1: i32) -> (i32, i32) {
    %c0_i32 = arith.constant 0 : i32
    %c0_i32_0 = arith.constant 0 : i32
    return %c0_i32, %arg0 : i32, i32
  }
  func.func @transform_4(%arg0: i32, %arg1: i32) -> (i32, i32) {
    %c0_i32 = arith.constant 0 : i32
    %c0_i32_0 = arith.constant 0 : i32
    return %c0_i32, %arg0 : i32, i32
  }
}

module attributes {stable_mosaic.version = 11 : i64} {
  func.func @maxpool_kernel(%arg0: i32, %arg1: memref<9x128x128xf32, #tpu.memory_space<vmem>>, %arg2: memref<128x128xf32, #tpu.memory_space<vmem>>) attributes {dimension_semantics = [#tpu.dimension_semantics<parallel>], iteration_bounds = array<i64: 1>, scalar_prefetch = 0 : i64, scratch_operands = 0 : i64, tpu.core_type = #tpu.core_type<tc>, window_params = [{transform_indices = @transform_0, window_bounds = array<i64: 9, 128, 128>}, {transform_indices = @transform_1, window_bounds = array<i64: 128, 128>}]} {
    %c0 = arith.constant 0 : index
    %c0_0 = arith.constant 0 : index
    %c0_1 = arith.constant 0 : index
    %0 = vector.load %arg1[%c0, %c0_0, %c0_1] : memref<9x128x128xf32, #tpu.memory_space<vmem>>, vector<9x128x128xf32>
    %cst = arith.constant dense<0xFF800000> : vector<128x128xf32>
    %1 = vector.multi_reduction <maximumf>, %0, %cst [0] : vector<9x128x128xf32> to vector<128x128xf32>
    %c0_2 = arith.constant 0 : index
    %c0_3 = arith.constant 0 : index
    %2 = vector.load %arg2[%c0_2, %c0_3] : memref<128x128xf32, #tpu.memory_space<vmem>>, vector<128x128xf32>
    tpu.vector_store %arg2[%c0_2, %c0_3], %1 {strides = array<i32>} : memref<128x128xf32, #tpu.memory_space<vmem>>, vector<128x128xf32>,
    return
  }
  func.func @transform_0(%arg0: i32) -> (i32, i32, i32) {
    %c0_i32 = arith.constant 0 : i32
    %c0_i32_0 = arith.constant 0 : i32
    %c0_i32_1 = arith.constant 0 : i32
    return %c0_i32, %arg0, %c0_i32_0 : i32, i32, i32
  }
  func.func @transform_1(%arg0: i32) -> (i32, i32) {
    %c0_i32 = arith.constant 0 : i32
    %c0_i32_0 = arith.constant 0 : i32
    return %arg0, %c0_i32 : i32, i32
  }
}

</mosaic_0001>

<bundles_post_ra>
// kernel: inception_block_b.7
= control target key start
LH: loop header
LB: loop body
LE: loop exit
PB: predicated region body
PF: predicated region fallthrough
CT: control target
= control target key end

     0   :  { %v2703_v0 = vmov 0.0   ;;  %vm2704_vm0 = vmmov 0   ;;  %vm1146_vm1 = vcmask 1041408   ;;  %s4264_s1 = inlined_call_operand.vmem [shape: bf16[1,128,128], index: 1, kind: input, shape index: {}]   ;;  %s4265_s0 = inlined_call_operand.vmem [shape: bf16[1,578,128], index: 0, kind: input, shape index: {}]   ;;  %s4266_s2 = inlined_call_operand.vmem [shape: f32[1,128], index: 2, kind: input, shape index: {}]   ;;  %s4267_s3 = inlined_call_operand.vmem [shape: f32[1,128], index: 3, kind: input, shape index: {}]   ;;  %s4268_s4 = inlined_call_operand.vmem [shape: bf16[578,128], index: 4, kind: output, shape index: {}]  }
   0x1   :  { %2442 = vmatprep.subr.bf16.mxu0 %v2703_v0  ;;  %94 = vst [vmem:[#allocation2 + $0x240] sm:$0x3] %v2703_v0  ;;  %v2624_v1 = vld [vmem:[%s4264_s1] sm:$0xff]   ;;  %2458 = vmatprep.mubr.msk.bf16.mxu0 %vm2704_vm0, %v2703_v0  ;;  %v2625_v2 = vld [vmem:[%s4264_s1 + $0x8] sm:$0xff]   ;;  %v2626_v3 = vld [vmem:[%s4264_s1 + $0x10] sm:$0xff]  }
   0x2   :  { %2606 = vmatprep.subr.bf16.mxu1 %v2703_v0  ;;  %2534 = vmatprep.mubr.msk.bf16.mxu1 %vm2704_vm0, %v2703_v0  ;;  %v2627_v4 = vld [vmem:[%s4264_s1 + $0x18] sm:$0xff]   ;;  %v2628_v5 = vld [vmem:[%s4264_s1 + $0x20] sm:$0xff]   ;;  %v2629_v6 = vld [vmem:[%s4264_s1 + $0x28] sm:$0xff]  }
   0x3   :  { %2443 = vmatpush3.bf16.msra.mxu0 %v2624_v1  ;;  %2614 = vmatpush3.bf16.msra.mxu1 %v2624_v1  ;;  %v2630_v7 = vld [vmem:[%s4264_s1 + $0x30] sm:$0xff]   ;;  %v2631_v8 = vld [vmem:[%s4264_s1 + $0x38] sm:$0xff]   ;;  %v2632_v9 = vld [vmem:[%s4265_s0] sm:$0xff]  }
   0x4   :  { %2444 = vmatprep.subr.bf16.mxu0 %v2703_v0  ;;  %2607 = vmatprep.subr.bf16.mxu1 %v2703_v0  ;;  %v2642_v10 = vld [vmem:[%s4265_s0 + $0x98] sm:$0xff]   ;;  %v2633_v11 = vld [vmem:[%s4265_s0 + $0x8] sm:$0xff]   ;;  %v2644_v12 = vld [vmem:[%s4265_s0 + $0xa0] sm:$0xff]  }
   0x5   :  { %v2634_v13 = vld [vmem:[%s4265_s0 + $0x10] sm:$0xff]   ;;  %v2646_v14 = vld [vmem:[%s4265_s0 + $0xa8] sm:$0xff]   ;;  %v2635_v15 = vld [vmem:[%s4265_s0 + $0x18] sm:$0xff]  }
   0x6   :  { %v2648_v16 = vld [vmem:[%s4265_s0 + $0xb0] sm:$0xff]   ;;  %v2636_v17 = vld [vmem:[%s4265_s0 + $0x20] sm:$0xff]   ;;  %v2650_v18 = vld [vmem:[%s4265_s0 + $0xb8] sm:$0xff]  }
   0x7   :  { %2445 = vmatpush3.bf16.msra.mxu0 %v2625_v2  ;;  %2615 = vmatpush3.bf16.msra.mxu1 %v2625_v2  ;;  %v2637_v19 = vld [vmem:[%s4265_s0 + $0x28] sm:$0xff]   ;;  %v2652_v20 = vld [vmem:[%s4265_s0 + $0xc0] sm:$0xff]   ;;  %v2638_v21 = vld [vmem:[%s4265_s0 + $0x30] sm:$0xff]  }
   0x8   :  { %2446 = vmatprep.subr.bf16.mxu0 %v2703_v0  ;;  %2608 = vmatprep.subr.bf16.mxu1 %v2703_v0  ;;  %v2654_v22 = vld [vmem:[%s4265_s0 + $0xc8] sm:$0xff]   ;;  %v2639_v23 = vld [vmem:[%s4265_s0 + $0x38] sm:$0xff]   ;;  %v2656_v24 = vld [vmem:[%s4265_s0 + $0xd0] sm:$0xff]  }
   0x9   :  { %v2640_v25 = vld [vmem:[%s4265_s0 + $0x40] sm:$0xff]   ;;  %v2658_v26 = vld [vmem:[%s4265_s0 + $0xd8] sm:$0xff]   ;;  %v2641_v27 = vld [vmem:[%s4265_s0 + $0x48] sm:$0xff]  }
   0xa   :  { %v2660_v28 = vld [vmem:[%s4265_s0 + $0xe0] sm:$0xff]   ;;  %v2643_v29 = vld [vmem:[%s4265_s0 + $0x50] sm:$0xff]   ;;  %v2661_v30 = vld [vmem:[%s4265_s0 + $0xe8] sm:$0xff]  }
   0xb   :  { %2447 = vmatpush3.bf16.msra.mxu0 %v2626_v3  ;;  %2616 = vmatpush3.bf16.msra.mxu1 %v2626_v3  ;;  %v2645_v31 = vld [vmem:[%s4265_s0 + $0x58] sm:$0xff]   ;;  %v2662_v32 = vld [vmem:[%s4265_s0 + $0xf0] sm:$0xff]   ;;  %v2647_v33 = vld [vmem:[%s4265_s0 + $0x60] sm:$0xff]  }
   0xc   :  { %2448 = vmatprep.subr.bf16.mxu0 %v2703_v0  ;;  %2609 = vmatprep.subr.bf16.mxu1 %v2703_v0  ;;  %v2663_v34 = vld [vmem:[%s4265_s0 + $0xf8] sm:$0xff]   ;;  %v2649_v35 = vld [vmem:[%s4265_s0 + $0x68] sm:$0xff]   ;;  %v2664_v36 = vld [vmem:[%s4265_s0 + $0x100] sm:$0xff]  }
   0xd   :  { %v2651_v37 = vld [vmem:[%s4265_s0 + $0x70] sm:$0xff]   ;;  %v2665_v38 = vld [vmem:[%s4265_s0 + $0x108] sm:$0xff]   ;;  %v2653_v39 = vld [vmem:[%s4265_s0 + $0x78] sm:$0xff]  }
   0xe   :  { %v2666_v40 = vld [vmem:[%s4265_s0 + $0x110] sm:$0xff]   ;;  %v2655_v41 = vld [vmem:[%s4265_s0 + $0x80] sm:$0xff]   ;;  %v2667_v42 = vld [vmem:[%s4265_s0 + $0x118] sm:$0xff]  }
   0xf   :  { %2449 = vmatpush3.bf16.msra.mxu0 %v2627_v4  ;;  %2617 = vmatpush3.bf16.msra.mxu1 %v2627_v4  ;;  %v2657_v43 = vld [vmem:[%s4265_s0 + $0x88] sm:$0xff]   ;;  %v2668_v44 = vld [vmem:[%s4265_s0 + $0x120] ss:$0 sps:$4 sm:$0x11]   ;;  %v2659_v45 = vld [vmem:[%s4265_s0 + $0x90] sm:$0xff]  }
  0x10   :  { %2450 = vmatprep.subr.bf16.mxu0 %v2703_v0  ;;  %2610 = vmatprep.subr.bf16.mxu1 %v2703_v0 }
  0x13   :  { %2451 = vmatpush3.bf16.msra.mxu0 %v2628_v5  ;;  %2618 = vmatpush3.bf16.msra.mxu1 %v2628_v5 }
  0x14   :  { %2452 = vmatprep.subr.bf16.mxu0 %v2703_v0  ;;  %2611 = vmatprep.subr.bf16.mxu1 %v2703_v0 }
  0x17   :  { %2453 = vmatpush3.bf16.msra.mxu0 %v2629_v6  ;;  %2619 = vmatpush3.bf16.msra.mxu1 %v2629_v6 }
  0x18   :  { %2454 = vmatprep.subr.bf16.mxu0 %v2703_v0  ;;  %2612 = vmatprep.subr.bf16.mxu1 %v2703_v0 }
  0x1b   :  { %2455 = vmatpush3.bf16.msra.mxu0 %v2630_v7  ;;  %2620 = vmatpush3.bf16.msra.mxu1 %v2630_v7 }
  0x1c   :  { %2456 = vmatprep.subr.bf16.mxu0 %v2703_v0  ;;  %2613 = vmatprep.subr.bf16.mxu1 %v2703_v0 }
  0x1f   :  { %2457 = vmatpush3.bf16.msra.mxu0 %v2631_v8  ;;  %2621 = vmatpush3.bf16.msra.mxu1 %v2631_v8 }
  0x22   :  { %2459 = vmatmul.mubr.bf16.vlgmr.msra.gmra.mrb[0].mxu0 %v2632_v9  ;;  %2535 = vmatmul.mubr.bf16.vlgmr.msra.gmra.mrb[0].mxu1 %v2642_v10 }
  0x23   :  { %2462 = vmatprep.mubr.msk.bf16.mxu0 %vm2704_vm0, %v2703_v0  ;;  %2538 = vmatprep.mubr.msk.bf16.mxu1 %vm2704_vm0, %v2703_v0 }
  0x2a   :  { %2463 = vmatmul.mubr.bf16.gmra.mrb[4].mxu0 %v2633_v11  ;;  %2539 = vmatmul.mubr.bf16.gmra.mrb[4].mxu1 %v2644_v12 }
  0x2b   :  { %2466 = vmatprep.mubr.msk.bf16.mxu0 %vm2704_vm0, %v2703_v0  ;;  %2542 = vmatprep.mubr.msk.bf16.mxu1 %vm2704_vm0, %v2703_v0 }
  0x32   :  { %2467 = vmatmul.mubr.bf16.gmra.mrb[8].mxu0 %v2634_v13  ;;  %2543 = vmatmul.mubr.bf16.gmra.mrb[8].mxu1 %v2646_v14 }
  0x33   :  { %2470 = vmatprep.mubr.msk.bf16.mxu0 %vm2704_vm0, %v2703_v0  ;;  %2546 = vmatprep.mubr.msk.bf16.mxu1 %vm2704_vm0, %v2703_v0 }
  0x3a   :  { %2471 = vmatmul.mubr.bf16.gmra.mrb[12].mxu0 %v2635_v15  ;;  %2547 = vmatmul.mubr.bf16.gmra.mrb[12].mxu1 %v2648_v16 }
  0x3b   :  { %2474 = vmatprep.mubr.msk.bf16.mxu0 %vm2704_vm0, %v2703_v0  ;;  %2550 = vmatprep.mubr.msk.bf16.mxu1 %vm2704_vm0, %v2703_v0 }
  0x42   :  { %2475 = vmatmul.mubr.bf16.gmra.mrb[16].mxu0 %v2636_v17  ;;  %2551 = vmatmul.mubr.bf16.gmra.mrb[16].mxu1 %v2650_v18 }
  0x43   :  { %2478 = vmatprep.mubr.msk.bf16.mxu0 %vm2704_vm0, %v2703_v0  ;;  %2554 = vmatprep.mubr.msk.bf16.mxu1 %vm2704_vm0, %v2703_v0 }
  0x4a   :  { %2479 = vmatmul.mubr.bf16.gmra.mrb[20].mxu0 %v2637_v19  ;;  %2555 = vmatmul.mubr.bf16.gmra.mrb[20].mxu1 %v2652_v20 }
  0x4b   :  { %2482 = vmatprep.mubr.msk.bf16.mxu0 %vm2704_vm0, %v2703_v0  ;;  %2558 = vmatprep.mubr.msk.bf16.mxu1 %vm2704_vm0, %v2703_v0 }
  0x52   :  { %2483 = vmatmul.mubr.bf16.gmra.mrb[24].mxu0 %v2638_v21  ;;  %2559 = vmatmul.mubr.bf16.gmra.mrb[24].mxu1 %v2654_v22 }
  0x53   :  { %2486 = vmatprep.mubr.msk.bf16.mxu0 %vm2704_vm0, %v2703_v0  ;;  %2562 = vmatprep.mubr.msk.bf16.mxu1 %vm2704_vm0, %v2703_v0 }
  0x5a   :  { %2487 = vmatmul.mubr.bf16.gmra.mrb[28].mxu0 %v2639_v23  ;;  %2563 = vmatmul.mubr.bf16.gmra.mrb[28].mxu1 %v2656_v24 }
  0x5b   :  { %2490 = vmatprep.mubr.msk.bf16.mxu0 %vm2704_vm0, %v2703_v0  ;;  %2566 = vmatprep.mubr.msk.bf16.mxu1 %vm2704_vm0, %v2703_v0 }
  0x62   :  { %2491 = vmatmul.mubr.bf16.gmra.mrb[32].mxu0 %v2640_v25  ;;  %2567 = vmatmul.mubr.bf16.gmra.mrb[32].mxu1 %v2658_v26 }
  0x63   :  { %2494 = vmatprep.mubr.msk.bf16.mxu0 %vm2704_vm0, %v2703_v0  ;;  %2570 = vmatprep.mubr.msk.bf16.mxu1 %vm2704_vm0, %v2703_v0 }
  0x6a   :  { %2495 = vmatmul.mubr.bf16.gmra.mrb[36].mxu0 %v2641_v27  ;;  %2571 = vmatmul.mubr.bf16.gmra.mrb[36].mxu1 %v2660_v28 }
  0x6b   :  { %2498 = vmatprep.mubr.msk.bf16.mxu0 %vm2704_vm0, %v2703_v0  ;;  %2574 = vmatprep.mubr.msk.bf16.mxu1 %vm2704_vm0, %v2703_v0 }
  0x72   :  { %2499 = vmatmul.mubr.bf16.gmra.mrb[40].mxu0 %v2643_v29  ;;  %2575 = vmatmul.mubr.bf16.gmra.mrb[40].mxu1 %v2661_v30 }
  0x73   :  { %2502 = vmatprep.mubr.msk.bf16.mxu0 %vm2704_vm0, %v2703_v0  ;;  %2578 = vmatprep.mubr.msk.bf16.mxu1 %vm2704_vm0, %v2703_v0 }
  0x7a   :  { %2503 = vmatmul.mubr.bf16.gmra.mrb[44].mxu0 %v2645_v31  ;;  %2579 = vmatmul.mubr.bf16.gmra.mrb[44].mxu1 %v2662_v32 }
  0x7b   :  { %2506 = vmatprep.mubr.msk.bf16.mxu0 %vm2704_vm0, %v2703_v0  ;;  %2582 = vmatprep.mubr.msk.bf16.mxu1 %vm2704_vm0, %v2703_v0 }
  0x82   :  { %2507 = vmatmul.mubr.bf16.gmra.mrb[48].mxu0 %v2647_v33  ;;  %2583 = vmatmul.mubr.bf16.gmra.mrb[48].mxu1 %v2663_v34 }
  0x83   :  { %2510 = vmatprep.mubr.msk.bf16.mxu0 %vm2704_vm0, %v2703_v0  ;;  %2586 = vmatprep.mubr.msk.bf16.mxu1 %vm2704_vm0, %v2703_v0 }
  0x8a   :  { %2511 = vmatmul.mubr.bf16.gmra.mrb[52].mxu0 %v2649_v35  ;;  %2587 = vmatmul.mubr.bf16.gmra.mrb[52].mxu1 %v2664_v36 }
  0x8b   :  { %2514 = vmatprep.mubr.msk.bf16.mxu0 %vm2704_vm0, %v2703_v0  ;;  %2590 = vmatprep.mubr.msk.bf16.mxu1 %vm2704_vm0, %v2703_v0 }
  0x92   :  { %2515 = vmatmul.mubr.bf16.gmra.mrb[56].mxu0 %v2651_v37  ;;  %2591 = vmatmul.mubr.bf16.gmra.mrb[56].mxu1 %v2665_v38 }
  0x93   :  { %2518 = vmatprep.mubr.msk.bf16.mxu0 %vm2704_vm0, %v2703_v0  ;;  %2594 = vmatprep.mubr.msk.bf16.mxu1 %vm2704_vm0, %v2703_v0 }
  0x9a   :  { %2519 = vmatmul.mubr.bf16.gmra.mrb[60].mxu0 %v2653_v39  ;;  %2595 = vmatmul.mubr.bf16.gmra.mrb[60].mxu1 %v2666_v40 }
  0x9b   :  { %2522 = vmatprep.mubr.msk.bf16.mxu0 %vm2704_vm0, %v2703_v0  ;;  %2598 = vmatprep.mubr.msk.bf16.mxu1 %vm2704_vm0, %v2703_v0 }
  0xa2   :  { %2523 = vmatmul.mubr.bf16.gmra.mrb[64].mxu0 %v2655_v41  ;;  %2599 = vmatmul.mubr.bf16.gmra.mrb[64].mxu1 %v2667_v42 }
  0xa3   :  { %2526 = vmatprep.mubr.msk.bf16.mxu0 %vm2704_vm0, %v2703_v0  ;;  %2602 = vmatprep.mubr.msk.bf16.mxu1 %vm2704_vm0, %v2703_v0 }
  0xaa   :  { %2527 = vmatmul.mubr.bf16.gmra.mrb[68].mxu0 %v2657_v43  ;;  %2603 = vmatmul.mubr.bf16.gmra.mrb[68].mxu1 %v2668_v44 }
  0xab   :  { %2530 = vmatprep.mubr.msk.bf16.mxu0 %vm2704_vm0, %v2703_v0 }
  0xb2   :  { %2531 = vmatmul.mubr.bf16.gmra.mrb[72].mxu0 %v2659_v45 }
  0xf5   :  { %v2956_v46 = vpop.f32.mrb[0].mxu0  ;;  %v2958_v47 = vpop.f32.mrb[0].mxu1 }
  0xf6   :  { %v2460_v48 = vpop.f32.mrb[1].mxu0  ;;  %v2536_v49 = vpop.f32.mrb[1].mxu1  ;;  %926 = vst [vmem:[#allocation2] sm:$0xff] %v2956_v46  ;;  %964 = vst [vmem:[#allocation2 + $0x130] sm:$0xff] %v2958_v47 }
  0xf7   :  { %v2960_v50 = vpop.f32.mrb[2].mxu0  ;;  %v2962_v51 = vpop.f32.mrb[2].mxu1 }
  0xf8   :  { %v2461_v52 = vpop.f32.mrb[3].mxu0  ;;  %v2537_v53 = vpop.f32.mrb[3].mxu1  ;;  %927 = vst [vmem:[#allocation2 + $0x8] sm:$0xff] %v2960_v50  ;;  %965 = vst [vmem:[#allocation2 + $0x138] sm:$0xff] %v2962_v51  ;;  %v1075_v28 = vadd.f32 %v2960_v50, %v2956_v46 }
  0xfd   :  { %v2968_v54 = vpop.f32.mrb[4].mxu0  ;;  %v2970_v55 = vpop.f32.mrb[4].mxu1 }
  0xfe   :  { %v2464_v56 = vpop.f32.mrb[5].mxu0  ;;  %v2540_v57 = vpop.f32.mrb[5].mxu1  ;;  %928 = vst [vmem:[#allocation2 + $0x10] sm:$0xff] %v2968_v54  ;;  %966 = vst [vmem:[#allocation2 + $0x140] sm:$0xff] %v2970_v55  ;;  %v1076_v31 = vadd.f32 %v1075_v28, %v2968_v54 }
  0xff   :  { %v2972_v58 = vpop.f32.mrb[6].mxu0  ;;  %v2974_v59 = vpop.f32.mrb[6].mxu1 }
 0x100   :  { %v2465_v60 = vpop.f32.mrb[7].mxu0  ;;  %v2541_v61 = vpop.f32.mrb[7].mxu1  ;;  %929 = vst [vmem:[#allocation2 + $0x18] sm:$0xff] %v2972_v58  ;;  %967 = vst [vmem:[#allocation2 + $0x148] sm:$0xff] %v2974_v59  ;;  %v1077_v34 = vadd.f32 %v1076_v31, %v2972_v58 }
 0x105   :  { %v2980_v62 = vpop.f32.mrb[8].mxu0  ;;  %v2982_v63 = vpop.f32.mrb[8].mxu1 }
 0x106   :  { %v2468_v0 = vpop.f32.mrb[9].mxu0  ;;  %v2544_v1 = vpop.f32.mrb[9].mxu1  ;;  %930 = vst [vmem:[#allocation2 + $0x20] sm:$0xff] %v2980_v62  ;;  %968 = vst [vmem:[#allocation2 + $0x150] sm:$0xff] %v2982_v63  ;;  %v1078_v39 = vadd.f32 %v1077_v34, %v2980_v62 }
 0x107   :  { %v2984_v2 = vpop.f32.mrb[10].mxu0  ;;  %v2986_v3 = vpop.f32.mrb[10].mxu1 }
 0x108   :  { %v2469_v4 = vpop.f32.mrb[11].mxu0  ;;  %v2545_v5 = vpop.f32.mrb[11].mxu1  ;;  %931 = vst [vmem:[#allocation2 + $0x28] sm:$0xff] %v2984_v2  ;;  %969 = vst [vmem:[#allocation2 + $0x158] sm:$0xff] %v2986_v3  ;;  %v1079_v42 = vadd.f32 %v1078_v39, %v2984_v2 }
 0x10d   :  { %v2992_v6 = vpop.f32.mrb[12].mxu0  ;;  %v2994_v7 = vpop.f32.mrb[12].mxu1 }
 0x10e   :  { %v2472_v8 = vpop.f32.mrb[13].mxu0  ;;  %v2548_v9 = vpop.f32.mrb[13].mxu1  ;;  %932 = vst [vmem:[#allocation2 + $0x30] sm:$0xff] %v2992_v6  ;;  %970 = vst [vmem:[#allocation2 + $0x160] sm:$0xff] %v2994_v7  ;;  %v1080_v45 = vadd.f32 %v1079_v42, %v2992_v6 }
 0x10f   :  { %v2996_v10 = vpop.f32.mrb[14].mxu0  ;;  %v2998_v11 = vpop.f32.mrb[14].mxu1 }
 0x110   :  { %v2473_v12 = vpop.f32.mrb[15].mxu0  ;;  %v2549_v13 = vpop.f32.mrb[15].mxu1  ;;  %933 = vst [vmem:[#allocation2 + $0x38] sm:$0xff] %v2996_v10  ;;  %971 = vst [vmem:[#allocation2 + $0x168] sm:$0xff] %v2998_v11  ;;  %v1081_v60 = vadd.f32 %v1080_v45, %v2996_v10 }
 0x115   :  { %v3004_v14 = vpop.f32.mrb[16].mxu0  ;;  %v3006_v15 = vpop.f32.mrb[16].mxu1 }
 0x116   :  { %v2476_v16 = vpop.f32.mrb[17].mxu0  ;;  %v2552_v17 = vpop.f32.mrb[17].mxu1  ;;  %934 = vst [vmem:[#allocation2 + $0x40] sm:$0xff] %v3004_v14  ;;  %972 = vst [vmem:[#allocation2 + $0x170] sm:$0xff] %v3006_v15  ;;  %v1082_v61 = vadd.f32 %v1081_v60, %v3004_v14 }
 0x117   :  { %v3008_v18 = vpop.f32.mrb[18].mxu0  ;;  %v3010_v19 = vpop.f32.mrb[18].mxu1 }
 0x118   :  { %v2477_v20 = vpop.f32.mrb[19].mxu0  ;;  %v2553_v21 = vpop.f32.mrb[19].mxu1  ;;  %935 = vst [vmem:[#allocation2 + $0x48] sm:$0xff] %v3008_v18  ;;  %973 = vst [vmem:[#allocation2 + $0x178] sm:$0xff] %v3010_v19  ;;  %v1083_v12 = vadd.f32 %v1082_v61, %v3008_v18 }
 0x11d   :  { %v3016_v22 = vpop.f32.mrb[20].mxu0  ;;  %v3018_v23 = vpop.f32.mrb[20].mxu1 }
 0x11e   :  { %v2480_v24 = vpop.f32.mrb[21].mxu0  ;;  %v2556_v25 = vpop.f32.mrb[21].mxu1  ;;  %936 = vst [vmem:[#allocation2 + $0x50] sm:$0xff] %v3016_v22  ;;  %974 = vst [vmem:[#allocation2 + $0x180] sm:$0xff] %v3018_v23  ;;  %v1084_v17 = vadd.f32 %v1083_v12, %v3016_v22 }
 0x11f   :  { %v3020_v26 = vpop.f32.mrb[22].mxu0  ;;  %v3022_v27 = vpop.f32.mrb[22].mxu1 }
 0x120   :  { %v2481_v29 = vpop.f32.mrb[23].mxu0  ;;  %v2557_v30 = vpop.f32.mrb[23].mxu1  ;;  %937 = vst [vmem:[#allocation2 + $0x58] sm:$0xff] %v3020_v26  ;;  %975 = vst [vmem:[#allocation2 + $0x188] sm:$0xff] %v3022_v27  ;;  %v1085_v24 = vadd.f32 %v1084_v17, %v3020_v26 }
 0x125   :  { %v3031_v32 = vpop.f32.mrb[24].mxu0  ;;  %v3033_v33 = vpop.f32.mrb[24].mxu1 }
 0x126   :  { %4352 = vst [vmem:[#allocation3_spill] sm:$0xff] %v3031_v32  ;;  %v2484_v35 = vpop.f32.mrb[25].mxu0  ;;  %v2560_v36 = vpop.f32.mrb[25].mxu1  ;;  %938 = vst [vmem:[#allocation2 + $0x60] sm:$0xff] %v3031_v32  ;;  %v1086_v31 = vadd.f32 %v1085_v24, %v3031_v32 }
 0x127   :  { %v3036_v37 = vpop.f32.mrb[26].mxu0  ;;  %v3038_v38 = vpop.f32.mrb[26].mxu1  ;;  %976 = vst [vmem:[#allocation2 + $0x190] sm:$0xff] %v3033_v33 }
 0x128   :  { %4353 = vst [vmem:[#allocation4_spill] sm:$0xff] %v3036_v37  ;;  %v2485_v40 = vpop.f32.mrb[27].mxu0  ;;  %v2561_v41 = vpop.f32.mrb[27].mxu1  ;;  %939 = vst [vmem:[#allocation2 + $0x68] sm:$0xff] %v3036_v37  ;;  %v1087_v36 = vadd.f32 %v1086_v31, %v3036_v37 }
 0x129   :  { %977 = vst [vmem:[#allocation2 + $0x198] sm:$0xff] %v3038_v38 }
 0x12d   :  { %v3046_v43 = vpop.f32.mrb[28].mxu0  ;;  %v3048_v44 = vpop.f32.mrb[28].mxu1 }
 0x12e   :  { %4354 = vst [vmem:[#allocation5_spill] sm:$0xff] %v3046_v43  ;;  %v2488_v48 = vpop.f32.mrb[29].mxu0  ;;  %v2564_v49 = vpop.f32.mrb[29].mxu1  ;;  %978 = vst [vmem:[#allocation2 + $0x1a0] sm:$0xff] %v3048_v44  ;;  %v1088_v41 = vadd.f32 %v1087_v36, %v3046_v43 }
 0x12f   :  { %v3051_v52 = vpop.f32.mrb[30].mxu0  ;;  %v3053_v53 = vpop.f32.mrb[30].mxu1 }
 0x130   :  { %4355 = vst [vmem:[#allocation6_spill] sm:$0xff] %v3051_v52  ;;  %v2489_v56 = vpop.f32.mrb[31].mxu0  ;;  %v2565_v57 = vpop.f32.mrb[31].mxu1  ;;  %979 = vst [vmem:[#allocation2 + $0x1a8] sm:$0xff] %v3053_v53  ;;  %v1089_v60 = vadd.f32 %v1088_v41, %v3051_v52 }
 0x135   :  { %v3059_v0 = vpop.f32.mrb[32].mxu0  ;;  %v3061_v1 = vpop.f32.mrb[32].mxu1 }
 0x136   :  { %4356 = vst [vmem:[#allocation7_spill] sm:$0xff] %v3059_v0  ;;  %v2492_v4 = vpop.f32.mrb[33].mxu0  ;;  %v2568_v5 = vpop.f32.mrb[33].mxu1  ;;  %980 = vst [vmem:[#allocation2 + $0x1b0] sm:$0xff] %v3061_v1  ;;  %v1090_v61 = vadd.f32 %v1089_v60, %v3059_v0 }
 0x137   :  { %v3063_v8 = vpop.f32.mrb[34].mxu0  ;;  %v3065_v9 = vpop.f32.mrb[34].mxu1 }
 0x138   :  { %4357 = vst [vmem:[#allocation8_spill] sm:$0xff] %v3063_v8  ;;  %v2493_v13 = vpop.f32.mrb[35].mxu0  ;;  %v2569_v16 = vpop.f32.mrb[35].mxu1  ;;  %981 = vst [vmem:[#allocation2 + $0x1b8] sm:$0xff] %v3065_v9  ;;  %v1091_v24 = vadd.f32 %v1090_v61, %v3063_v8 }
 0x13d   :  { %v3071_v20 = vpop.f32.mrb[36].mxu0  ;;  %v3073_v21 = vpop.f32.mrb[36].mxu1 }
 0x13e   :  { %4358 = vst [vmem:[#allocation9_spill] sm:$0xff] %v3071_v20  ;;  %v2496_v25 = vpop.f32.mrb[37].mxu0  ;;  %v2572_v28 = vpop.f32.mrb[37].mxu1  ;;  %v1092_v31 = vadd.f32 %v1091_v24, %v3071_v20 }
 0x13f   :  { %v3076_v29 = vpop.f32.mrb[38].mxu0  ;;  %v3078_v30 = vpop.f32.mrb[38].mxu1 }
 0x140   :  { %4359 = vst [vmem:[#allocation10_spill] sm:$0xff] %v3076_v29  ;;  %v2497_v34 = vpop.f32.mrb[39].mxu0  ;;  %v2573_v35 = vpop.f32.mrb[39].mxu1  ;;  %v1093_v36 = vadd.f32 %v1092_v31, %v3076_v29 }
 0x145   :  { %v3082_v39 = vpop.f32.mrb[40].mxu0  ;;  %v3084_v40 = vpop.f32.mrb[40].mxu1 }
 0x146   :  { %4360 = vst [vmem:[#allocation11_spill] sm:$0xff] %v3082_v39  ;;  %v2500_v42 = vpop.f32.mrb[41].mxu0  ;;  %v2576_v45 = vpop.f32.mrb[41].mxu1 }
 0x147   :  { %v3087_v48 = vpop.f32.mrb[42].mxu0  ;;  %v3089_v49 = vpop.f32.mrb[42].mxu1 }
 0x148   :  { %4361 = vst [vmem:[#allocation12_spill] sm:$0xff] %v3087_v48  ;;  %v2501_v56 = vpop.f32.mrb[43].mxu0  ;;  %v2577_v57 = vpop.f32.mrb[43].mxu1 }
 0x149   :  { %v1094_v57 = vadd.f32 %v1093_v36, %v3082_v39 }
 0x14d   :  { %v3093_v4 = vpop.f32.mrb[44].mxu0  ;;  %v3095_v5 = vpop.f32.mrb[44].mxu1 }
 0x14e   :  { %4362 = vst [vmem:[#allocation13_spill] sm:$0xff] %v3093_v4  ;;  %v2504_v12 = vpop.f32.mrb[45].mxu0  ;;  %v2580_v13 = vpop.f32.mrb[45].mxu1 }
 0x14f   :  { %v3097_v16 = vpop.f32.mrb[46].mxu0  ;;  %v3099_v17 = vpop.f32.mrb[46].mxu1  ;;  %v1095_v12 = vadd.f32 %v1094_v57, %v3087_v48 }
 0x150   :  { %4363 = vst [vmem:[#allocation14_spill] sm:$0xff] %v3097_v16  ;;  %v2505_v25 = vpop.f32.mrb[47].mxu0  ;;  %v2581_v28 = vpop.f32.mrb[47].mxu1 }
 0x151   :  { %v1096_v25 = vadd.f32 %v1095_v12, %v3093_v4 }
 0x153   :  { %v1097_v36 = vadd.f32 %v1096_v25, %v3097_v16 }
 0x155   :  { %v3103_v34 = vpop.f32.mrb[48].mxu0  ;;  %v3105_v35 = vpop.f32.mrb[48].mxu1 }
 0x156   :  { %4364 = vst [vmem:[#allocation15_spill] sm:$0xff] %v3103_v34  ;;  %v2508_v41 = vpop.f32.mrb[49].mxu0  ;;  %v2584_v42 = vpop.f32.mrb[49].mxu1 }
 0x157   :  { %v3108_v45 = vpop.f32.mrb[50].mxu0  ;;  %v3110_v56 = vpop.f32.mrb[50].mxu1 }
 0x158   :  { %4365 = vst [vmem:[#allocation16_spill] sm:$0xff] %v3108_v45  ;;  %v2509_v60 = vpop.f32.mrb[51].mxu0  ;;  %v2585_v61 = vpop.f32.mrb[51].mxu1 }
 0x159   :  { %v1098_v60 = vadd.f32 %v1097_v36, %v3103_v34 }
 0x15d   :  { %v3114_v13 = vpop.f32.mrb[52].mxu0  ;;  %v3116_v24 = vpop.f32.mrb[52].mxu1 }
 0x15e   :  { %4366 = vst [vmem:[#allocation17_spill] sm:$0xff] %v3114_v13  ;;  %v2512_v28 = vpop.f32.mrb[53].mxu0  ;;  %v2588_v31 = vpop.f32.mrb[53].mxu1 }
 0x15f   :  { %v3119_v41 = vpop.f32.mrb[54].mxu0  ;;  %v3121_v42 = vpop.f32.mrb[54].mxu1  ;;  %v1099_v28 = vadd.f32 %v1098_v60, %v3108_v45 }
 0x160   :  { %4367 = vst [vmem:[#allocation18_spill] sm:$0xff] %v3119_v41  ;;  %v2513_v29 = vpop.f32.mrb[55].mxu0  ;;  %v2589_v20 = vpop.f32.mrb[55].mxu1 }
 0x161   :  { %v1100_v20 = vadd.f32 %v1099_v28, %v3114_v13 }
 0x163   :  { %v1101_v36 = vadd.f32 %v1100_v20, %v3119_v41 }
 0x165   :  { %v3125_v61 = vpop.f32.mrb[56].mxu0  ;;  %v3127_v57 = vpop.f32.mrb[56].mxu1 }
 0x166   :  { %4368 = vst [vmem:[#allocation19_spill] sm:$0xff] %v3125_v61  ;;  %v2516_v48 = vpop.f32.mrb[57].mxu0  ;;  %v2592_v39 = vpop.f32.mrb[57].mxu1  ;;  %v1102_v0 = vadd.f32 %v1101_v36, %v3125_v61 }
 0x167   :  { %v3129_v8 = vpop.f32.mrb[58].mxu0  ;;  %v3131_v12 = vpop.f32.mrb[58].mxu1 }
 0x168   :  { %4369 = vst [vmem:[#allocation20_spill] sm:$0xff] %v3129_v8  ;;  %4370 = vst [vmem:[#allocation21_spill] sm:$0xff] %v3131_v12  ;;  %v2517_v31 = vpop.f32.mrb[59].mxu0  ;;  %v2593_v4 = vpop.f32.mrb[59].mxu1 }
 0x169   :  { %v1103_v4 = vadd.f32 %v1102_v0, %v3129_v8 }
 0x16d   :  { %v3135_v29 = vpop.f32.mrb[60].mxu0  ;;  %v3137_v25 = vpop.f32.mrb[60].mxu1 }
 0x16e   :  { %4371 = vst [vmem:[#allocation22_spill] sm:$0xff] %v3135_v29  ;;  %v2520_v34 = vpop.f32.mrb[61].mxu0  ;;  %v2596_v16 = vpop.f32.mrb[61].mxu1  ;;  %v1104_v13 = vadd.f32 %v1103_v4, %v3135_v29 }
 0x16f   :  { %v3140_v48 = vpop.f32.mrb[62].mxu0  ;;  %v3142_v39 = vpop.f32.mrb[62].mxu1 }
 0x170   :  { %4372 = vst [vmem:[#allocation23_spill] sm:$0xff] %v3140_v48  ;;  %v2521_v52 = vpop.f32.mrb[63].mxu0  ;;  %v2597_v60 = vpop.f32.mrb[63].mxu1  ;;  %v1105_v36 = vadd.f32 %v1104_v13, %v3140_v48 }
 0x171   :  { %v167_v52 = vld [vmem:[#allocation2 + $0x240] sm:$0x3] }
 0x175   :  { %v3146_v31 = vpop.f32.mrb[64].mxu0  ;;  %v3148_v28 = vpop.f32.mrb[64].mxu1 }
 0x176   :  { %4373 = vst [vmem:[#allocation24_spill] sm:$0xff] %v3146_v31  ;;  %v2524_v45 = vpop.f32.mrb[65].mxu0  ;;  %v2600_v20 = vpop.f32.mrb[65].mxu1  ;;  %v1106_v60 = vadd.f32 %v1105_v36, %v3146_v31 }
 0x177   :  { %v3151_v34 = vpop.f32.mrb[66].mxu0  ;;  %v3153_v16 = vpop.f32.mrb[66].mxu1 }
 0x178   :  { %4374 = vst [vmem:[#allocation25_spill] sm:$0xff] %v3153_v16  ;;  %v2525_v41 = vpop.f32.mrb[67].mxu0  ;;  %v2601_v43 = vpop.f32.mrb[67].mxu1  ;;  %v1107_v20 = vadd.f32 %v1106_v60, %v3151_v34 }
 0x17d   :  { %v3157_v0 = vpop.f32.mrb[68].mxu0  ;;  %v847_v8 = vpop.f32.mrb[68].mxu1 }
 0x17e   :  { %v2528_v61 = vpop.f32.mrb[69].mxu0  ;;  %v925_v37 = vadd.f32 %v847_v8, %v167_v52  ;;  %v2604_v32 = vpop.f32.mrb[69].mxu1  ;;  %v1108_v43 = vadd.f32 %v1107_v20, %v3157_v0 }
 0x17f   :  { %v3159_v4 = vpop.f32.mrb[70].mxu0  ;;  %v850_v45 = vpop.f32.mrb[70].mxu1 }
 0x180   :  { %v2529_v29 = vpop.f32.mrb[71].mxu0  ;;  %998 = vst [vmem:[#allocation2 + $0x240] sm:$0x3] %v925_v37  ;;  %v2605_v41 = vpop.f32.mrb[71].mxu1  ;;  %v1109_v36 = vadd.f32 %v1108_v43, %v3159_v4 }
 0x185   :  { %v3163_v13 = vpop.f32.mrb[72].mxu0 }
 0x186   :  { %v2532_v31 = vpop.f32.mrb[73].mxu0  ;;  %v1110_v8 = vadd.f32 %v1109_v36, %v3163_v13 }
 0x187   :  { %v3166_v48 = vpop.f32.mrb[74].mxu0 }
 0x188   :  { %v2533_v32 = vpop.f32.mrb[75].mxu0  ;;  %v1111_v61 = vadd.f32 %v1110_v8, %v3166_v48 }
 0x18a   :  { %v1112_v52 = vadd.f32 %v1111_v61, %v2958_v47 }
 0x18c   :  { %v1113_v29 = vadd.f32 %v1112_v52, %v2962_v51 }
 0x18e   :  { %v1114_v37 = vadd.f32 %v1113_v29, %v2970_v55 }
 0x190   :  { %v1115_v60 = vadd.f32 %v1114_v37, %v2974_v59 }
 0x192   :  { %v1116_v45 = vadd.f32 %v1115_v60, %v2982_v63 }
 0x194   :  { %v1117_v20 = vadd.f32 %v1116_v45, %v2986_v3 }
 0x196   :  { %v1118_v31 = vadd.f32 %v1117_v20, %v2994_v7 }
 0x198   :  { %v1119_v41 = vadd.f32 %v1118_v31, %v2998_v11 }
 0x19a   :  { %v1120_v43 = vadd.f32 %v1119_v41, %v3006_v15 }
 0x19c   :  { %v1121_v36 = vadd.f32 %v1120_v43, %v3010_v19 }
 0x19e   :  { %v1122_v8 = vadd.f32 %v1121_v36, %v3018_v23 }
 0x1a0   :  { %v1123_v32 = vadd.f32 %v1122_v8, %v3022_v27 }
 0x1a2   :  { %v1124_v61 = vadd.f32 %v1123_v32, %v3033_v33 }
 0x1a4   :  { %v1125_v52 = vadd.f32 %v1124_v61, %v3038_v38 }
 0x1a6   :  { %v1126_v29 = vadd.f32 %v1125_v52, %v3048_v44 }
 0x1a8   :  { %v1127_v37 = vadd.f32 %v1126_v29, %v3053_v53 }
 0x1aa   :  { %v1128_v60 = vadd.f32 %v1127_v37, %v3061_v1 }
 0x1ac   :  { %v1129_v45 = vadd.f32 %v1128_v60, %v3065_v9 }
 0x1ae   :  { %v1130_v20 = vadd.f32 %v1129_v45, %v3073_v21 }
 0x1b0   :  { %v1131_v31 = vadd.f32 %v1130_v20, %v3078_v30 }
 0x1b2   :  { %v1132_v41 = vadd.f32 %v1131_v31, %v3084_v40 }
 0x1b4   :  { %v1133_v43 = vadd.f32 %v1132_v41, %v3089_v49  ;;  %v3203_v41 = vld [vmem:[#allocation2 + $0x240] sm:$0x3] }
 0x1b5   :  { %4375 = vst [vmem:[#allocation26_spill] sm:$0xff] %v3203_v41 }
 0x1b6   :  { %v1134_v36 = vadd.f32 %v1133_v43, %v3095_v5 }
 0x1b8   :  { %v1135_v8 = vadd.f32 %v1134_v36, %v3099_v17  ;;  %v1147_v36 = vsel %vm1146_vm1, %v3203_v41, 0.0 }
 0x1ba   :  { %v1136_v32 = vadd.f32 %v1135_v8, %v3105_v35 }
 0x1bc   :  { %v1137_v61 = vadd.f32 %v1136_v32, %v3110_v56 }
 0x1be   :  { %v1138_v52 = vadd.f32 %v1137_v61, %v3116_v24 }
 0x1c0   :  { %v1139_v29 = vadd.f32 %v1138_v52, %v3121_v42 }
 0x1c2   :  { %v1140_v37 = vadd.f32 %v1139_v29, %v3127_v57 }
 0x1c4   :  { %v1141_v60 = vadd.f32 %v1140_v37, %v3131_v12 }
 0x1c6   :  { %v1142_v45 = vadd.f32 %v1141_v60, %v3137_v25 }
 0x1c8   :  { %v1143_v20 = vadd.f32 %v1142_v45, %v3142_v39 }
 0x1ca   :  { %v1144_v31 = vadd.f32 %v1143_v20, %v3148_v28 }
 0x1cc   :  { %v1145_v43 = vadd.f32 %v1144_v31, %v3153_v16 }
 0x1ce   :  { %v1148_v8 = vadd.f32 %v1147_v36, %v1145_v43 }
 0x1d0   :  { %v1149_v32 = vrot.slane %v1148_v8, 4 }
 0x1d2   :  { %v1150_v61 = vadd.f32 %v1149_v32, %v1148_v8 }
 0x1d4   :  { %v1151_v52 = vrot.slane %v1150_v61, 2 }
 0x1d6   :  { %v1152_v29 = vadd.f32 %v1151_v52, %v1150_v61 }
 0x1d8   :  { %v1153_v37 = vrot.slane %v1152_v29, 1 }
 0x1da   :  { %v1154_v12 = vadd.f32 %v1153_v37, %v1152_v29 }
 0x1dc   :  { %v3208_v60 = vmul.f32 0.0017301039, %v1154_v12 }
 0x1de   :  { %v1157_v45 = vsub.f32 %v2956_v46, %v3208_v60  ;;  %v1158_v20 = vsub.f32 %v2960_v50, %v3208_v60  ;;  %v1159_v31 = vsub.f32 %v2968_v54, %v3208_v60  ;;  %v1160_v43 = vsub.f32 %v2972_v58, %v3208_v60 }
 0x1df   :  { %v1161_v36 = vsub.f32 %v2980_v62, %v3208_v60  ;;  %v1162_v32 = vsub.f32 %v2984_v2, %v3208_v60  ;;  %v1163_v50 = vsub.f32 %v2992_v6, %v3208_v60  ;;  %v1164_v29 = vsub.f32 %v2996_v10, %v3208_v60 }
 0x1e0   :  { %v1230_v16 = vmul.f32 %v1157_v45, %v1157_v45  ;;  %v1231_v41 = vmul.f32 %v1158_v20, %v1158_v20  ;;  %v1232_v8 = vmul.f32 %v1159_v31, %v1159_v31  ;;  %v1233_v46 = vmul.f32 %v1160_v43, %v1160_v43 }
 0x1e1   :  { %v1234_v52 = vmul.f32 %v1161_v36, %v1161_v36  ;;  %v1235_v37 = vmul.f32 %v1162_v32, %v1162_v32  ;;  %v1165_v62 = vsub.f32 %v3004_v14, %v3208_v60  ;;  %v1236_v45 = vmul.f32 %v1163_v50, %v1163_v50 }
 0x1e2   :  { %v1303_v12 = vadd.f32 %v1231_v41, %v1230_v16  ;;  %v1166_v2 = vsub.f32 %v3008_v18, %v3208_v60  ;;  %v1237_v41 = vmul.f32 %v1164_v29, %v1164_v29  ;;  %v1167_v6 = vsub.f32 %v3016_v22, %v3208_v60 }
 0x1e3   :  { %v1238_v31 = vmul.f32 %v1165_v62, %v1165_v62  ;;  %v1168_v10 = vsub.f32 %v3020_v26, %v3208_v60 }
 0x1e4   :  { %v1304_v61 = vadd.f32 %v1303_v12, %v1232_v8  ;;  %v1239_v36 = vmul.f32 %v1166_v2, %v1166_v2  ;;  %v4376_v12 = vld [vmem:[#allocation3_spill] sm:$0xff]  ;;  %v1240_v32 = vmul.f32 %v1167_v6, %v1167_v6  ;;  %v4381_v6 = vld [vmem:[#allocation8_spill] sm:$0xff] }
 0x1e5   :  { %v1169_v14 = vsub.f32 %v4376_v12, %v3208_v60  ;;  %v1241_v50 = vmul.f32 %v1168_v10, %v1168_v10 }
 0x1e6   :  { %v1305_v54 = vadd.f32 %v1304_v61, %v1233_v46  ;;  %v4377_v61 = vld [vmem:[#allocation4_spill] sm:$0xff] }
 0x1e7   :  { %v1170_v18 = vsub.f32 %v4377_v61, %v3208_v60  ;;  %v1242_v29 = vmul.f32 %v1169_v14, %v1169_v14 }
 0x1e8   :  { %v1306_v58 = vadd.f32 %v1305_v54, %v1234_v52  ;;  %v4378_v54 = vld [vmem:[#allocation5_spill] sm:$0xff] }
 0x1e9   :  { %v1171_v22 = vsub.f32 %v4378_v54, %v3208_v60  ;;  %v1243_v62 = vmul.f32 %v1170_v18, %v1170_v18 }
 0x1ea   :  { %v1307_v16 = vadd.f32 %v1306_v58, %v1235_v37  ;;  %v4379_v58 = vld [vmem:[#allocation6_spill] sm:$0xff] }
 0x1eb   :  { %v1172_v26 = vsub.f32 %v4379_v58, %v3208_v60 }
 0x1ec   :  { %v1308_v20 = vadd.f32 %v1307_v16, %v1236_v45  ;;  %v4380_v16 = vld [vmem:[#allocation7_spill] sm:$0xff] }
 0x1ed   :  { %v1173_v2 = vsub.f32 %v4380_v16, %v3208_v60 }
 0x1ee   :  { %v1309_v43 = vadd.f32 %v1308_v20, %v1237_v41  ;;  %v1244_v41 = vmul.f32 %v1171_v22, %v1171_v22 }
 0x1ef   :  { %v1246_v12 = vmul.f32 %v1173_v2, %v1173_v2 }
 0x1f0   :  { %v1310_v8 = vadd.f32 %v1309_v43, %v1238_v31  ;;  %v1174_v31 = vsub.f32 %v4381_v6, %v3208_v60  ;;  %v1245_v43 = vmul.f32 %v1172_v26, %v1172_v26 }
 0x1f2   :  { %v1311_v46 = vadd.f32 %v1310_v8, %v1239_v36  ;;  %v4382_v36 = vld [vmem:[#allocation9_spill] sm:$0xff]  ;;  %v1247_v61 = vmul.f32 %v1174_v31, %v1174_v31 }
 0x1f3   :  { %v1175_v8 = vsub.f32 %v4382_v36, %v3208_v60 }
 0x1f4   :  { %v1312_v52 = vadd.f32 %v1311_v46, %v1240_v32  ;;  %v4383_v32 = vld [vmem:[#allocation10_spill] sm:$0xff] }
 0x1f5   :  { %v1176_v46 = vsub.f32 %v4383_v32, %v3208_v60  ;;  %v1248_v22 = vmul.f32 %v1175_v8, %v1175_v8 }
 0x1f6   :  { %v1313_v37 = vadd.f32 %v1312_v52, %v1241_v50  ;;  %v4384_v50 = vld [vmem:[#allocation11_spill] sm:$0xff] }
 0x1f7   :  { %v1177_v52 = vsub.f32 %v4384_v50, %v3208_v60  ;;  %v1249_v26 = vmul.f32 %v1176_v46, %v1176_v46 }
 0x1f8   :  { %v1314_v45 = vadd.f32 %v1313_v37, %v1242_v29  ;;  %v4385_v37 = vld [vmem:[#allocation12_spill] sm:$0xff] }
 0x1f9   :  { %v1250_v2 = vmul.f32 %v1177_v52, %v1177_v52 }
 0x1fa   :  { %v1315_v20 = vadd.f32 %v1314_v45, %v1243_v62  ;;  %v1178_v62 = vsub.f32 %v4385_v37, %v3208_v60 }
 0x1fc   :  { %v1316_v10 = vadd.f32 %v1315_v20, %v1244_v41  ;;  %v4386_v41 = vld [vmem:[#allocation13_spill] sm:$0xff]  ;;  %v1251_v31 = vmul.f32 %v1178_v62, %v1178_v62 }
 0x1fd   :  { %v1179_v20 = vsub.f32 %v4386_v41, %v3208_v60 }
 0x1fe   :  { %v1317_v14 = vadd.f32 %v1316_v10, %v1245_v43  ;;  %v4387_v10 = vld [vmem:[#allocation14_spill] sm:$0xff] }
 0x1ff   :  { %v1180_v32 = vsub.f32 %v4387_v10, %v3208_v60  ;;  %v1252_v8 = vmul.f32 %v1179_v20, %v1179_v20 }
 0x200   :  { %v1318_v18 = vadd.f32 %v1317_v14, %v1246_v12  ;;  %v4388_v14 = vld [vmem:[#allocation15_spill] sm:$0xff] }
 0x201   :  { %v1181_v50 = vsub.f32 %v4388_v14, %v3208_v60  ;;  %v1253_v46 = vmul.f32 %v1180_v32, %v1180_v32 }
 0x202   :  { %v1319_v29 = vadd.f32 %v1318_v18, %v1247_v61  ;;  %v4389_v18 = vld [vmem:[#allocation16_spill] sm:$0xff] }
 0x203   :  { %v1182_v37 = vsub.f32 %v4389_v18, %v3208_v60  ;;  %v1254_v52 = vmul.f32 %v1181_v50, %v1181_v50 }
 0x204   :  { %v1320_v45 = vadd.f32 %v1319_v29, %v1248_v22  ;;  %v4390_v29 = vld [vmem:[#allocation17_spill] sm:$0xff] }
 0x205   :  { %v1183_v41 = vsub.f32 %v4390_v29, %v3208_v60  ;;  %v1255_v62 = vmul.f32 %v1182_v37, %v1182_v37 }
 0x206   :  { %v1321_v43 = vadd.f32 %v1320_v45, %v1249_v26  ;;  %v4391_v45 = vld [vmem:[#allocation18_spill] sm:$0xff] }
 0x207   :  { %v1184_v10 = vsub.f32 %v4391_v45, %v3208_v60  ;;  %v1256_v20 = vmul.f32 %v1183_v41, %v1183_v41 }
 0x208   :  { %v1322_v12 = vadd.f32 %v1321_v43, %v1250_v2  ;;  %v4392_v43 = vld [vmem:[#allocation19_spill] sm:$0xff] }
 0x209   :  { %v1185_v14 = vsub.f32 %v4392_v43, %v3208_v60  ;;  %v1257_v32 = vmul.f32 %v1184_v10, %v1184_v10 }
 0x20a   :  { %v1323_v61 = vadd.f32 %v1322_v12, %v1251_v31  ;;  %v4393_v12 = vld [vmem:[#allocation20_spill] sm:$0xff] }
 0x20b   :  { %v1186_v18 = vsub.f32 %v4393_v12, %v3208_v60  ;;  %v1258_v50 = vmul.f32 %v1185_v14, %v1185_v14 }
 0x20c   :  { %v1324_v22 = vadd.f32 %v1323_v61, %v1252_v8  ;;  %v4394_v61 = vld [vmem:[#allocation22_spill] sm:$0xff] }
 0x20d   :  { %v1187_v29 = vsub.f32 %v4394_v61, %v3208_v60  ;;  %v1259_v37 = vmul.f32 %v1186_v18, %v1186_v18 }
 0x20e   :  { %v1325_v26 = vadd.f32 %v1324_v22, %v1253_v46  ;;  %v4395_v22 = vld [vmem:[#allocation23_spill] sm:$0xff] }
 0x20f   :  { %v1188_v45 = vsub.f32 %v4395_v22, %v3208_v60  ;;  %v1260_v41 = vmul.f32 %v1187_v29, %v1187_v29 }
 0x210   :  { %v1326_v2 = vadd.f32 %v1325_v26, %v1254_v52  ;;  %v4396_v26 = vld [vmem:[#allocation24_spill] sm:$0xff] }
 0x211   :  { %v1189_v43 = vsub.f32 %v4396_v26, %v3208_v60  ;;  %v1261_v10 = vmul.f32 %v1188_v45, %v1188_v45 }
 0x212   :  { %v1327_v31 = vadd.f32 %v1326_v2, %v1255_v62  ;;  %v1190_v2 = vsub.f32 %v3151_v34, %v3208_v60 }
 0x213   :  { %v1262_v14 = vmul.f32 %v1189_v43, %v1189_v43 }
 0x214   :  { %v1328_v8 = vadd.f32 %v1327_v31, %v1256_v20  ;;  %v1191_v31 = vsub.f32 %v3157_v0, %v3208_v60  ;;  %v1263_v18 = vmul.f32 %v1190_v2, %v1190_v2 }
 0x216   :  { %v1329_v46 = vadd.f32 %v1328_v8, %v1257_v32  ;;  %v1192_v8 = vsub.f32 %v3159_v4, %v3208_v60  ;;  %v1264_v29 = vmul.f32 %v1191_v31, %v1191_v31 }
 0x218   :  { %v1330_v52 = vadd.f32 %v1329_v46, %v1258_v50  ;;  %v1193_v46 = vsub.f32 %v3163_v13, %v3208_v60  ;;  %v1265_v45 = vmul.f32 %v1192_v8, %v1192_v8 }
 0x21a   :  { %v1331_v62 = vadd.f32 %v1330_v52, %v1259_v37  ;;  %v1194_v52 = vsub.f32 %v3166_v48, %v3208_v60  ;;  %v1266_v43 = vmul.f32 %v1193_v46, %v1193_v46 }
 0x21c   :  { %v1332_v20 = vadd.f32 %v1331_v62, %v1260_v41  ;;  %v1195_v62 = vsub.f32 %v2958_v47, %v3208_v60  ;;  %v1267_v2 = vmul.f32 %v1194_v52, %v1194_v52  ;;  %v1199_v47 = vsub.f32 %v2982_v63, %v3208_v60 }
 0x21d   :  { %v1203_v63 = vsub.f32 %v3006_v15, %v3208_v60  ;;  %v1207_v15 = vsub.f32 %v3033_v33, %v3208_v60  ;;  %v1211_v33 = vsub.f32 %v3061_v1, %v3208_v60  ;;  %v1215_v1 = vsub.f32 %v3084_v40, %v3208_v60 }
 0x21e   :  { %v1333_v32 = vadd.f32 %v1332_v20, %v1261_v10  ;;  %v1196_v20 = vsub.f32 %v2962_v51, %v3208_v60  ;;  %v1268_v31 = vmul.f32 %v1195_v62, %v1195_v62  ;;  %v1200_v51 = vsub.f32 %v2986_v3, %v3208_v60 }
 0x21f   :  { %v1204_v3 = vsub.f32 %v3010_v19, %v3208_v60  ;;  %v1208_v19 = vsub.f32 %v3038_v38, %v3208_v60  ;;  %v1212_v38 = vsub.f32 %v3065_v9, %v3208_v60  ;;  %v1216_v9 = vsub.f32 %v3089_v49, %v3208_v60 }
 0x220   :  { %v1334_v50 = vadd.f32 %v1333_v32, %v1262_v14  ;;  %v1197_v32 = vsub.f32 %v2970_v55, %v3208_v60  ;;  %v1269_v8 = vmul.f32 %v1196_v20, %v1196_v20  ;;  %v1201_v55 = vsub.f32 %v2994_v7, %v3208_v60 }
 0x221   :  { %v1205_v7 = vsub.f32 %v3018_v23, %v3208_v60  ;;  %v1209_v23 = vsub.f32 %v3048_v44, %v3208_v60  ;;  %v1213_v44 = vsub.f32 %v3073_v21, %v3208_v60 }
 0x222   :  { %v1335_v37 = vadd.f32 %v1334_v50, %v1263_v18  ;;  %v1198_v50 = vsub.f32 %v2974_v59, %v3208_v60  ;;  %v1270_v46 = vmul.f32 %v1197_v32, %v1197_v32  ;;  %v1202_v59 = vsub.f32 %v2998_v11, %v3208_v60 }
 0x223   :  { %v1274_v20 = vmul.f32 %v1201_v55, %v1201_v55  ;;  %v1206_v11 = vsub.f32 %v3022_v27, %v3208_v60  ;;  %v1210_v27 = vsub.f32 %v3053_v53, %v3208_v60  ;;  %v1214_v53 = vsub.f32 %v3078_v30, %v3208_v60 }
 0x224   :  { %v1336_v41 = vadd.f32 %v1335_v37, %v1264_v29  ;;  %v1271_v52 = vmul.f32 %v1198_v50, %v1198_v50  ;;  %v1277_v50 = vmul.f32 %v1204_v3, %v1204_v3  ;;  %v1286_v3 = vmul.f32 %v1213_v44, %v1213_v44 }
 0x226   :  { %v1337_v10 = vadd.f32 %v1336_v41, %v1265_v45  ;;  %v1272_v41 = vmul.f32 %v1199_v47, %v1199_v47 }
 0x228   :  { %v1338_v14 = vadd.f32 %v1337_v10, %v1266_v43  ;;  %v1273_v43 = vmul.f32 %v1200_v51, %v1200_v51  ;;  %v1280_v51 = vmul.f32 %v1207_v15, %v1207_v15 }
 0x22a   :  { %v1339_v18 = vadd.f32 %v1338_v14, %v1267_v2  ;;  %v1275_v14 = vmul.f32 %v1202_v59, %v1202_v59  ;;  %v1283_v59 = vmul.f32 %v1210_v27, %v1210_v27 }
 0x22c   :  { %v1340_v29 = vadd.f32 %v1339_v18, %v1268_v31  ;;  %v1276_v31 = vmul.f32 %v1203_v63, %v1203_v63 }
 0x22e   :  { %v1341_v37 = vadd.f32 %v1340_v29, %v1269_v8  ;;  %v1278_v29 = vmul.f32 %v1205_v7, %v1205_v7 }
 0x230   :  { %v1342_v45 = vadd.f32 %v1341_v37, %v1270_v46  ;;  %v1279_v46 = vmul.f32 %v1206_v11, %v1206_v11 }
 0x232   :  { %v1343_v62 = vadd.f32 %v1342_v45, %v1271_v52  ;;  %v1281_v45 = vmul.f32 %v1208_v19, %v1208_v19 }
 0x234   :  { %v1344_v10 = vadd.f32 %v1343_v62, %v1272_v41  ;;  %v1282_v41 = vmul.f32 %v1209_v23, %v1209_v23 }
 0x236   :  { %v1345_v2 = vadd.f32 %v1344_v10, %v1273_v43  ;;  %v1284_v10 = vmul.f32 %v1211_v33, %v1211_v33 }
 0x238   :  { %v1346_v32 = vadd.f32 %v1345_v2, %v1274_v20  ;;  %v1285_v20 = vmul.f32 %v1212_v38, %v1212_v38 }
 0x23a   :  { %v1347_v18 = vadd.f32 %v1346_v32, %v1275_v14  ;;  %v1287_v32 = vmul.f32 %v1214_v53, %v1214_v53 }
 0x23c   :  { %v1348_v8 = vadd.f32 %v1347_v18, %v1276_v31  ;;  %v1217_v31 = vsub.f32 %v3095_v5, %v3208_v60  ;;  %v1288_v18 = vmul.f32 %v1215_v1, %v1215_v1 }
 0x23e   :  { %v1349_v47 = vadd.f32 %v1348_v8, %v1277_v50  ;;  %v1218_v50 = vsub.f32 %v3099_v17, %v3208_v60  ;;  %v1289_v8 = vmul.f32 %v1216_v9, %v1216_v9 }
 0x240   :  { %v1350_v37 = vadd.f32 %v1349_v47, %v1278_v29  ;;  %v1219_v29 = vsub.f32 %v3105_v35, %v3208_v60  ;;  %v1290_v47 = vmul.f32 %v1217_v31, %v1217_v31 }
 0x242   :  { %v1351_v52 = vadd.f32 %v1350_v37, %v1279_v46  ;;  %v1220_v46 = vsub.f32 %v3110_v56, %v3208_v60  ;;  %v1291_v37 = vmul.f32 %v1218_v50, %v1218_v50 }
 0x244   :  { %v1352_v55 = vadd.f32 %v1351_v52, %v1280_v51  ;;  %v1221_v51 = vsub.f32 %v3116_v24, %v3208_v60  ;;  %v1292_v52 = vmul.f32 %v1219_v29, %v1219_v29 }
 0x246   :  { %v1353_v62 = vadd.f32 %v1352_v55, %v1281_v45  ;;  %v1222_v45 = vsub.f32 %v3121_v42, %v3208_v60  ;;  %v1293_v55 = vmul.f32 %v1220_v46, %v1220_v46 }
 0x248   :  { %v1354_v43 = vadd.f32 %v1353_v62, %v1282_v41  ;;  %v1223_v41 = vsub.f32 %v3127_v57, %v3208_v60  ;;  %v1294_v62 = vmul.f32 %v1221_v51, %v1221_v51  ;;  %v1295_v44 = vmul.f32 %v1222_v45, %v1222_v45 }
 0x24a   :  { %v1355_v63 = vadd.f32 %v1354_v43, %v1283_v59  ;;  %v4397_v59 = vld [vmem:[#allocation21_spill] sm:$0xff]  ;;  %v1296_v53 = vmul.f32 %v1223_v41, %v1223_v41 }
 0x24b   :  { %v1224_v43 = vsub.f32 %v4397_v59, %v3208_v60 }
 0x24c   :  { %v1356_v2 = vadd.f32 %v1355_v63, %v1284_v10  ;;  %v1225_v63 = vsub.f32 %v3137_v25, %v3208_v60 }
 0x24d   :  { %v1297_v1 = vmul.f32 %v1224_v43, %v1224_v43  ;;  %v1391_v43 = vlaneseq }
 0x24e   :  { %v1357_v14 = vadd.f32 %v1356_v2, %v1285_v20  ;;  %v1226_v2 = vsub.f32 %v3142_v39, %v3208_v60  ;;  %v1298_v9 = vmul.f32 %v1225_v63, %v1225_v63 }
 0x250   :  { %v1358_v7 = vadd.f32 %v1357_v14, %v1286_v3  ;;  %v1227_v14 = vsub.f32 %v3148_v28, %v3208_v60  ;;  %v1299_v50 = vmul.f32 %v1226_v2, %v1226_v2  ;;  %v3366_v2 = vld [vmem:[%s4267_s3] sm:$0x1] }
 0x252   :  { %v1359_v11 = vadd.f32 %v1358_v7, %v1287_v32  ;;  %v4398_v7 = vld [vmem:[#allocation26_spill] sm:$0xff] }
 0x253   :  { %v1229_v31 = vsub.f32 %v4398_v7, %v3208_v60 }
 0x254   :  { %v1360_v15 = vadd.f32 %v1359_v11, %v1288_v18  ;;  %v4399_v18 = vld [vmem:[#allocation25_spill] sm:$0xff] }
 0x255   :  { %v1228_v11 = vsub.f32 %v4399_v18, %v3208_v60 }
 0x256   :  { %v1361_v19 = vadd.f32 %v1360_v15, %v1289_v8  ;;  %v1300_v15 = vmul.f32 %v1227_v14, %v1227_v14  ;;  %v4408_v14 = vld [vmem:[#allocation18_spill] sm:$0xff] }
 0x258   :  { %v1362_v23 = vadd.f32 %v1361_v19, %v1290_v47  ;;  %v1302_v47 = vmul.f32 %v1229_v31, %v1229_v31  ;;  %v1301_v19 = vmul.f32 %v1228_v11, %v1228_v11  ;;  %v2672_v31 = vld [vmem:[#allocation2 + $0x8] sm:$0xff] }
 0x25a   :  { %v1363_v27 = vadd.f32 %v1362_v23, %v1291_v37  ;;  %v1374_v23 = vsel %vm1146_vm1, %v1302_v47, 0.0 }
 0x25c   :  { %v1364_v33 = vadd.f32 %v1363_v27, %v1292_v52 }
 0x25e   :  { %v1365_v38 = vadd.f32 %v1364_v33, %v1293_v55 }
 0x260   :  { %v1366_v10 = vadd.f32 %v1365_v38, %v1294_v62 }
 0x262   :  { %v1367_v20 = vadd.f32 %v1366_v10, %v1295_v44  ;;  %v3357_v44 = vshrl.u32 %v1391_v43, 7  ;;  %v1383_v10 = vld [vmem:[%s4266_s2] sm:$0x1] }
 0x264   :  { %v1368_v3 = vadd.f32 %v1367_v20, %v1296_v53  ;;  %v4315_v63 = vsub.s32 0, %v3357_v44 }
 0x266   :  { %v1369_v32 = vadd.f32 %v1368_v3, %v1297_v1 }
 0x268   :  { %v1370_v8 = vadd.f32 %v1369_v32, %v1298_v9  ;;  %v2671_v9 = vld [vmem:[#allocation2] sm:$0xff] }
 0x26a   :  { %v1371_v29 = vadd.f32 %v1370_v8, %v1299_v50  ;;  %v2673_v50 = vld [vmem:[#allocation2 + $0x10] sm:$0xff] }
 0x26c   :  { %v1372_v46 = vadd.f32 %v1371_v29, %v1300_v15  ;;  %v2675_v29 = vld [vmem:[#allocation2 + $0x20] sm:$0xff] }
 0x26e   :  { %v1373_v37 = vadd.f32 %v1372_v46, %v1301_v19  ;;  %v2676_v19 = vld [vmem:[#allocation2 + $0x28] sm:$0xff] }
 0x270   :  { %v1375_v51 = vadd.f32 %v1374_v23, %v1373_v37  ;;  %v2677_v37 = vld [vmem:[#allocation2 + $0x30] sm:$0xff] }
 0x272   :  { %v1376_v52 = vrot.slane %v1375_v51, 4 }
 0x274   :  { %v1377_v27 = vadd.f32 %v1376_v52, %v1375_v51  ;;  %v2678_v51 = vld [vmem:[#allocation2 + $0x38] sm:$0xff] }
 0x276   :  { %v1378_v45 = vrot.slane %v1377_v27, 2 }
 0x278   :  { %v1379_v55 = vadd.f32 %v1378_v45, %v1377_v27  ;;  %v2679_v27 = vld [vmem:[#allocation2 + $0x40] sm:$0xff] }
 0x27a   :  { %v1380_v33 = vrot.slane %v1379_v55, 1 }
 0x27c   :  { %v1381_v41 = vadd.f32 %v1380_v33, %v1379_v55  ;;  %v2680_v55 = vld [vmem:[#allocation2 + $0x48] sm:$0xff] }
 0x27e   :  { %v1382_v62 = vmul.f32 0.0017301039, %v1381_v41  ;;  %v2681_v41 = vld [vmem:[#allocation2 + $0x50] sm:$0xff] }
 0x280   :  { %v1384_v38 = vadd.f32 1e-05, %v1382_v62 }
 0x282   :  { %2669 = vrsqrt.f32 %v1384_v38  ;;  %v2682_v38 = vld [vmem:[#allocation2 + $0x58] sm:$0xff] }
 0x28c   :  { %v2670_v53 = vpop.eup %2669 }
 0x28d   :  { %v1386_v20 = vmul.f32 %v2670_v53, %v1383_v10  ;;  %v2683_v10 = vld [vmem:[#allocation2 + $0x60] sm:$0xff] }
 0x28f   :  { %v3369_v1 = vmul.f32 %v1386_v20, %v3208_v60  ;;  %v3373_v3 = vrot.slane %v1386_v20, %v4315_v63  ;;  %v2674_v60 = vld [vmem:[#allocation2 + $0x18] sm:$0xff]  ;;  %v2684_v20 = vld [vmem:[#allocation2 + $0x68] sm:$0xff] }
 0x290   :  { %v4409_v63 = vld [vmem:[#allocation19_spill] sm:$0xff] }
 0x291   :  { %v3378_v32 = vmul.f32 %v2671_v9, %v3373_v3  ;;  %v3381_v11 = vmul.f32 %v2672_v31, %v3373_v3  ;;  %v3384_v8 = vmul.f32 %v2673_v50, %v3373_v3  ;;  %v3387_v15 = vmul.f32 %v2674_v60, %v3373_v3 }
 0x292   :  { %v3390_v47 = vmul.f32 %v2675_v29, %v3373_v3  ;;  %v3393_v46 = vmul.f32 %v2676_v19, %v3373_v3  ;;  %v3396_v23 = vmul.f32 %v2677_v37, %v3373_v3  ;;  %v3399_v52 = vmul.f32 %v2678_v51, %v3373_v3  ;;  %v4400_v37 = vld [vmem:[#allocation10_spill] sm:$0xff]  ;;  %v4401_v51 = vld [vmem:[#allocation11_spill] sm:$0xff] }
 0x293   :  { %v3402_v45 = vmul.f32 %v2679_v27, %v3373_v3  ;;  %v3405_v33 = vmul.f32 %v2680_v55, %v3373_v3  ;;  %v3408_v62 = vmul.f32 %v2681_v41, %v3373_v3  ;;  %v3411_v43 = vmul.f32 %v2682_v38, %v3373_v3  ;;  %v4402_v27 = vld [vmem:[#allocation12_spill] sm:$0xff]  ;;  %v4403_v55 = vld [vmem:[#allocation13_spill] sm:$0xff]  ;;  %v4404_v41 = vld [vmem:[#allocation14_spill] sm:$0xff] }
 0x294   :  { %v3414_v53 = vmul.f32 %v2683_v10, %v3373_v3  ;;  %v3417_v9 = vmul.f32 %v2684_v20, %v3373_v3  ;;  %v3421_v31 = vmul.f32 %v3373_v3, %v4378_v54  ;;  %v3425_v50 = vmul.f32 %v3373_v3, %v4379_v58  ;;  %v4405_v38 = vld [vmem:[#allocation15_spill] sm:$0xff]  ;;  %v4406_v20 = vld [vmem:[#allocation16_spill] sm:$0xff] }
 0x295   :  { %v3429_v60 = vmul.f32 %v3373_v3, %v4380_v16  ;;  %v3433_v29 = vmul.f32 %v3373_v3, %v4381_v6  ;;  %v3437_v19 = vmul.f32 %v3373_v3, %v4382_v36  ;;  %v3441_v54 = vmul.f32 %v3373_v3, %v4400_v37 }
 0x296   :  { %v3445_v58 = vmul.f32 %v3373_v3, %v4401_v51  ;;  %v3449_v16 = vmul.f32 %v3373_v3, %v4402_v27  ;;  %v3453_v6 = vmul.f32 %v3373_v3, %v4403_v55  ;;  %v3457_v36 = vmul.f32 %v3373_v3, %v4404_v41  ;;  %v4407_v51 = vld [vmem:[#allocation17_spill] sm:$0xff] }
 0x297   :  { %v3461_v10 = vmul.f32 %v3373_v3, %v4405_v38  ;;  %v3465_v37 = vmul.f32 %v3373_v3, %v4406_v20  ;;  %v3469_v27 = vmul.f32 %v3373_v3, %v4407_v51  ;;  %v3473_v55 = vmul.f32 %v3373_v3, %v4408_v14 }
 0x298   :  { %v3477_v41 = vmul.f32 %v3373_v3, %v4409_v63  ;;  %v3481_v38 = vmul.f32 %v3373_v3, %v4393_v12  ;;  %v3485_v20 = vmul.f32 %v3373_v3, %v4394_v61  ;;  %v3489_v51 = vmul.f32 %v3373_v3, %v4395_v22 }
 0x299   :  { %v3493_v14 = vmul.f32 %v3373_v3, %v4396_v26  ;;  %v3497_v63 = vmul.f32 %v3373_v3, %v3151_v34  ;;  %v3501_v12 = vmul.f32 %v3373_v3, %v3157_v0  ;;  %v3505_v61 = vmul.f32 %v3373_v3, %v3159_v4 }
 0x29a   :  { %v3509_v22 = vmul.f32 %v3373_v3, %v3163_v13  ;;  %v3513_v26 = vmul.f32 %v3373_v3, %v3166_v48 }
 0x29b   :  { %4410 = vst [vmem:[#allocation3_spill] sm:$0xff] %v3493_v14  ;;  %4411 = vst [vmem:[#allocation4_spill] sm:$0xff] %v3497_v63  ;;  %v2685_v14 = vld [vmem:[#allocation2 + $0x130] sm:$0xff]  ;;  %v2686_v63 = vld [vmem:[#allocation2 + $0x138] sm:$0xff] }
 0x29c   :  { %4412 = vst [vmem:[#allocation5_spill] sm:$0xff] %v3501_v12  ;;  %4413 = vst [vmem:[#allocation6_spill] sm:$0xff] %v3505_v61  ;;  %v3516_v34 = vmul.f32 %v2685_v14, %v3373_v3  ;;  %v3519_v0 = vmul.f32 %v2686_v63, %v3373_v3  ;;  %v2687_v12 = vld [vmem:[#allocation2 + $0x140] sm:$0xff]  ;;  %v2688_v61 = vld [vmem:[#allocation2 + $0x148] sm:$0xff] }
 0x29d   :  { %4414 = vst [vmem:[#allocation7_spill] sm:$0xff] %v3509_v22  ;;  %4415 = vst [vmem:[#allocation8_spill] sm:$0xff] %v3513_v26  ;;  %v3522_v4 = vmul.f32 %v2687_v12, %v3373_v3  ;;  %v3525_v13 = vmul.f32 %v2688_v61, %v3373_v3  ;;  %v2689_v22 = vld [vmem:[#allocation2 + $0x150] sm:$0xff]  ;;  %v2690_v26 = vld [vmem:[#allocation2 + $0x158] sm:$0xff] }
 0x29e   :  { %4416 = vst [vmem:[#allocation9_spill] sm:$0xff] %v3516_v34  ;;  %4417 = vst [vmem:[#allocation20_spill] sm:$0xff] %v3519_v0  ;;  %v3528_v48 = vmul.f32 %v2689_v22, %v3373_v3  ;;  %v3531_v14 = vmul.f32 %v2690_v26, %v3373_v3  ;;  %v2691_v34 = vld [vmem:[#allocation2 + $0x160] sm:$0xff]  ;;  %v2692_v0 = vld [vmem:[#allocation2 + $0x168] sm:$0xff] }
 0x29f   :  { %4418 = vst [vmem:[#allocation22_spill] sm:$0xff] %v3522_v4  ;;  %4419 = vst [vmem:[#allocation23_spill] sm:$0xff] %v3525_v13  ;;  %v3534_v63 = vmul.f32 %v2691_v34, %v3373_v3  ;;  %v3537_v12 = vmul.f32 %v2692_v0, %v3373_v3  ;;  %v2693_v4 = vld [vmem:[#allocation2 + $0x170] sm:$0xff]  ;;  %v2694_v13 = vld [vmem:[#allocation2 + $0x178] sm:$0xff] }
 0x2a0   :  { %4420 = vst [vmem:[#allocation24_spill] sm:$0xff] %v3528_v48  ;;  %4421 = vst [vmem:[#allocation21_spill] sm:$0xff] %v3531_v14  ;;  %v3540_v61 = vmul.f32 %v2693_v4, %v3373_v3  ;;  %v3543_v22 = vmul.f32 %v2694_v13, %v3373_v3  ;;  %v2695_v48 = vld [vmem:[#allocation2 + $0x180] sm:$0xff]  ;;  %v2696_v14 = vld [vmem:[#allocation2 + $0x188] sm:$0xff] }
 0x2a1   :  { %4422 = vst [vmem:[#allocation26_spill] sm:$0xff] %v3534_v63  ;;  %4423 = vst [vmem:[#allocation25_spill] sm:$0xff] %v3537_v12  ;;  %v3546_v26 = vmul.f32 %v2695_v48, %v3373_v3  ;;  %v3549_v34 = vmul.f32 %v2696_v14, %v3373_v3  ;;  %v2697_v63 = vld [vmem:[#allocation2 + $0x190] sm:$0xff]  ;;  %v2698_v12 = vld [vmem:[#allocation2 + $0x198] sm:$0xff] }
 0x2a2   :  { %4424 = vst [vmem:[#allocation10_spill] sm:$0xff] %v3540_v61  ;;  %4425 = vst [vmem:[#allocation11_spill] sm:$0xff] %v3543_v22  ;;  %v3552_v0 = vmul.f32 %v2697_v63, %v3373_v3  ;;  %v3555_v4 = vmul.f32 %v2698_v12, %v3373_v3  ;;  %v2699_v61 = vld [vmem:[#allocation2 + $0x1a0] sm:$0xff]  ;;  %v2700_v22 = vld [vmem:[#allocation2 + $0x1a8] sm:$0xff]  ;;  %v3571_v12 = vmul.f32 %v3373_v3, %v3073_v21 }
 0x2a3   :  { %4426 = vst [vmem:[#allocation12_spill] sm:$0xff] %v3546_v26  ;;  %4427 = vst [vmem:[#allocation13_spill] sm:$0xff] %v3549_v34  ;;  %v3558_v13 = vmul.f32 %v2699_v61, %v3373_v3  ;;  %v3561_v48 = vmul.f32 %v2700_v22, %v3373_v3  ;;  %v2701_v26 = vld [vmem:[#allocation2 + $0x1b0] sm:$0xff]  ;;  %v2702_v34 = vld [vmem:[#allocation2 + $0x1b8] sm:$0xff]  ;;  %v3575_v61 = vmul.f32 %v3373_v3, %v3078_v30 }
 0x2a4   :  { %v3564_v14 = vmul.f32 %v2701_v26, %v3373_v3  ;;  %v3567_v63 = vmul.f32 %v2702_v34, %v3373_v3  ;;  %v3579_v22 = vmul.f32 %v3373_v3, %v3084_v40  ;;  %v3583_v26 = vmul.f32 %v3373_v3, %v3089_v49 }
 0x2a5   :  { %v3587_v34 = vmul.f32 %v3373_v3, %v3095_v5  ;;  %v3591_v21 = vmul.f32 %v3373_v3, %v3099_v17  ;;  %v3595_v30 = vmul.f32 %v3373_v3, %v3105_v35  ;;  %v3599_v40 = vmul.f32 %v3373_v3, %v3110_v56 }
 0x2a6   :  { %v3603_v49 = vmul.f32 %v3373_v3, %v3116_v24  ;;  %v3607_v5 = vmul.f32 %v3373_v3, %v3121_v42  ;;  %v3611_v17 = vmul.f32 %v3373_v3, %v3127_v57  ;;  %v3615_v35 = vmul.f32 %v3373_v3, %v4397_v59 }
 0x2a7   :  { %4428 = vst [vmem:[#allocation14_spill] sm:$0xff] %v3599_v40  ;;  %v3619_v56 = vmul.f32 %v3373_v3, %v3137_v25  ;;  %v4430_v40 = vsub.s32 0, %v3357_v44  ;;  %v4431_v24 = vsub.f32 %v3366_v2, %v3369_v1  ;;  %v3630_v42 = vmul.f32 %v3373_v3, %v3142_v39 }
 0x2a8   :  { %4429 = vst [vmem:[#allocation15_spill] sm:$0xff] %v3603_v49  ;;  %v3634_v57 = vmul.f32 %v3373_v3, %v3148_v28  ;;  %v3638_v59 = vmul.f32 %v3373_v3, %v4399_v18  ;;  %v3642_v25 = vmul.f32 %v3373_v3, %v4398_v7 }
 0x2a9   :  { %v3626_v49 = vrot.slane %v4431_v24, %v4430_v40  ;;  %v4449_v40 = vld [vmem:[#allocation6_spill] sm:$0xff]  ;;  %v4451_v24 = vld [vmem:[#allocation7_spill] sm:$0xff] }
 0x2ab   :  { %v3646_v44 = vadd.f32 %v3626_v49, %v3378_v32  ;;  %v3650_v39 = vadd.f32 %v3626_v49, %v3381_v11  ;;  %v3654_v28 = vadd.f32 %v3626_v49, %v3384_v8  ;;  %v3658_v18 = vadd.f32 %v3626_v49, %v3387_v15 }
 0x2ac   :  { %v3662_v7 = vadd.f32 %v3626_v49, %v3390_v47  ;;  %v3666_v2 = vadd.f32 %v3626_v49, %v3393_v46  ;;  %v3670_v1 = vadd.f32 %v3626_v49, %v3396_v23  ;;  %v3674_v3 = vadd.f32 %v3626_v49, %v3399_v52 }
 0x2ad   :  { %v3678_v32 = vadd.f32 %v3626_v49, %v3402_v45  ;;  %v3682_v11 = vadd.f32 %v3626_v49, %v3405_v33  ;;  %v3686_v8 = vadd.f32 %v3626_v49, %v3408_v62  ;;  %v3690_v15 = vadd.f32 %v3626_v49, %v3411_v43 }
 0x2ae   :  { %v3694_v47 = vadd.f32 %v3626_v49, %v3414_v53  ;;  %v3698_v46 = vadd.f32 %v3626_v49, %v3417_v9  ;;  %v3702_v23 = vadd.f32 %v3626_v49, %v3421_v31  ;;  %v3706_v52 = vadd.f32 %v3626_v49, %v3425_v50 }
 0x2af   :  { %v3710_v45 = vadd.f32 %v3626_v49, %v3429_v60  ;;  %v3714_v33 = vadd.f32 %v3626_v49, %v3433_v29  ;;  %v3718_v62 = vadd.f32 %v3626_v49, %v3437_v19  ;;  %v3722_v43 = vadd.f32 %v3626_v49, %v3441_v54 }
 0x2b0   :  { %v3726_v53 = vadd.f32 %v3626_v49, %v3445_v58  ;;  %v3730_v9 = vadd.f32 %v3626_v49, %v3449_v16  ;;  %v3734_v31 = vadd.f32 %v3626_v49, %v3453_v6  ;;  %v3738_v50 = vadd.f32 %v3626_v49, %v3457_v36 }
 0x2b1   :  { %v3742_v60 = vadd.f32 %v3626_v49, %v3461_v10  ;;  %v3746_v29 = vadd.f32 %v3626_v49, %v3465_v37  ;;  %v3750_v19 = vadd.f32 %v3626_v49, %v3469_v27  ;;  %v3754_v54 = vadd.f32 %v3626_v49, %v3473_v55  ;;  %v4443_v10 = vld [vmem:[#allocation3_spill] sm:$0xff]  ;;  %v4445_v27 = vld [vmem:[#allocation4_spill] sm:$0xff] }
 0x2b2   :  { %4432 = vst [vmem:[#allocation16_spill] sm:$0xff] %v3730_v9  ;;  %4433 = vst [vmem:[#allocation17_spill] sm:$0xff] %v3734_v31  ;;  %v3758_v58 = vadd.f32 %v3626_v49, %v3477_v41  ;;  %v3762_v16 = vadd.f32 %v3626_v49, %v3481_v38  ;;  %v3766_v6 = vadd.f32 %v3626_v49, %v3485_v20  ;;  %v4447_v41 = vld [vmem:[#allocation5_spill] sm:$0xff] }
 0x2b3   :  { %4434 = vst [vmem:[#allocation18_spill] sm:$0xff] %v3738_v50  ;;  %4435 = vst [vmem:[#allocation19_spill] sm:$0xff] %v3742_v60  ;;  %v3770_v36 = vadd.f32 %v3626_v49, %v3489_v51  ;;  %v3774_v37 = vadd.f32 %v3626_v49, %v4443_v10  ;;  %v3778_v55 = vadd.f32 %v3626_v49, %v4445_v27 }
 0x2b4   :  { %4436 = vst [vmem:[#allocation27_spill] sm:$0xff] %v3746_v29  ;;  %4437 = vst [vmem:[#allocation28_spill] sm:$0xff] %v3750_v19  ;;  %v3782_v38 = vadd.f32 %v3626_v49, %v4447_v41  ;;  %v3786_v20 = vadd.f32 %v3626_v49, %v4449_v40  ;;  %v3790_v51 = vadd.f32 %v3626_v49, %v4451_v24 }
 0x2b5   :  { %4438 = vst [vmem:[#allocation29_spill] sm:$0xff] %v3754_v54  ;;  %4439 = vst [vmem:[#allocation30_spill] sm:$0xff] %v3758_v58 }
 0x2b6   :  { %4440 = vst [vmem:[#allocation31_spill] sm:$0xff] %v3762_v16  ;;  %4441 = vst [vmem:[#allocation32_spill] sm:$0xff] %v3766_v6 }
 0x2b7   :  { %4442 = vst [vmem:[#allocation33_spill] sm:$0xff] %v3770_v36  ;;  %4444 = vst [vmem:[#allocation3_spill] sm:$0xff] %v3774_v37  ;;  %v4453_v36 = vld [vmem:[#allocation8_spill] sm:$0xff]  ;;  %v4455_v37 = vld [vmem:[#allocation9_spill] sm:$0xff] }
 0x2b8   :  { %4446 = vst [vmem:[#allocation4_spill] sm:$0xff] %v3778_v55  ;;  %4448 = vst [vmem:[#allocation5_spill] sm:$0xff] %v3782_v38  ;;  %v3794_v10 = vadd.f32 %v3626_v49, %v4453_v36  ;;  %v3798_v27 = vadd.f32 %v3626_v49, %v4455_v37  ;;  %v4457_v55 = vld [vmem:[#allocation20_spill] sm:$0xff]  ;;  %v4459_v38 = vld [vmem:[#allocation22_spill] sm:$0xff] }
 0x2b9   :  { %4450 = vst [vmem:[#allocation6_spill] sm:$0xff] %v3786_v20  ;;  %4452 = vst [vmem:[#allocation7_spill] sm:$0xff] %v3790_v51  ;;  %v3802_v41 = vadd.f32 %v3626_v49, %v4457_v55  ;;  %v3806_v40 = vadd.f32 %v3626_v49, %v4459_v38  ;;  %v4461_v20 = vld [vmem:[#allocation23_spill] sm:$0xff]  ;;  %v4463_v51 = vld [vmem:[#allocation24_spill] sm:$0xff] }
 0x2ba   :  { %4454 = vst [vmem:[#allocation8_spill] sm:$0xff] %v3794_v10  ;;  %4456 = vst [vmem:[#allocation9_spill] sm:$0xff] %v3798_v27  ;;  %v3810_v24 = vadd.f32 %v3626_v49, %v4461_v20  ;;  %v3814_v36 = vadd.f32 %v3626_v49, %v4463_v51  ;;  %v4465_v10 = vld [vmem:[#allocation21_spill] sm:$0xff]  ;;  %v4467_v27 = vld [vmem:[#allocation26_spill] sm:$0xff] }
 0x2bb   :  { %4458 = vst [vmem:[#allocation20_spill] sm:$0xff] %v3802_v41  ;;  %4460 = vst [vmem:[#allocation22_spill] sm:$0xff] %v3806_v40  ;;  %v3818_v37 = vadd.f32 %v3626_v49, %v4465_v10  ;;  %v3822_v55 = vadd.f32 %v3626_v49, %v4467_v27  ;;  %v4468_v41 = vld [vmem:[#allocation25_spill] sm:$0xff]  ;;  %v4469_v40 = vld [vmem:[#allocation10_spill] sm:$0xff] }
 0x2bc   :  { %4462 = vst [vmem:[#allocation23_spill] sm:$0xff] %v3810_v24  ;;  %4464 = vst [vmem:[#allocation24_spill] sm:$0xff] %v3814_v36  ;;  %v3826_v38 = vadd.f32 %v3626_v49, %v4468_v41  ;;  %v3830_v20 = vadd.f32 %v3626_v49, %v4469_v40  ;;  %v4471_v24 = vld [vmem:[#allocation11_spill] sm:$0xff]  ;;  %v4473_v36 = vld [vmem:[#allocation12_spill] sm:$0xff]  ;;  %v3846_v41 = vadd.f32 %v3626_v49, %v3552_v0 }
 0x2bd   :  { %4466 = vst [vmem:[#allocation21_spill] sm:$0xff] %v3818_v37  ;;  %v3834_v51 = vadd.f32 %v3626_v49, %v4471_v24  ;;  %v3838_v10 = vadd.f32 %v3626_v49, %v4473_v36  ;;  %v4474_v37 = vld [vmem:[#allocation13_spill] sm:$0xff]  ;;  %v3850_v40 = vadd.f32 %v3626_v49, %v3555_v4  ;;  %v3854_v24 = vadd.f32 %v3626_v49, %v3558_v13 }
 0x2be   :  { %4470 = vst [vmem:[#allocation26_spill] sm:$0xff] %v3830_v20  ;;  %v3842_v27 = vadd.f32 %v3626_v49, %v4474_v37  ;;  %v3858_v36 = vadd.f32 %v3626_v49, %v3561_v48  ;;  %v3862_v37 = vadd.f32 %v3626_v49, %v3564_v14  ;;  %v3866_v0 = vadd.f32 %v3626_v49, %v3567_v63 }
 0x2bf   :  { %4472 = vst [vmem:[#allocation25_spill] sm:$0xff] %v3834_v51  ;;  %v3870_v4 = vadd.f32 %v3626_v49, %v3571_v12  ;;  %v3874_v13 = vadd.f32 %v3626_v49, %v3575_v61  ;;  %v3878_v48 = vadd.f32 %v3626_v49, %v3579_v22  ;;  %v3882_v14 = vadd.f32 %v3626_v49, %v3583_v26  ;;  %v4490_v31 = vld [vmem:[#allocation4_spill] sm:$0xff]  ;;  %v4491_v50 = vld [vmem:[#allocation5_spill] sm:$0xff] }
 0x2c0   :  { %v3886_v63 = vadd.f32 %v3626_v49, %v3587_v34  ;;  %v3890_v12 = vadd.f32 %v3626_v49, %v3591_v21  ;;  %v3894_v61 = vadd.f32 %v3626_v49, %v3595_v30  ;;  %v3906_v34 = vadd.f32 %v3626_v49, %v3607_v5  ;;  %v4492_v60 = vld [vmem:[#allocation6_spill] sm:$0xff]  ;;  %v4493_v29 = vld [vmem:[#allocation7_spill] sm:$0xff] }
 0x2c1   :  { %4475 = vst [vmem:[#allocation10_spill] sm:$0xff] %v3870_v4  ;;  %4476 = vst [vmem:[#allocation11_spill] sm:$0xff] %v3874_v13  ;;  %v4480_v13 = vld [vmem:[#allocation14_spill] sm:$0xff]  ;;  %v3910_v21 = vadd.f32 %v3626_v49, %v3611_v17  ;;  %v3914_v30 = vadd.f32 %v3626_v49, %v3615_v35  ;;  %v3926_v5 = vadd.f32 %v3626_v49, %v3634_v57  ;;  %v4494_v19 = vld [vmem:[#allocation8_spill] sm:$0xff]  ;;  %v4510_v57 = vmax.f32 %v3654_v28, 0.0 }
 0x2c2   :  { %4477 = vst [vmem:[#allocation12_spill] sm:$0xff] %v3878_v48  ;;  %4478 = vst [vmem:[#allocation13_spill] sm:$0xff] %v3882_v14  ;;  %v3898_v22 = vadd.f32 %v3626_v49, %v4480_v13  ;;  %v4481_v48 = vld [vmem:[#allocation15_spill] sm:$0xff]  ;;  %v3918_v13 = vadd.f32 %v3626_v49, %v3619_v56  ;;  %v3930_v17 = vadd.f32 %v3626_v49, %v3638_v59  ;;  %v4495_v54 = vld [vmem:[#allocation9_spill] sm:$0xff]  ;;  %v4515_v56 = vmax.f32 %v3674_v3, 0.0 }
 0x2c3   :  { %4479 = vst [vmem:[#allocation34_spill] sm:$0xff] %v3886_v63  ;;  %v3902_v26 = vadd.f32 %v3626_v49, %v4481_v48  ;;  %4483 = vst [vmem:[#allocation15_spill] sm:$0xff] %v3914_v30  ;;  %v3922_v48 = vadd.f32 %v3626_v49, %v3630_v42  ;;  %v3934_v35 = vadd.f32 %v3626_v49, %v3642_v25  ;;  %v4496_v58 = vld [vmem:[#allocation20_spill] sm:$0xff]  ;;  %v4497_v16 = vld [vmem:[#allocation22_spill] sm:$0xff]  ;;  %v4506_v14 = vmov %v3926_v5 }
 0x2c4   :  { %4484 = vst [vmem:[#allocation35_spill] sm:$0xff] %v3918_v13  ;;  %4486 = vst [vmem:[#allocation37_spill] sm:$0xff] %v3926_v5  ;;  %v4498_v6 = vld [vmem:[#allocation23_spill] sm:$0xff]  ;;  %v4499_v30 = vld [vmem:[#allocation24_spill] sm:$0xff]  ;;  %v4504_v20 = vmov %v3918_v13  ;;  %v4507_v63 = vmov %v3930_v17  ;;  %v4508_v42 = vmax.f32 %v3646_v44, 0.0  ;;  %v4511_v5 = vmax.f32 %v3658_v18, 0.0 }
 0x2c5   :  { %4482 = vst [vmem:[#allocation14_spill] sm:$0xff] %v3902_v26  ;;  %4485 = vst [vmem:[#allocation36_spill] sm:$0xff] %v3922_v48  ;;  %v4500_v9 = vld [vmem:[#allocation21_spill] sm:$0xff]  ;;  %v1620_v13 = vmax.f32 %v3934_v35, 0.0  ;;  %v4509_v48 = vmax.f32 %v3650_v39, 0.0  ;;  %v4513_v49 = vmax.f32 %v3666_v2, 0.0 }
 0x2c6   :  { %4487 = vst [vmem:[#allocation38_spill] sm:$0xff] %v3930_v17  ;;  %v2190_v59 = vpack.c.bf16 %v4511_v5, %v4510_v57  ;;  %v4512_v17 = vmax.f32 %v3662_v7, 0.0  ;;  %v4514_v25 = vmax.f32 %v3670_v1, 0.0  ;;  %v4516_v44 = vmax.f32 %v3678_v32, 0.0 }
 0x2c7   :  { %v2185_v26 = vpack.c.bf16 %v4509_v48, %v4508_v42  ;;  %v4517_v39 = vmax.f32 %v3682_v11, 0.0  ;;  %v4518_v28 = vmax.f32 %v3686_v8, 0.0  ;;  %v4519_v18 = vmax.f32 %v3690_v15, 0.0 }
 0x2c8   :  { %v2195_v51 = vpack.c.bf16 %v4513_v49, %v4512_v17  ;;  %v2200_v35 = vpack.c.bf16 %v4515_v56, %v4514_v25  ;;  %v2181_v42 = vpack.c.bf16 %v1620_v13, %v1620_v13  ;;  %2362 = vst [vmem:[%s4268_s4 + $0x8] sm:$0xff] %v2190_v59   ;;  %v4520_v7 = vmax.f32 %v3694_v47, 0.0  ;;  %v4533_v56 = vld [vmem:[#allocation18_spill] sm:$0xff]  ;;  %v4535_v49 = vld [vmem:[#allocation19_spill] sm:$0xff] }
 0x2c9   :  { %v2205_v48 = vpack.c.bf16 %v4517_v39, %v4516_v44  ;;  %v2210_v5 = vpack.c.bf16 %v4519_v18, %v4518_v28  ;;  %2186 = vst [vmem:[%s4268_s4] sm:$0xff] %v2185_v26   ;;  %v4521_v2 = vmax.f32 %v3698_v46, 0.0  ;;  %v4522_v3 = vmax.f32 %v3702_v23, 0.0  ;;  %v4531_v26 = vld [vmem:[#allocation17_spill] sm:$0xff]  ;;  %v4543_v18 = vld [vmem:[#allocation30_spill] sm:$0xff] }
 0x2ca   :  { %v4503_v4 = vld [vmem:[#allocation15_spill] sm:$0xff]  ;;  %v4523_v32 = vmax.f32 %v3706_v52, 0.0  ;;  %v4524_v8 = vmax.f32 %v3710_v45, 0.0  ;;  %v4525_v15 = vmax.f32 %v3714_v33, 0.0  ;;  %2363 = vst [vmem:[%s4268_s4 + $0x10] sm:$0xff] %v2195_v51   ;;  %2364 = vst [vmem:[%s4268_s4 + $0x18] sm:$0xff] %v2200_v35  }
 0x2cb   :  { %v2215_v1 = vpack.c.bf16 %v4521_v2, %v4520_v7  ;;  %2365 = vst [vmem:[%s4268_s4 + $0x20] sm:$0xff] %v2205_v48   ;;  %2366 = vst [vmem:[%s4268_s4 + $0x28] sm:$0xff] %v2210_v5   ;;  %v4526_v47 = vmax.f32 %v3718_v62, 0.0  ;;  %v4527_v46 = vmax.f32 %v3722_v43, 0.0  ;;  %v4528_v52 = vmax.f32 %v3726_v53, 0.0  ;;  %v4529_v45 = vld [vmem:[#allocation16_spill] sm:$0xff] }
 0x2cc   :  { %v2220_v11 = vpack.c.bf16 %v4523_v32, %v4522_v3  ;;  %v2225_v13 = vpack.c.bf16 %v4525_v15, %v4524_v8  ;;  %v4530_v33 = vmax.f32 %v4529_v45, 0.0  ;;  %v4532_v17 = vmax.f32 %v4531_v26, 0.0  ;;  %v4537_v35 = vld [vmem:[#allocation27_spill] sm:$0xff]  ;;  %v4539_v62 = vld [vmem:[#allocation28_spill] sm:$0xff]  ;;  %v4541_v53 = vld [vmem:[#allocation29_spill] sm:$0xff] }
 0x2cd   :  { %v2230_v23 = vpack.c.bf16 %v4527_v46, %v4526_v47  ;;  %v4534_v57 = vmax.f32 %v4533_v56, 0.0  ;;  %v4536_v25 = vmax.f32 %v4535_v49, 0.0  ;;  %v4538_v44 = vmax.f32 %v4537_v35, 0.0  ;;  %2367 = vst [vmem:[%s4268_s4 + $0x30] sm:$0xff] %v2215_v1   ;;  %v4545_v7 = vld [vmem:[#allocation31_spill] sm:$0xff]  ;;  %v4547_v32 = vld [vmem:[#allocation32_spill] sm:$0xff] }
 0x2ce   :  { %v2235_v51 = vpack.c.bf16 %v4530_v33, %v4528_v52  ;;  %2368 = vst [vmem:[%s4268_s4 + $0x38] sm:$0xff] %v2220_v11   ;;  %2369 = vst [vmem:[%s4268_s4 + $0x40] sm:$0xff] %v2225_v13   ;;  %v4540_v43 = vmax.f32 %v4539_v62, 0.0  ;;  %v4542_v48 = vmax.f32 %v4541_v53, 0.0  ;;  %v4544_v5 = vmax.f32 %v4543_v18, 0.0  ;;  %v4549_v8 = vld [vmem:[#allocation33_spill] sm:$0xff] }
 0x2cf   :  { %v2240_v59 = vpack.c.bf16 %v4534_v57, %v4532_v17  ;;  %v2245_v39 = vpack.c.bf16 %v4538_v44, %v4536_v25  ;;  %v4546_v2 = vmax.f32 %v4545_v7, 0.0  ;;  %v4548_v1 = vmax.f32 %v4547_v32, 0.0  ;;  %v4551_v11 = vld [vmem:[#allocation3_spill] sm:$0xff]  ;;  %1986 = vst [vmem:[%s4268_s4 + $0x120] sm:$0x1] %v2181_v42  ;;  %2370 = vst [vmem:[%s4268_s4 + $0x48] sm:$0xff] %v2230_v23  }
 0x2d0   :  { %v2250_v28 = vpack.c.bf16 %v4542_v48, %v4540_v43  ;;  %v4550_v15 = vmax.f32 %v4549_v8, 0.0  ;;  %v4552_v46 = vmax.f32 %v4551_v11, 0.0  ;;  %v4553_v52 = vmax.f32 %v4490_v31, 0.0  ;;  %2371 = vst [vmem:[%s4268_s4 + $0x50] sm:$0xff] %v2235_v51   ;;  %v4568_v25 = vld [vmem:[#allocation25_spill] sm:$0xff]  ;;  %v4578_v18 = vld [vmem:[#allocation10_spill] sm:$0xff] }
 0x2d1   :  { %v2255_v3 = vpack.c.bf16 %v4546_v2, %v4544_v5  ;;  %2372 = vst [vmem:[%s4268_s4 + $0x58] sm:$0xff] %v2240_v59   ;;  %2373 = vst [vmem:[%s4268_s4 + $0x60] sm:$0xff] %v2245_v39   ;;  %v4554_v31 = vmax.f32 %v4491_v50, 0.0  ;;  %v4555_v42 = vmax.f32 %v4492_v60, 0.0  ;;  %v4556_v33 = vmax.f32 %v4493_v29, 0.0  ;;  %v4580_v7 = vld [vmem:[#allocation11_spill] sm:$0xff] }
 0x2d2   :  { %v2260_v47 = vpack.c.bf16 %v4550_v15, %v4548_v1  ;;  %v2265_v13 = vpack.c.bf16 %v4553_v52, %v4552_v46  ;;  %v4557_v23 = vmax.f32 %v4494_v19, 0.0  ;;  %v4558_v51 = vmax.f32 %v4495_v54, 0.0  ;;  %2374 = vst [vmem:[%s4268_s4 + $0x68] sm:$0xff] %v2250_v28   ;;  %v4591_v46 = vld [vmem:[#allocation14_spill] sm:$0xff] }
 0x2d3   :  { %v2270_v45 = vpack.c.bf16 %v4555_v42, %v4554_v31  ;;  %v4559_v17 = vmax.f32 %v4496_v58, 0.0  ;;  %v4560_v57 = vmax.f32 %v4497_v16, 0.0  ;;  %v4561_v59 = vmax.f32 %v4498_v6, 0.0  ;;  %2375 = vst [vmem:[%s4268_s4 + $0x70] sm:$0xff] %v2255_v3   ;;  %v4566_v16 = vld [vmem:[#allocation26_spill] sm:$0xff]  ;;  %v4597_v42 = vld [vmem:[#allocation36_spill] sm:$0xff] }
 0x2d4   :  { %v2275_v26 = vpack.c.bf16 %v4557_v23, %v4556_v33  ;;  %2376 = vst [vmem:[%s4268_s4 + $0x78] sm:$0xff] %v2260_v47   ;;  %2377 = vst [vmem:[%s4268_s4 + $0x80] sm:$0xff] %v2265_v13   ;;  %v4562_v50 = vmax.f32 %v4499_v30, 0.0  ;;  %v4563_v60 = vmax.f32 %v4500_v9, 0.0  ;;  %v4564_v19 = vmax.f32 %v3822_v55, 0.0 }
 0x2d5   :  { %v2280_v56 = vpack.c.bf16 %v4559_v17, %v4558_v51  ;;  %v2285_v49 = vpack.c.bf16 %v4561_v59, %v4560_v57  ;;  %v4565_v54 = vmax.f32 %v3826_v38, 0.0  ;;  %v4567_v6 = vmax.f32 %v4566_v16, 0.0  ;;  %2378 = vst [vmem:[%s4268_s4 + $0x88] sm:$0xff] %v2270_v45  }
 0x2d6   :  { %v2290_v29 = vpack.c.bf16 %v4563_v60, %v4562_v50  ;;  %v4569_v35 = vmax.f32 %v4568_v25, 0.0  ;;  %v4570_v39 = vmax.f32 %v3838_v10, 0.0  ;;  %v4571_v62 = vmax.f32 %v3842_v27, 0.0  ;;  %2379 = vst [vmem:[%s4268_s4 + $0x90] sm:$0xff] %v2275_v26  }
 0x2d7   :  { %v2295_v58 = vpack.c.bf16 %v4565_v54, %v4564_v19  ;;  %2380 = vst [vmem:[%s4268_s4 + $0x98] sm:$0xff] %v2280_v56   ;;  %2381 = vst [vmem:[%s4268_s4 + $0xa0] sm:$0xff] %v2285_v49   ;;  %v4572_v9 = vmax.f32 %v3846_v41, 0.0  ;;  %v4573_v55 = vmax.f32 %v3850_v40, 0.0  ;;  %v4574_v10 = vmax.f32 %v3854_v24, 0.0  ;;  %v4582_v41 = vld [vmem:[#allocation12_spill] sm:$0xff] }
 0x2d8   :  { %v2300_v44 = vpack.c.bf16 %v4569_v35, %v4567_v6  ;;  %v2305_v43 = vpack.c.bf16 %v4571_v62, %v4570_v39  ;;  %v4575_v27 = vmax.f32 %v3858_v36, 0.0  ;;  %v4576_v53 = vmax.f32 %v3862_v37, 0.0  ;;  %2382 = vst [vmem:[%s4268_s4 + $0xa8] sm:$0xff] %v2290_v29   ;;  %v4584_v24 = vld [vmem:[#allocation13_spill] sm:$0xff] }
 0x2d9   :  { %v2310_v38 = vpack.c.bf16 %v4573_v55, %v4572_v9  ;;  %v4577_v48 = vmax.f32 %v3866_v0, 0.0  ;;  %v4579_v5 = vmax.f32 %v4578_v18, 0.0  ;;  %v4581_v2 = vmax.f32 %v4580_v7, 0.0  ;;  %2383 = vst [vmem:[%s4268_s4 + $0xb0] sm:$0xff] %v2295_v58   ;;  %v4586_v0 = vld [vmem:[#allocation34_spill] sm:$0xff] }
 0x2da   :  { %v2315_v30 = vpack.c.bf16 %v4575_v27, %v4574_v10  ;;  %2384 = vst [vmem:[%s4268_s4 + $0xb8] sm:$0xff] %v2300_v44   ;;  %2385 = vst [vmem:[%s4268_s4 + $0xc0] sm:$0xff] %v2305_v43   ;;  %v4583_v40 = vmax.f32 %v4582_v41, 0.0  ;;  %v4585_v36 = vmax.f32 %v4584_v24, 0.0  ;;  %v4587_v32 = vmax.f32 %v4586_v0, 0.0 }
 0x2db   :  { %v2320_v28 = vpack.c.bf16 %v4577_v48, %v4576_v53  ;;  %v2325_v3 = vpack.c.bf16 %v4581_v2, %v4579_v5  ;;  %v4588_v1 = vmax.f32 %v3890_v12, 0.0  ;;  %v4589_v15 = vmax.f32 %v3894_v61, 0.0  ;;  %2386 = vst [vmem:[%s4268_s4 + $0xc8] sm:$0xff] %v2310_v38  }
 0x2dc   :  { %v2330_v37 = vpack.c.bf16 %v4585_v36, %v4583_v40  ;;  %v4590_v47 = vmax.f32 %v3898_v22, 0.0  ;;  %v4592_v52 = vmax.f32 %v4591_v46, 0.0  ;;  %v4593_v13 = vmax.f32 %v3906_v34, 0.0  ;;  %2387 = vst [vmem:[%s4268_s4 + $0xd0] sm:$0xff] %v2315_v30  }
 0x2dd   :  { %v2335_v8 = vpack.c.bf16 %v4588_v1, %v4587_v32  ;;  %2388 = vst [vmem:[%s4268_s4 + $0xd8] sm:$0xff] %v2320_v28   ;;  %2389 = vst [vmem:[%s4268_s4 + $0xe0] sm:$0xff] %v2325_v3   ;;  %v4594_v12 = vmax.f32 %v3910_v21, 0.0  ;;  %v4595_v61 = vmax.f32 %v4503_v4, 0.0  ;;  %v4596_v34 = vmax.f32 %v4504_v20, 0.0 }
 0x2de   :  { %v2340_v11 = vpack.c.bf16 %v4590_v47, %v4589_v15  ;;  %v2345_v31 = vpack.c.bf16 %v4593_v13, %v4592_v52  ;;  %v4598_v45 = vmax.f32 %v4597_v42, 0.0  ;;  %v4599_v23 = vmax.f32 %v4506_v14, 0.0  ;;  %2390 = vst [vmem:[%s4268_s4 + $0xe8] sm:$0xff] %v2330_v37  }
 0x2df   :  { %v2350_v22 = vpack.c.bf16 %v4595_v61, %v4594_v12  ;;  %v4600_v26 = vmax.f32 %v4507_v63, 0.0  ;;  %2391 = vst [vmem:[%s4268_s4 + $0xf0] sm:$0xff] %v2335_v8  }
 0x2e0   :  { %v2355_v33 = vpack.c.bf16 %v4598_v45, %v4596_v34  ;;  %2392 = vst [vmem:[%s4268_s4 + $0xf8] sm:$0xff] %v2340_v11   ;;  %2393 = vst [vmem:[%s4268_s4 + $0x100] sm:$0xff] %v2345_v31  }
 0x2e1   :  { %v2360_v51 = vpack.c.bf16 %v4600_v26, %v4599_v23  ;;  %2394 = vst [vmem:[%s4268_s4 + $0x108] sm:$0xff] %v2350_v22  }
 0x2e2   :  { %2395 = vst [vmem:[%s4268_s4 + $0x110] sm:$0xff] %v2355_v33  }
 0x2e3   :  { %2396 = vst [vmem:[%s4268_s4 + $0x118] sm:$0xff] %v2360_v51  }

// kernel: inception_block_b.8
= control target key start
LH: loop header
LB: loop body
LE: loop exit
PB: predicated region body
PF: predicated region fallthrough
CT: control target
= control target key end

     0   :  { %s3121_s15 = smov 0   ;;  %s3123_s16 = smov 0   ;;  %s4073_s0 = inlined_call_operand.vmem [shape: bf16[9,578,128], index: 0, kind: input, shape index: {}]   ;;  %s4074_s1 = inlined_call_operand.vmem [shape: bf16[9,128,128], index: 1, kind: input, shape index: {}]   ;;  %s4075_s2 = inlined_call_operand.vmem [shape: f32[1,128], index: 2, kind: input, shape index: {}]   ;;  %s4076_s3 = inlined_call_operand.vmem [shape: f32[1,128], index: 3, kind: input, shape index: {}]   ;;  %s4077_s4 = inlined_call_operand.vmem [shape: bf16[578,128], index: 4, kind: output, shape index: {}]  }
   0x1   :  { %s3125_s17 = smov 0  }
   0x2 LB: > { %s23_s18 = sadd.s32 1, %s3087_s16  ;;  %p2344_p0 = scmp.ge.s32.totalorder %s3091_s17, 1  ;;  %s3091_s17 = sphi %s3125_s17, %s14_s17   ;;  %s3087_s16 = sphi %s3123_s16, %s4211_s16   ;;  %s3083_s15 = sphi %s3121_s15, %s4210_s15  }
   0x3   : > { %p24_p1 = scmp.ge.s32.totalorder %s23_s18, 9  ;;  %p205_p2 = scmp.lt.s32.totalorder %s3091_s17, 10 }
   0x5   : > { %s4213_s18 = smov (%p24_p1, %s23_s18), 0  ;;  %p206_p3 = pnand %p2344_p0, %p205_p2 }
   0x6   : > { %p244_p4 = scmp.lt.s32.totalorder (!%p206_p3), %s3083_s15, 8  ;;  %p2348_p5 = scmp.ne.s32.totalorder (!%p206_p3), %s3083_s15, 0 }
   0x7   : > { %209 = sbr.rel (%p206_p3) target bundleno = 855 (0x357), region = 36 }
   0xe   : > { %s245_s19 = scalar_select %p244_p4, %s3083_s15, 8 }
   0xf   : > { %271 = sbr.rel (%p2348_p5) target bundleno = 53 (0x35), region = 40  ;;  %v3093_v0 = vmov (!%p2348_p5), 0.0  }
  0x10   : > { %s2985_s20 = smul.u32 292, %s245_s19  ;;  %s2471_s21 = sshll.u32 %s245_s19, 6  ;;  %272 = vst [vmem:[#allocation2] sm:$0xff] (!%p2348_p5), %v3093_v0  ;;  %273 = vst [vmem:[#allocation2 + $0x8] sm:$0xff] (!%p2348_p5), %v3093_v0 }
  0x11   : > { %s3146_s24 = scalar_lea.vmem %s4074_s1, %s2471_s21  ;;  %274 = vst [vmem:[#allocation2 + $0x10] sm:$0xff] (!%p2348_p5), %v3093_v0  ;;  %275 = vst [vmem:[#allocation2 + $0x18] sm:$0xff] (!%p2348_p5), %v3093_v0 }
  0x12   : > { %s3151_s27 = scalar_lea.vmem %s4073_s0, %s2985_s20  ;;  %276 = vst [vmem:[#allocation2 + $0x20] sm:$0xff] (!%p2348_p5), %v3093_v0  ;;  %277 = vst [vmem:[#allocation2 + $0x28] sm:$0xff] (!%p2348_p5), %v3093_v0 }
  0x13   : > { %278 = vst [vmem:[#allocation2 + $0x30] sm:$0xff] (!%p2348_p5), %v3093_v0  ;;  %279 = vst [vmem:[#allocation2 + $0x38] sm:$0xff] (!%p2348_p5), %v3093_v0 }
  0x14   : > { %280 = vst [vmem:[#allocation2 + $0x40] sm:$0xff] (!%p2348_p5), %v3093_v0  ;;  %281 = vst [vmem:[#allocation2 + $0x48] sm:$0xff] (!%p2348_p5), %v3093_v0 }
  0x15   : > { %282 = vst [vmem:[#allocation2 + $0x50] sm:$0xff] (!%p2348_p5), %v3093_v0  ;;  %283 = vst [vmem:[#allocation2 + $0x58] sm:$0xff] (!%p2348_p5), %v3093_v0 }
  0x16   : > { %284 = vst [vmem:[#allocation2 + $0x60] sm:$0xff] %v3093_v0  ;;  %285 = vst [vmem:[#allocation2 + $0x68] sm:$0xff] %v3093_v0 }
  0x17   : > { %286 = vst [vmem:[#allocation2 + $0x70] sm:$0xff] %v3093_v0  ;;  %287 = vst [vmem:[#allocation2 + $0x78] sm:$0xff] %v3093_v0 }
  0x18   : > { %288 = vst [vmem:[#allocation2 + $0x80] sm:$0xff] %v3093_v0  ;;  %289 = vst [vmem:[#allocation2 + $0x88] sm:$0xff] %v3093_v0 }
  0x19   : > { %290 = vst [vmem:[#allocation2 + $0x90] sm:$0xff] %v3093_v0  ;;  %291 = vst [vmem:[#allocation2 + $0x98] sm:$0xff] %v3093_v0 }
  0x1a   : > { %292 = vst [vmem:[#allocation2 + $0xa0] sm:$0xff] %v3093_v0  ;;  %293 = vst [vmem:[#allocation2 + $0xa8] sm:$0xff] %v3093_v0 }
  0x1b   : > { %294 = vst [vmem:[#allocation2 + $0xb0] sm:$0xff] %v3093_v0  ;;  %295 = vst [vmem:[#allocation2 + $0xb8] sm:$0xff] %v3093_v0 }
  0x1c   : > { %296 = vst [vmem:[#allocation2 + $0xc0] sm:$0xff] %v3093_v0  ;;  %297 = vst [vmem:[#allocation2 + $0xc8] sm:$0xff] %v3093_v0 }
  0x1d   : > { %298 = vst [vmem:[#allocation2 + $0xd0] sm:$0xff] %v3093_v0  ;;  %299 = vst [vmem:[#allocation2 + $0xd8] sm:$0xff] %v3093_v0 }
  0x1e   : > { %300 = vst [vmem:[#allocation2 + $0xe0] sm:$0xff] %v3093_v0  ;;  %301 = vst [vmem:[#allocation2 + $0xe8] sm:$0xff] %v3093_v0 }
  0x1f   : > { %302 = vst [vmem:[#allocation2 + $0xf0] sm:$0xff] %v3093_v0  ;;  %303 = vst [vmem:[#allocation2 + $0xf8] sm:$0xff] %v3093_v0 }
  0x20   : > { %304 = vst [vmem:[#allocation2 + $0x100] sm:$0xff] %v3093_v0  ;;  %305 = vst [vmem:[#allocation2 + $0x108] sm:$0xff] %v3093_v0 }
  0x21   : > { %306 = vst [vmem:[#allocation2 + $0x110] sm:$0xff] %v3093_v0  ;;  %307 = vst [vmem:[#allocation2 + $0x118] sm:$0xff] %v3093_v0 }
  0x22   : > { %308 = vst [vmem:[#allocation2 + $0x120] sm:$0xff] %v3093_v0  ;;  %309 = vst [vmem:[#allocation2 + $0x128] sm:$0xff] %v3093_v0 }
  0x23   : > { %310 = vst [vmem:[#allocation2 + $0x130] sm:$0xff] %v3093_v0  ;;  %311 = vst [vmem:[#allocation2 + $0x138] sm:$0xff] %v3093_v0 }
  0x24   : > { %312 = vst [vmem:[#allocation2 + $0x140] sm:$0xff] %v3093_v0  ;;  %313 = vst [vmem:[#allocation2 + $0x148] sm:$0xff] %v3093_v0 }
  0x25   : > { %314 = vst [vmem:[#allocation2 + $0x150] sm:$0xff] %v3093_v0  ;;  %315 = vst [vmem:[#allocation2 + $0x158] sm:$0xff] %v3093_v0 }
  0x26   : > { %316 = vst [vmem:[#allocation2 + $0x160] sm:$0xff] %v3093_v0  ;;  %317 = vst [vmem:[#allocation2 + $0x168] sm:$0xff] %v3093_v0 }
  0x27   : > { %318 = vst [vmem:[#allocation2 + $0x170] sm:$0xff] %v3093_v0  ;;  %319 = vst [vmem:[#allocation2 + $0x178] sm:$0xff] %v3093_v0 }
  0x28   : > { %320 = vst [vmem:[#allocation2 + $0x180] sm:$0xff] %v3093_v0  ;;  %321 = vst [vmem:[#allocation2 + $0x188] sm:$0xff] %v3093_v0 }
  0x29   : > { %322 = vst [vmem:[#allocation2 + $0x190] sm:$0xff] %v3093_v0  ;;  %323 = vst [vmem:[#allocation2 + $0x198] sm:$0xff] %v3093_v0 }
  0x2a   : > { %324 = vst [vmem:[#allocation2 + $0x1a0] sm:$0xff] %v3093_v0  ;;  %325 = vst [vmem:[#allocation2 + $0x1a8] sm:$0xff] %v3093_v0 }
  0x2b   : > { %326 = vst [vmem:[#allocation2 + $0x1b0] sm:$0xff] %v3093_v0  ;;  %327 = vst [vmem:[#allocation2 + $0x1b8] sm:$0xff] %v3093_v0 }
  0x2c   : > { %328 = vst [vmem:[#allocation2 + $0x1c0] sm:$0xff] %v3093_v0  ;;  %329 = vst [vmem:[#allocation2 + $0x1c8] sm:$0xff] %v3093_v0 }
  0x2d   : > { %330 = vst [vmem:[#allocation2 + $0x1d0] sm:$0xff] %v3093_v0  ;;  %331 = vst [vmem:[#allocation2 + $0x1d8] sm:$0xff] %v3093_v0 }
  0x2e   : > { %332 = vst [vmem:[#allocation2 + $0x1e0] sm:$0xff] %v3093_v0  ;;  %333 = vst [vmem:[#allocation2 + $0x1e8] sm:$0xff] %v3093_v0 }
  0x2f   : > { %334 = vst [vmem:[#allocation2 + $0x1f0] sm:$0xff] %v3093_v0  ;;  %335 = vst [vmem:[#allocation2 + $0x1f8] sm:$0xff] %v3093_v0 }
  0x30   : > { %336 = vst [vmem:[#allocation2 + $0x200] sm:$0xff] %v3093_v0  ;;  %337 = vst [vmem:[#allocation2 + $0x208] sm:$0xff] %v3093_v0 }
  0x31   : > { %338 = vst [vmem:[#allocation2 + $0x210] sm:$0xff] %v3093_v0  ;;  %339 = vst [vmem:[#allocation2 + $0x218] sm:$0xff] %v3093_v0 }
  0x32   : > { %340 = vst [vmem:[#allocation2 + $0x220] sm:$0xff] %v3093_v0  ;;  %341 = vst [vmem:[#allocation2 + $0x228] sm:$0xff] %v3093_v0 }
  0x33   : > { %342 = vst [vmem:[#allocation2 + $0x230] sm:$0xff] %v3093_v0  ;;  %343 = vst [vmem:[#allocation2 + $0x238] sm:$0xff] %v3093_v0 }
  0x34   : > { %344 = vst [vmem:[#allocation2 + $0x240] sm:$0x3] %v3093_v0 }
  0x35 PF: > { %v3013_v1 = vld [vmem:[%s3146_s24] sm:$0xff]   ;;  %v3094_v2 = vmov 0.0   ;;  %v3014_v3 = vld [vmem:[%s3146_s24 + $0x8] sm:$0xff]   ;;  %vm3095_vm0 = vmmov 0   ;;  %v3015_v4 = vld [vmem:[%s3146_s24 + $0x10] sm:$0xff]   ;;  %p2394_p6 = scmp.ne.s32.totalorder %s3083_s15, 8 }
  0x36   : > { %2805 = vmatprep.subr.bf16.mxu0 %v3094_v2  ;;  %2969 = vmatprep.subr.bf16.mxu1 %v3094_v2  ;;  %v3016_v5 = vld [vmem:[%s3146_s24 + $0x18] sm:$0xff]   ;;  %v3017_v6 = vld [vmem:[%s3146_s24 + $0x20] sm:$0xff]   ;;  %v3018_v7 = vld [vmem:[%s3146_s24 + $0x28] sm:$0xff]  }
  0x37   : > { %2806 = vmatpush3.bf16.msra.mxu0 %v3013_v1  ;;  %2977 = vmatpush3.bf16.msra.mxu1 %v3013_v1  ;;  %v3019_v8 = vld [vmem:[%s3146_s24 + $0x30] sm:$0xff]   ;;  %v3020_v9 = vld [vmem:[%s3146_s24 + $0x38] sm:$0xff]   ;;  %v3021_v10 = vld [vmem:[%s3151_s27] sm:$0xff]  }
  0x38   : > { %2807 = vmatprep.subr.bf16.mxu0 %v3094_v2  ;;  %2970 = vmatprep.subr.bf16.mxu1 %v3094_v2  ;;  %v3022_v11 = vld [vmem:[%s3151_s27 + $0x98] sm:$0xff]   ;;  %v3023_v12 = vld [vmem:[%s3151_s27 + $0x8] sm:$0xff]   ;;  %v3024_v13 = vld [vmem:[%s3151_s27 + $0xa0] sm:$0xff]  }
  0x39   : > { %2821 = vmatprep.mubr.msk.bf16.mxu0 %vm3095_vm0, %v3094_v2  ;;  %2897 = vmatprep.mubr.msk.bf16.mxu1 %vm3095_vm0, %v3094_v2  ;;  %v3025_v14 = vld [vmem:[%s3151_s27 + $0x10] sm:$0xff]   ;;  %v3026_v15 = vld [vmem:[%s3151_s27 + $0xa8] sm:$0xff]   ;;  %v3027_v16 = vld [vmem:[%s3151_s27 + $0x18] sm:$0xff]  }
  0x3a   : > { %v3028_v17 = vld [vmem:[%s3151_s27 + $0xb0] sm:$0xff]   ;;  %v3029_v18 = vld [vmem:[%s3151_s27 + $0x20] sm:$0xff]   ;;  %v3030_v19 = vld [vmem:[%s3151_s27 + $0xb8] sm:$0xff]  }
  0x3b   : > { %2808 = vmatpush3.bf16.msra.mxu0 %v3014_v3  ;;  %2978 = vmatpush3.bf16.msra.mxu1 %v3014_v3  ;;  %v3031_v20 = vld [vmem:[%s3151_s27 + $0x28] sm:$0xff]   ;;  %v3032_v21 = vld [vmem:[%s3151_s27 + $0xc0] sm:$0xff]   ;;  %v3033_v22 = vld [vmem:[%s3151_s27 + $0x30] sm:$0xff]  }
  0x3c   : > { %2809 = vmatprep.subr.bf16.mxu0 %v3094_v2  ;;  %2971 = vmatprep.subr.bf16.mxu1 %v3094_v2  ;;  %v3034_v23 = vld [vmem:[%s3151_s27 + $0xc8] sm:$0xff]   ;;  %v3035_v24 = vld [vmem:[%s3151_s27 + $0x38] sm:$0xff]   ;;  %v3036_v25 = vld [vmem:[%s3151_s27 + $0xd0] sm:$0xff]  }
  0x3d   : > { %v3037_v26 = vld [vmem:[%s3151_s27 + $0x40] sm:$0xff]   ;;  %v3038_v27 = vld [vmem:[%s3151_s27 + $0xd8] sm:$0xff]   ;;  %v3039_v28 = vld [vmem:[%s3151_s27 + $0x48] sm:$0xff]  }
  0x3e   : > { %v3040_v29 = vld [vmem:[%s3151_s27 + $0xe0] sm:$0xff]   ;;  %v3041_v30 = vld [vmem:[%s3151_s27 + $0x50] sm:$0xff]   ;;  %v3042_v31 = vld [vmem:[%s3151_s27 + $0xe8] sm:$0xff]  }
  0x3f   : > { %2810 = vmatpush3.bf16.msra.mxu0 %v3015_v4  ;;  %2979 = vmatpush3.bf16.msra.mxu1 %v3015_v4  ;;  %v3043_v32 = vld [vmem:[%s3151_s27 + $0x58] sm:$0xff]   ;;  %v3044_v33 = vld [vmem:[%s3151_s27 + $0xf0] sm:$0xff]   ;;  %v3045_v34 = vld [vmem:[%s3151_s27 + $0x60] sm:$0xff]  }
  0x40   : > { %2811 = vmatprep.subr.bf16.mxu0 %v3094_v2  ;;  %2972 = vmatprep.subr.bf16.mxu1 %v3094_v2  ;;  %v3046_v35 = vld [vmem:[%s3151_s27 + $0xf8] sm:$0xff]   ;;  %v3047_v36 = vld [vmem:[%s3151_s27 + $0x68] sm:$0xff]   ;;  %v3048_v37 = vld [vmem:[%s3151_s27 + $0x100] sm:$0xff]  }
  0x41   : > { %v3049_v38 = vld [vmem:[%s3151_s27 + $0x70] sm:$0xff]   ;;  %v3050_v39 = vld [vmem:[%s3151_s27 + $0x108] sm:$0xff]   ;;  %v3051_v40 = vld [vmem:[%s3151_s27 + $0x78] sm:$0xff]  }
  0x42   : > { %v3052_v41 = vld [vmem:[%s3151_s27 + $0x110] sm:$0xff]   ;;  %v3053_v42 = vld [vmem:[%s3151_s27 + $0x80] sm:$0xff]   ;;  %v3054_v43 = vld [vmem:[%s3151_s27 + $0x118] sm:$0xff]  }
  0x43   : > { %2812 = vmatpush3.bf16.msra.mxu0 %v3016_v5  ;;  %2980 = vmatpush3.bf16.msra.mxu1 %v3016_v5  ;;  %v3055_v44 = vld [vmem:[%s3151_s27 + $0x88] sm:$0xff]   ;;  %v3056_v45 = vld [vmem:[%s3151_s27 + $0x120] ss:$0 sps:$4 sm:$0x11]   ;;  %v3057_v46 = vld [vmem:[%s3151_s27 + $0x90] sm:$0xff]  }
  0x44   : > { %2813 = vmatprep.subr.bf16.mxu0 %v3094_v2  ;;  %2973 = vmatprep.subr.bf16.mxu1 %v3094_v2  ;;  %v345_v47 = vld [vmem:[#allocation2] sm:$0xff]  ;;  %v383_v48 = vld [vmem:[#allocation2 + $0x130] sm:$0xff]  ;;  %v346_v50 = vld [vmem:[#allocation2 + $0x8] sm:$0xff] }
  0x45   : > { %v384_v52 = vld [vmem:[#allocation2 + $0x138] sm:$0xff]  ;;  %v347_v63 = vld [vmem:[#allocation2 + $0x10] sm:$0xff]  ;;  %v385_v0 = vld [vmem:[#allocation2 + $0x140] sm:$0xff] }
  0x46   : > { %v386_v4 = vld [vmem:[#allocation2 + $0x148] sm:$0xff] }
  0x47   : > { %2814 = vmatpush3.bf16.msra.mxu0 %v3017_v6  ;;  %2981 = vmatpush3.bf16.msra.mxu1 %v3017_v6 }
  0x48   : > { %2815 = vmatprep.subr.bf16.mxu0 %v3094_v2  ;;  %2974 = vmatprep.subr.bf16.mxu1 %v3094_v2 }
  0x4b   : > { %2816 = vmatpush3.bf16.msra.mxu0 %v3018_v7  ;;  %2982 = vmatpush3.bf16.msra.mxu1 %v3018_v7 }
  0x4c   : > { %2817 = vmatprep.subr.bf16.mxu0 %v3094_v2  ;;  %2975 = vmatprep.subr.bf16.mxu1 %v3094_v2 }
  0x4f   : > { %2818 = vmatpush3.bf16.msra.mxu0 %v3019_v8  ;;  %2983 = vmatpush3.bf16.msra.mxu1 %v3019_v8 }
  0x50   : > { %2819 = vmatprep.subr.bf16.mxu0 %v3094_v2  ;;  %2976 = vmatprep.subr.bf16.mxu1 %v3094_v2 }
  0x53   : > { %2820 = vmatpush3.bf16.msra.mxu0 %v3020_v9  ;;  %2984 = vmatpush3.bf16.msra.mxu1 %v3020_v9 }
  0x56   : > { %2822 = vmatmul.mubr.bf16.vlgmr.msra.gmra.mrb[0].mxu0 %v3021_v10  ;;  %2898 = vmatmul.mubr.bf16.vlgmr.msra.gmra.mrb[0].mxu1 %v3022_v11 }
  0x57   : > { %2825 = vmatprep.mubr.msk.bf16.mxu0 %vm3095_vm0, %v3094_v2  ;;  %2901 = vmatprep.mubr.msk.bf16.mxu1 %vm3095_vm0, %v3094_v2 }
  0x5e   : > { %2826 = vmatmul.mubr.bf16.gmra.mrb[4].mxu0 %v3023_v12  ;;  %2902 = vmatmul.mubr.bf16.gmra.mrb[4].mxu1 %v3024_v13 }
  0x5f   : > { %2829 = vmatprep.mubr.msk.bf16.mxu0 %vm3095_vm0, %v3094_v2  ;;  %2905 = vmatprep.mubr.msk.bf16.mxu1 %vm3095_vm0, %v3094_v2 }
  0x66   : > { %2830 = vmatmul.mubr.bf16.gmra.mrb[8].mxu0 %v3025_v14  ;;  %2906 = vmatmul.mubr.bf16.gmra.mrb[8].mxu1 %v3026_v15  ;;  %v349_v15 = vld [vmem:[#allocation2 + $0x20] sm:$0xff] }
  0x67   : > { %2833 = vmatprep.mubr.msk.bf16.mxu0 %vm3095_vm0, %v3094_v2  ;;  %2909 = vmatprep.mubr.msk.bf16.mxu1 %vm3095_vm0, %v3094_v2 }
  0x6e   : > { %2834 = vmatmul.mubr.bf16.gmra.mrb[12].mxu0 %v3027_v16  ;;  %2910 = vmatmul.mubr.bf16.gmra.mrb[12].mxu1 %v3028_v17  ;;  %v387_v16 = vld [vmem:[#allocation2 + $0x150] sm:$0xff] }
  0x6f   : > { %2837 = vmatprep.mubr.msk.bf16.mxu0 %vm3095_vm0, %v3094_v2  ;;  %2913 = vmatprep.mubr.msk.bf16.mxu1 %vm3095_vm0, %v3094_v2 }
  0x76   : > { %2838 = vmatmul.mubr.bf16.gmra.mrb[16].mxu0 %v3029_v18  ;;  %2914 = vmatmul.mubr.bf16.gmra.mrb[16].mxu1 %v3030_v19  ;;  %v350_v18 = vld [vmem:[#allocation2 + $0x28] sm:$0xff] }
  0x77   : > { %2841 = vmatprep.mubr.msk.bf16.mxu0 %vm3095_vm0, %v3094_v2  ;;  %2917 = vmatprep.mubr.msk.bf16.mxu1 %vm3095_vm0, %v3094_v2 }
  0x7e   : > { %2842 = vmatmul.mubr.bf16.gmra.mrb[20].mxu0 %v3031_v20  ;;  %2918 = vmatmul.mubr.bf16.gmra.mrb[20].mxu1 %v3032_v21  ;;  %v388_v20 = vld [vmem:[#allocation2 + $0x158] sm:$0xff] }
  0x7f   : > { %2845 = vmatprep.mubr.msk.bf16.mxu0 %vm3095_vm0, %v3094_v2  ;;  %2921 = vmatprep.mubr.msk.bf16.mxu1 %vm3095_vm0, %v3094_v2 }
  0x86   : > { %2846 = vmatmul.mubr.bf16.gmra.mrb[24].mxu0 %v3033_v22  ;;  %2922 = vmatmul.mubr.bf16.gmra.mrb[24].mxu1 %v3034_v23 }
  0x87   : > { %2849 = vmatprep.mubr.msk.bf16.mxu0 %vm3095_vm0, %v3094_v2  ;;  %2925 = vmatprep.mubr.msk.bf16.mxu1 %vm3095_vm0, %v3094_v2 }
  0x8e   : > { %2850 = vmatmul.mubr.bf16.gmra.mrb[28].mxu0 %v3035_v24  ;;  %2926 = vmatmul.mubr.bf16.gmra.mrb[28].mxu1 %v3036_v25 }
  0x8f   : > { %2853 = vmatprep.mubr.msk.bf16.mxu0 %vm3095_vm0, %v3094_v2  ;;  %2929 = vmatprep.mubr.msk.bf16.mxu1 %vm3095_vm0, %v3094_v2 }
  0x96   : > { %2854 = vmatmul.mubr.bf16.gmra.mrb[32].mxu0 %v3037_v26  ;;  %2930 = vmatmul.mubr.bf16.gmra.mrb[32].mxu1 %v3038_v27 }
  0x97   : > { %2857 = vmatprep.mubr.msk.bf16.mxu0 %vm3095_vm0, %v3094_v2  ;;  %2933 = vmatprep.mubr.msk.bf16.mxu1 %vm3095_vm0, %v3094_v2 }
  0x9e   : > { %2858 = vmatmul.mubr.bf16.gmra.mrb[36].mxu0 %v3039_v28  ;;  %2934 = vmatmul.mubr.bf16.gmra.mrb[36].mxu1 %v3040_v29 }
  0x9f   : > { %2861 = vmatprep.mubr.msk.bf16.mxu0 %vm3095_vm0, %v3094_v2  ;;  %2937 = vmatprep.mubr.msk.bf16.mxu1 %vm3095_vm0, %v3094_v2 }
  0xa6   : > { %2862 = vmatmul.mubr.bf16.gmra.mrb[40].mxu0 %v3041_v30  ;;  %2938 = vmatmul.mubr.bf16.gmra.mrb[40].mxu1 %v3042_v31  ;;  %v351_v31 = vld [vmem:[#allocation2 + $0x30] sm:$0xff] }
  0xa7   : > { %2865 = vmatprep.mubr.msk.bf16.mxu0 %vm3095_vm0, %v3094_v2  ;;  %2941 = vmatprep.mubr.msk.bf16.mxu1 %vm3095_vm0, %v3094_v2 }
  0xae   : > { %2866 = vmatmul.mubr.bf16.gmra.mrb[44].mxu0 %v3043_v32  ;;  %2942 = vmatmul.mubr.bf16.gmra.mrb[44].mxu1 %v3044_v33  ;;  %v389_v32 = vld [vmem:[#allocation2 + $0x160] sm:$0xff] }
  0xaf   : > { %2869 = vmatprep.mubr.msk.bf16.mxu0 %vm3095_vm0, %v3094_v2  ;;  %2945 = vmatprep.mubr.msk.bf16.mxu1 %vm3095_vm0, %v3094_v2 }
  0xb6   : > { %2870 = vmatmul.mubr.bf16.gmra.mrb[48].mxu0 %v3045_v34  ;;  %2946 = vmatmul.mubr.bf16.gmra.mrb[48].mxu1 %v3046_v35  ;;  %v352_v34 = vld [vmem:[#allocation2 + $0x38] sm:$0xff] }
  0xb7   : > { %2873 = vmatprep.mubr.msk.bf16.mxu0 %vm3095_vm0, %v3094_v2  ;;  %2949 = vmatprep.mubr.msk.bf16.mxu1 %vm3095_vm0, %v3094_v2 }
  0xbe   : > { %2874 = vmatmul.mubr.bf16.gmra.mrb[52].mxu0 %v3047_v36  ;;  %2950 = vmatmul.mubr.bf16.gmra.mrb[52].mxu1 %v3048_v37  ;;  %v390_v36 = vld [vmem:[#allocation2 + $0x168] sm:$0xff] }
  0xbf   : > { %2877 = vmatprep.mubr.msk.bf16.mxu0 %vm3095_vm0, %v3094_v2  ;;  %2953 = vmatprep.mubr.msk.bf16.mxu1 %vm3095_vm0, %v3094_v2 }
  0xc6   : > { %2878 = vmatmul.mubr.bf16.gmra.mrb[56].mxu0 %v3049_v38  ;;  %2954 = vmatmul.mubr.bf16.gmra.mrb[56].mxu1 %v3050_v39 }
  0xc7   : > { %2881 = vmatprep.mubr.msk.bf16.mxu0 %vm3095_vm0, %v3094_v2  ;;  %2957 = vmatprep.mubr.msk.bf16.mxu1 %vm3095_vm0, %v3094_v2 }
  0xce   : > { %2882 = vmatmul.mubr.bf16.gmra.mrb[60].mxu0 %v3051_v40  ;;  %2958 = vmatmul.mubr.bf16.gmra.mrb[60].mxu1 %v3052_v41 }
  0xcf   : > { %2885 = vmatprep.mubr.msk.bf16.mxu0 %vm3095_vm0, %v3094_v2  ;;  %2961 = vmatprep.mubr.msk.bf16.mxu1 %vm3095_vm0, %v3094_v2 }
  0xd6   : > { %2886 = vmatmul.mubr.bf16.gmra.mrb[64].mxu0 %v3053_v42  ;;  %2962 = vmatmul.mubr.bf16.gmra.mrb[64].mxu1 %v3054_v43 }
  0xd7   : > { %2889 = vmatprep.mubr.msk.bf16.mxu0 %vm3095_vm0, %v3094_v2  ;;  %2965 = vmatprep.mubr.msk.bf16.mxu1 %vm3095_vm0, %v3094_v2 }
  0xde   : > { %2890 = vmatmul.mubr.bf16.gmra.mrb[68].mxu0 %v3055_v44  ;;  %2966 = vmatmul.mubr.bf16.gmra.mrb[68].mxu1 %v3056_v45 }
  0xdf   : > { %2893 = vmatprep.mubr.msk.bf16.mxu0 %vm3095_vm0, %v3094_v2  ;;  %v348_v2 = vld [vmem:[#allocation2 + $0x18] sm:$0xff] }
  0xe6   : > { %2894 = vmatmul.mubr.bf16.gmra.mrb[72].mxu0 %v3057_v46 }
 0x129   : > { %v809_v49 = vpop.f32.mrb[0].mxu0  ;;  %v961_v51 = vpop.f32.mrb[0].mxu1 }
 0x12a   : > { %v1103_v53 = vadd.f32 %v809_v49, %v345_v47  ;;  %v2823_v54 = vpop.f32.mrb[1].mxu0  ;;  %v1141_v55 = vadd.f32 %v961_v51, %v383_v48  ;;  %v2899_v56 = vpop.f32.mrb[1].mxu1  ;;  %v353_v47 = vld [vmem:[#allocation2 + $0x40] sm:$0xff]  ;;  %v391_v48 = vld [vmem:[#allocation2 + $0x170] sm:$0xff] }
 0x12b   : > { %v812_v57 = vpop.f32.mrb[2].mxu0  ;;  %v964_v58 = vpop.f32.mrb[2].mxu1 }
 0x12c   : > { %1176 = vst [vmem:[#allocation2] sm:$0xff] %v1103_v53  ;;  %v1104_v59 = vadd.f32 %v812_v57, %v346_v50  ;;  %v2824_v60 = vpop.f32.mrb[3].mxu0  ;;  %1214 = vst [vmem:[#allocation2 + $0x130] sm:$0xff] %v1141_v55  ;;  %v1142_v61 = vadd.f32 %v964_v58, %v384_v52  ;;  %v2900_v62 = vpop.f32.mrb[3].mxu1  ;;  %v354_v50 = vld [vmem:[#allocation2 + $0x48] sm:$0xff]  ;;  %v392_v52 = vld [vmem:[#allocation2 + $0x178] sm:$0xff] }
 0x12e   : > { %1177 = vst [vmem:[#allocation2 + $0x8] sm:$0xff] %v1104_v59  ;;  %1215 = vst [vmem:[#allocation2 + $0x138] sm:$0xff] %v1142_v61 }
 0x131   : > { %v817_v1 = vpop.f32.mrb[4].mxu0  ;;  %v969_v3 = vpop.f32.mrb[4].mxu1 }
 0x132   : > { %v1105_v5 = vadd.f32 %v817_v1, %v347_v63  ;;  %v2827_v6 = vpop.f32.mrb[5].mxu0  ;;  %v1143_v7 = vadd.f32 %v969_v3, %v385_v0  ;;  %v2903_v8 = vpop.f32.mrb[5].mxu1  ;;  %v355_v63 = vld [vmem:[#allocation2 + $0x50] sm:$0xff]  ;;  %v393_v0 = vld [vmem:[#allocation2 + $0x180] sm:$0xff] }
 0x133   : > { %v820_v9 = vpop.f32.mrb[6].mxu0  ;;  %v972_v10 = vpop.f32.mrb[6].mxu1 }
 0x134   : > { %1178 = vst [vmem:[#allocation2 + $0x10] sm:$0xff] %v1105_v5  ;;  %v1106_v11 = vadd.f32 %v820_v9, %v348_v2  ;;  %v2828_v12 = vpop.f32.mrb[7].mxu0  ;;  %1216 = vst [vmem:[#allocation2 + $0x140] sm:$0xff] %v1143_v7  ;;  %v1144_v13 = vadd.f32 %v972_v10, %v386_v4  ;;  %v2904_v14 = vpop.f32.mrb[7].mxu1  ;;  %v356_v2 = vld [vmem:[#allocation2 + $0x58] sm:$0xff]  ;;  %v394_v4 = vld [vmem:[#allocation2 + $0x188] sm:$0xff] }
 0x136   : > { %1179 = vst [vmem:[#allocation2 + $0x18] sm:$0xff] %v1106_v11  ;;  %1217 = vst [vmem:[#allocation2 + $0x148] sm:$0xff] %v1144_v13 }
 0x139   : > { %v825_v17 = vpop.f32.mrb[8].mxu0  ;;  %v977_v19 = vpop.f32.mrb[8].mxu1 }
 0x13a   : > { %v1107_v21 = vadd.f32 %v825_v17, %v349_v15  ;;  %v2831_v22 = vpop.f32.mrb[9].mxu0  ;;  %v1145_v23 = vadd.f32 %v977_v19, %v387_v16  ;;  %v2907_v24 = vpop.f32.mrb[9].mxu1  ;;  %v357_v15 = vld [vmem:[#allocation2 + $0x60] sm:$0xff]  ;;  %v395_v16 = vld [vmem:[#allocation2 + $0x190] sm:$0xff] }
 0x13b   : > { %v828_v25 = vpop.f32.mrb[10].mxu0  ;;  %v980_v26 = vpop.f32.mrb[10].mxu1 }
 0x13c   : > { %1180 = vst [vmem:[#allocation2 + $0x20] sm:$0xff] %v1107_v21  ;;  %v1108_v27 = vadd.f32 %v828_v25, %v350_v18  ;;  %v2832_v28 = vpop.f32.mrb[11].mxu0  ;;  %1218 = vst [vmem:[#allocation2 + $0x150] sm:$0xff] %v1145_v23  ;;  %v1146_v29 = vadd.f32 %v980_v26, %v388_v20  ;;  %v2908_v30 = vpop.f32.mrb[11].mxu1  ;;  %v358_v18 = vld [vmem:[#allocation2 + $0x68] sm:$0xff]  ;;  %v396_v20 = vld [vmem:[#allocation2 + $0x198] sm:$0xff] }
 0x13e   : > { %1181 = vst [vmem:[#allocation2 + $0x28] sm:$0xff] %v1108_v27  ;;  %1219 = vst [vmem:[#allocation2 + $0x158] sm:$0xff] %v1146_v29 }
 0x141   : > { %v833_v33 = vpop.f32.mrb[12].mxu0  ;;  %v985_v35 = vpop.f32.mrb[12].mxu1 }
 0x142   : > { %v1109_v37 = vadd.f32 %v833_v33, %v351_v31  ;;  %v2835_v38 = vpop.f32.mrb[13].mxu0  ;;  %v1147_v39 = vadd.f32 %v985_v35, %v389_v32  ;;  %v2911_v40 = vpop.f32.mrb[13].mxu1  ;;  %v359_v31 = vld [vmem:[#allocation2 + $0x70] sm:$0xff]  ;;  %v397_v32 = vld [vmem:[#allocation2 + $0x1a0] sm:$0xff] }
 0x143   : > { %v836_v41 = vpop.f32.mrb[14].mxu0  ;;  %v988_v42 = vpop.f32.mrb[14].mxu1 }
 0x144   : > { %1182 = vst [vmem:[#allocation2 + $0x30] sm:$0xff] %v1109_v37  ;;  %v1110_v43 = vadd.f32 %v836_v41, %v352_v34  ;;  %v2836_v44 = vpop.f32.mrb[15].mxu0  ;;  %1220 = vst [vmem:[#allocation2 + $0x160] sm:$0xff] %v1147_v39  ;;  %v1148_v45 = vadd.f32 %v988_v42, %v390_v36  ;;  %v2912_v46 = vpop.f32.mrb[15].mxu1  ;;  %v360_v34 = vld [vmem:[#allocation2 + $0x78] sm:$0xff]  ;;  %v398_v36 = vld [vmem:[#allocation2 + $0x1a8] sm:$0xff] }
 0x146   : > { %1183 = vst [vmem:[#allocation2 + $0x38] sm:$0xff] %v1110_v43  ;;  %1221 = vst [vmem:[#allocation2 + $0x168] sm:$0xff] %v1148_v45 }
 0x149   : > { %v841_v49 = vpop.f32.mrb[16].mxu0  ;;  %v993_v51 = vpop.f32.mrb[16].mxu1 }
 0x14a   : > { %v1111_v53 = vadd.f32 %v841_v49, %v353_v47  ;;  %v2839_v54 = vpop.f32.mrb[17].mxu0  ;;  %v1149_v55 = vadd.f32 %v993_v51, %v391_v48  ;;  %v2915_v56 = vpop.f32.mrb[17].mxu1  ;;  %v361_v47 = vld [vmem:[#allocation2 + $0x80] sm:$0xff]  ;;  %v399_v48 = vld [vmem:[#allocation2 + $0x1b0] sm:$0xff] }
 0x14b   : > { %v844_v57 = vpop.f32.mrb[18].mxu0  ;;  %v996_v58 = vpop.f32.mrb[18].mxu1 }
 0x14c   : > { %1184 = vst [vmem:[#allocation2 + $0x40] sm:$0xff] %v1111_v53  ;;  %v1112_v59 = vadd.f32 %v844_v57, %v354_v50  ;;  %v2840_v60 = vpop.f32.mrb[19].mxu0  ;;  %1222 = vst [vmem:[#allocation2 + $0x170] sm:$0xff] %v1149_v55  ;;  %v1150_v61 = vadd.f32 %v996_v58, %v392_v52  ;;  %v2916_v62 = vpop.f32.mrb[19].mxu1  ;;  %v362_v50 = vld [vmem:[#allocation2 + $0x88] sm:$0xff]  ;;  %v400_v52 = vld [vmem:[#allocation2 + $0x1b8] sm:$0xff] }
 0x14e   : > { %1185 = vst [vmem:[#allocation2 + $0x48] sm:$0xff] %v1112_v59  ;;  %1223 = vst [vmem:[#allocation2 + $0x178] sm:$0xff] %v1150_v61 }
 0x151   : > { %v849_v1 = vpop.f32.mrb[20].mxu0  ;;  %v1001_v3 = vpop.f32.mrb[20].mxu1 }
 0x152   : > { %v1113_v5 = vadd.f32 %v849_v1, %v355_v63  ;;  %v2843_v6 = vpop.f32.mrb[21].mxu0  ;;  %v1151_v7 = vadd.f32 %v1001_v3, %v393_v0  ;;  %v2919_v8 = vpop.f32.mrb[21].mxu1  ;;  %v363_v63 = vld [vmem:[#allocation2 + $0x90] sm:$0xff]  ;;  %v401_v0 = vld [vmem:[#allocation2 + $0x1c0] sm:$0xff] }
 0x153   : > { %v852_v9 = vpop.f32.mrb[22].mxu0  ;;  %v1004_v10 = vpop.f32.mrb[22].mxu1 }
 0x154   : > { %1186 = vst [vmem:[#allocation2 + $0x50] sm:$0xff] %v1113_v5  ;;  %v1114_v11 = vadd.f32 %v852_v9, %v356_v2  ;;  %v2844_v12 = vpop.f32.mrb[23].mxu0  ;;  %1224 = vst [vmem:[#allocation2 + $0x180] sm:$0xff] %v1151_v7  ;;  %v1152_v13 = vadd.f32 %v1004_v10, %v394_v4  ;;  %v2920_v14 = vpop.f32.mrb[23].mxu1  ;;  %v364_v2 = vld [vmem:[#allocation2 + $0x98] sm:$0xff]  ;;  %v402_v4 = vld [vmem:[#allocation2 + $0x1c8] sm:$0xff] }
 0x156   : > { %1187 = vst [vmem:[#allocation2 + $0x58] sm:$0xff] %v1114_v11  ;;  %1225 = vst [vmem:[#allocation2 + $0x188] sm:$0xff] %v1152_v13 }
 0x159   : > { %v857_v17 = vpop.f32.mrb[24].mxu0  ;;  %v1009_v19 = vpop.f32.mrb[24].mxu1 }
 0x15a   : > { %v1115_v21 = vadd.f32 %v857_v17, %v357_v15  ;;  %v2847_v22 = vpop.f32.mrb[25].mxu0  ;;  %v1153_v23 = vadd.f32 %v1009_v19, %v395_v16  ;;  %v2923_v24 = vpop.f32.mrb[25].mxu1  ;;  %v365_v15 = vld [vmem:[#allocation2 + $0xa0] sm:$0xff]  ;;  %v403_v16 = vld [vmem:[#allocation2 + $0x1d0] sm:$0xff] }
 0x15b   : > { %v860_v25 = vpop.f32.mrb[26].mxu0  ;;  %v1012_v26 = vpop.f32.mrb[26].mxu1 }
 0x15c   : > { %1188 = vst [vmem:[#allocation2 + $0x60] sm:$0xff] %v1115_v21  ;;  %v1116_v27 = vadd.f32 %v860_v25, %v358_v18  ;;  %v2848_v28 = vpop.f32.mrb[27].mxu0  ;;  %1226 = vst [vmem:[#allocation2 + $0x190] sm:$0xff] %v1153_v23  ;;  %v1154_v29 = vadd.f32 %v1012_v26, %v396_v20  ;;  %v2924_v30 = vpop.f32.mrb[27].mxu1  ;;  %v366_v18 = vld [vmem:[#allocation2 + $0xa8] sm:$0xff]  ;;  %v404_v20 = vld [vmem:[#allocation2 + $0x1d8] sm:$0xff] }
 0x15e   : > { %1189 = vst [vmem:[#allocation2 + $0x68] sm:$0xff] %v1116_v27  ;;  %1227 = vst [vmem:[#allocation2 + $0x198] sm:$0xff] %v1154_v29 }
 0x161   : > { %v865_v33 = vpop.f32.mrb[28].mxu0  ;;  %v1017_v35 = vpop.f32.mrb[28].mxu1 }
 0x162   : > { %v1117_v37 = vadd.f32 %v865_v33, %v359_v31  ;;  %v2851_v38 = vpop.f32.mrb[29].mxu0  ;;  %v1155_v39 = vadd.f32 %v1017_v35, %v397_v32  ;;  %v2927_v40 = vpop.f32.mrb[29].mxu1  ;;  %v367_v31 = vld [vmem:[#allocation2 + $0xb0] sm:$0xff]  ;;  %v405_v32 = vld [vmem:[#allocation2 + $0x1e0] sm:$0xff] }
 0x163   : > { %v868_v41 = vpop.f32.mrb[30].mxu0  ;;  %v1020_v42 = vpop.f32.mrb[30].mxu1 }
 0x164   : > { %1190 = vst [vmem:[#allocation2 + $0x70] sm:$0xff] %v1117_v37  ;;  %v1118_v43 = vadd.f32 %v868_v41, %v360_v34  ;;  %v2852_v44 = vpop.f32.mrb[31].mxu0  ;;  %1228 = vst [vmem:[#allocation2 + $0x1a0] sm:$0xff] %v1155_v39  ;;  %v1156_v45 = vadd.f32 %v1020_v42, %v398_v36  ;;  %v2928_v46 = vpop.f32.mrb[31].mxu1  ;;  %v368_v34 = vld [vmem:[#allocation2 + $0xb8] sm:$0xff]  ;;  %v406_v36 = vld [vmem:[#allocation2 + $0x1e8] sm:$0xff] }
 0x166   : > { %1191 = vst [vmem:[#allocation2 + $0x78] sm:$0xff] %v1118_v43  ;;  %1229 = vst [vmem:[#allocation2 + $0x1a8] sm:$0xff] %v1156_v45 }
 0x169   : > { %v873_v49 = vpop.f32.mrb[32].mxu0  ;;  %v1025_v51 = vpop.f32.mrb[32].mxu1 }
 0x16a   : > { %v1119_v53 = vadd.f32 %v873_v49, %v361_v47  ;;  %v2855_v54 = vpop.f32.mrb[33].mxu0  ;;  %v1157_v55 = vadd.f32 %v1025_v51, %v399_v48  ;;  %v2931_v56 = vpop.f32.mrb[33].mxu1  ;;  %v369_v47 = vld [vmem:[#allocation2 + $0xc0] sm:$0xff]  ;;  %v407_v48 = vld [vmem:[#allocation2 + $0x1f0] sm:$0xff] }
 0x16b   : > { %v876_v57 = vpop.f32.mrb[34].mxu0  ;;  %v1028_v58 = vpop.f32.mrb[34].mxu1 }
 0x16c   : > { %1192 = vst [vmem:[#allocation2 + $0x80] sm:$0xff] %v1119_v53  ;;  %v1120_v59 = vadd.f32 %v876_v57, %v362_v50  ;;  %v2856_v60 = vpop.f32.mrb[35].mxu0  ;;  %1230 = vst [vmem:[#allocation2 + $0x1b0] sm:$0xff] %v1157_v55  ;;  %v1158_v61 = vadd.f32 %v1028_v58, %v400_v52  ;;  %v2932_v62 = vpop.f32.mrb[35].mxu1  ;;  %v370_v50 = vld [vmem:[#allocation2 + $0xc8] sm:$0xff]  ;;  %v408_v52 = vld [vmem:[#allocation2 + $0x1f8] sm:$0xff] }
 0x16e   : > { %1193 = vst [vmem:[#allocation2 + $0x88] sm:$0xff] %v1120_v59  ;;  %1231 = vst [vmem:[#allocation2 + $0x1b8] sm:$0xff] %v1158_v61 }
 0x171   : > { %v881_v1 = vpop.f32.mrb[36].mxu0  ;;  %v1033_v3 = vpop.f32.mrb[36].mxu1 }
 0x172   : > { %v1121_v5 = vadd.f32 %v881_v1, %v363_v63  ;;  %v2859_v6 = vpop.f32.mrb[37].mxu0  ;;  %v1159_v7 = vadd.f32 %v1033_v3, %v401_v0  ;;  %v2935_v8 = vpop.f32.mrb[37].mxu1  ;;  %v371_v63 = vld [vmem:[#allocation2 + $0xd0] sm:$0xff]  ;;  %v409_v0 = vld [vmem:[#allocation2 + $0x200] sm:$0xff] }
 0x173   : > { %v884_v9 = vpop.f32.mrb[38].mxu0  ;;  %v1036_v10 = vpop.f32.mrb[38].mxu1 }
 0x174   : > { %1194 = vst [vmem:[#allocation2 + $0x90] sm:$0xff] %v1121_v5  ;;  %v1122_v11 = vadd.f32 %v884_v9, %v364_v2  ;;  %v2860_v12 = vpop.f32.mrb[39].mxu0  ;;  %1232 = vst [vmem:[#allocation2 + $0x1c0] sm:$0xff] %v1159_v7  ;;  %v1160_v13 = vadd.f32 %v1036_v10, %v402_v4  ;;  %v2936_v14 = vpop.f32.mrb[39].mxu1  ;;  %v372_v2 = vld [vmem:[#allocation2 + $0xd8] sm:$0xff]  ;;  %v410_v4 = vld [vmem:[#allocation2 + $0x208] sm:$0xff] }
 0x176   : > { %1195 = vst [vmem:[#allocation2 + $0x98] sm:$0xff] %v1122_v11  ;;  %1233 = vst [vmem:[#allocation2 + $0x1c8] sm:$0xff] %v1160_v13 }
 0x179   : > { %v889_v17 = vpop.f32.mrb[40].mxu0  ;;  %v1041_v19 = vpop.f32.mrb[40].mxu1 }
 0x17a   : > { %v1123_v21 = vadd.f32 %v889_v17, %v365_v15  ;;  %v2863_v22 = vpop.f32.mrb[41].mxu0  ;;  %v1161_v23 = vadd.f32 %v1041_v19, %v403_v16  ;;  %v2939_v24 = vpop.f32.mrb[41].mxu1  ;;  %v373_v15 = vld [vmem:[#allocation2 + $0xe0] sm:$0xff]  ;;  %v411_v16 = vld [vmem:[#allocation2 + $0x210] sm:$0xff] }
 0x17b   : > { %v892_v25 = vpop.f32.mrb[42].mxu0  ;;  %v1044_v26 = vpop.f32.mrb[42].mxu1 }
 0x17c   : > { %1196 = vst [vmem:[#allocation2 + $0xa0] sm:$0xff] %v1123_v21  ;;  %v1124_v27 = vadd.f32 %v892_v25, %v366_v18  ;;  %v2864_v28 = vpop.f32.mrb[43].mxu0  ;;  %1234 = vst [vmem:[#allocation2 + $0x1d0] sm:$0xff] %v1161_v23  ;;  %v1162_v29 = vadd.f32 %v1044_v26, %v404_v20  ;;  %v2940_v30 = vpop.f32.mrb[43].mxu1  ;;  %v374_v18 = vld [vmem:[#allocation2 + $0xe8] sm:$0xff]  ;;  %v412_v20 = vld [vmem:[#allocation2 + $0x218] sm:$0xff] }
 0x17e   : > { %1197 = vst [vmem:[#allocation2 + $0xa8] sm:$0xff] %v1124_v27  ;;  %1235 = vst [vmem:[#allocation2 + $0x1d8] sm:$0xff] %v1162_v29 }
 0x181   : > { %v897_v33 = vpop.f32.mrb[44].mxu0  ;;  %v1049_v35 = vpop.f32.mrb[44].mxu1 }
 0x182   : > { %v1125_v37 = vadd.f32 %v897_v33, %v367_v31  ;;  %v2867_v38 = vpop.f32.mrb[45].mxu0  ;;  %v1163_v39 = vadd.f32 %v1049_v35, %v405_v32  ;;  %v2943_v40 = vpop.f32.mrb[45].mxu1  ;;  %v375_v31 = vld [vmem:[#allocation2 + $0xf0] sm:$0xff]  ;;  %v413_v32 = vld [vmem:[#allocation2 + $0x220] sm:$0xff] }
 0x183   : > { %v900_v41 = vpop.f32.mrb[46].mxu0  ;;  %v1052_v42 = vpop.f32.mrb[46].mxu1 }
 0x184   : > { %1198 = vst [vmem:[#allocation2 + $0xb0] sm:$0xff] %v1125_v37  ;;  %v1126_v43 = vadd.f32 %v900_v41, %v368_v34  ;;  %v2868_v44 = vpop.f32.mrb[47].mxu0  ;;  %1236 = vst [vmem:[#allocation2 + $0x1e0] sm:$0xff] %v1163_v39  ;;  %v1164_v45 = vadd.f32 %v1052_v42, %v406_v36  ;;  %v2944_v46 = vpop.f32.mrb[47].mxu1  ;;  %v376_v34 = vld [vmem:[#allocation2 + $0xf8] sm:$0xff]  ;;  %v414_v36 = vld [vmem:[#allocation2 + $0x228] sm:$0xff] }
 0x186   : > { %1199 = vst [vmem:[#allocation2 + $0xb8] sm:$0xff] %v1126_v43  ;;  %1237 = vst [vmem:[#allocation2 + $0x1e8] sm:$0xff] %v1164_v45 }
 0x189   : > { %v905_v49 = vpop.f32.mrb[48].mxu0  ;;  %v1057_v51 = vpop.f32.mrb[48].mxu1 }
 0x18a   : > { %v1127_v53 = vadd.f32 %v905_v49, %v369_v47  ;;  %v2871_v54 = vpop.f32.mrb[49].mxu0  ;;  %v1165_v55 = vadd.f32 %v1057_v51, %v407_v48  ;;  %v2947_v56 = vpop.f32.mrb[49].mxu1  ;;  %v377_v47 = vld [vmem:[#allocation2 + $0x100] sm:$0xff]  ;;  %v415_v48 = vld [vmem:[#allocation2 + $0x230] sm:$0xff] }
 0x18b   : > { %v908_v57 = vpop.f32.mrb[50].mxu0  ;;  %v1060_v58 = vpop.f32.mrb[50].mxu1 }
 0x18c   : > { %1200 = vst [vmem:[#allocation2 + $0xc0] sm:$0xff] %v1127_v53  ;;  %v1128_v59 = vadd.f32 %v908_v57, %v370_v50  ;;  %v2872_v60 = vpop.f32.mrb[51].mxu0  ;;  %1238 = vst [vmem:[#allocation2 + $0x1f0] sm:$0xff] %v1165_v55  ;;  %v1166_v61 = vadd.f32 %v1060_v58, %v408_v52  ;;  %v2948_v62 = vpop.f32.mrb[51].mxu1  ;;  %v378_v50 = vld [vmem:[#allocation2 + $0x108] sm:$0xff]  ;;  %v416_v52 = vld [vmem:[#allocation2 + $0x238] sm:$0xff] }
 0x18e   : > { %1201 = vst [vmem:[#allocation2 + $0xc8] sm:$0xff] %v1128_v59  ;;  %1239 = vst [vmem:[#allocation2 + $0x1f8] sm:$0xff] %v1166_v61 }
 0x191   : > { %v913_v1 = vpop.f32.mrb[52].mxu0  ;;  %v1065_v3 = vpop.f32.mrb[52].mxu1 }
 0x192   : > { %v1129_v5 = vadd.f32 %v913_v1, %v371_v63  ;;  %v2875_v6 = vpop.f32.mrb[53].mxu0  ;;  %v1167_v7 = vadd.f32 %v1065_v3, %v409_v0  ;;  %v2951_v8 = vpop.f32.mrb[53].mxu1  ;;  %v379_v63 = vld [vmem:[#allocation2 + $0x110] sm:$0xff]  ;;  %v417_v0 = vld [vmem:[#allocation2 + $0x240] sm:$0x3] }
 0x193   : > { %v916_v9 = vpop.f32.mrb[54].mxu0  ;;  %v1068_v10 = vpop.f32.mrb[54].mxu1 }
 0x194   : > { %1202 = vst [vmem:[#allocation2 + $0xd0] sm:$0xff] %v1129_v5  ;;  %v1130_v11 = vadd.f32 %v916_v9, %v372_v2  ;;  %v2876_v12 = vpop.f32.mrb[55].mxu0  ;;  %1240 = vst [vmem:[#allocation2 + $0x200] sm:$0xff] %v1167_v7  ;;  %v1168_v13 = vadd.f32 %v1068_v10, %v410_v4  ;;  %v2952_v14 = vpop.f32.mrb[55].mxu1  ;;  %v380_v2 = vld [vmem:[#allocation2 + $0x118] sm:$0xff] }
 0x196   : > { %1203 = vst [vmem:[#allocation2 + $0xd8] sm:$0xff] %v1130_v11  ;;  %1241 = vst [vmem:[#allocation2 + $0x208] sm:$0xff] %v1168_v13  ;;  %v381_v13 = vld [vmem:[#allocation2 + $0x120] sm:$0xff] }
 0x199   : > { %v921_v17 = vpop.f32.mrb[56].mxu0  ;;  %v1073_v19 = vpop.f32.mrb[56].mxu1 }
 0x19a   : > { %v1131_v21 = vadd.f32 %v921_v17, %v373_v15  ;;  %v2879_v22 = vpop.f32.mrb[57].mxu0  ;;  %v1169_v23 = vadd.f32 %v1073_v19, %v411_v16  ;;  %v2955_v24 = vpop.f32.mrb[57].mxu1  ;;  %v382_v15 = vld [vmem:[#allocation2 + $0x128] sm:$0xff] }
 0x19b   : > { %v924_v25 = vpop.f32.mrb[58].mxu0  ;;  %v1076_v26 = vpop.f32.mrb[58].mxu1 }
 0x19c   : > { %1204 = vst [vmem:[#allocation2 + $0xe0] sm:$0xff] %v1131_v21  ;;  %v1132_v27 = vadd.f32 %v924_v25, %v374_v18  ;;  %v2880_v28 = vpop.f32.mrb[59].mxu0  ;;  %1242 = vst [vmem:[#allocation2 + $0x210] sm:$0xff] %v1169_v23  ;;  %v1170_v29 = vadd.f32 %v1076_v26, %v412_v20  ;;  %v2956_v30 = vpop.f32.mrb[59].mxu1 }
 0x19e   : > { %1205 = vst [vmem:[#allocation2 + $0xe8] sm:$0xff] %v1132_v27  ;;  %1243 = vst [vmem:[#allocation2 + $0x218] sm:$0xff] %v1170_v29 }
 0x1a1   : > { %v929_v33 = vpop.f32.mrb[60].mxu0  ;;  %v1081_v35 = vpop.f32.mrb[60].mxu1 }
 0x1a2   : > { %v1133_v37 = vadd.f32 %v929_v33, %v375_v31  ;;  %v2883_v38 = vpop.f32.mrb[61].mxu0  ;;  %v1171_v39 = vadd.f32 %v1081_v35, %v413_v32  ;;  %v2959_v40 = vpop.f32.mrb[61].mxu1 }
 0x1a3   : > { %v932_v41 = vpop.f32.mrb[62].mxu0  ;;  %v1084_v42 = vpop.f32.mrb[62].mxu1 }
 0x1a4   : > { %1206 = vst [vmem:[#allocation2 + $0xf0] sm:$0xff] %v1133_v37  ;;  %v1134_v43 = vadd.f32 %v932_v41, %v376_v34  ;;  %v2884_v44 = vpop.f32.mrb[63].mxu0  ;;  %1244 = vst [vmem:[#allocation2 + $0x220] sm:$0xff] %v1171_v39  ;;  %v1172_v45 = vadd.f32 %v1084_v42, %v414_v36  ;;  %v2960_v46 = vpop.f32.mrb[63].mxu1 }
 0x1a6   : > { %1207 = vst [vmem:[#allocation2 + $0xf8] sm:$0xff] %v1134_v43  ;;  %1245 = vst [vmem:[#allocation2 + $0x228] sm:$0xff] %v1172_v45 }
 0x1a9   : > { %v937_v49 = vpop.f32.mrb[64].mxu0  ;;  %v1089_v51 = vpop.f32.mrb[64].mxu1 }
 0x1aa   : > { %v1135_v53 = vadd.f32 %v937_v49, %v377_v47  ;;  %v2887_v54 = vpop.f32.mrb[65].mxu0  ;;  %v1173_v55 = vadd.f32 %v1089_v51, %v415_v48  ;;  %v2963_v56 = vpop.f32.mrb[65].mxu1 }
 0x1ab   : > { %v940_v57 = vpop.f32.mrb[66].mxu0  ;;  %v1092_v58 = vpop.f32.mrb[66].mxu1 }
 0x1ac   : > { %1208 = vst [vmem:[#allocation2 + $0x100] sm:$0xff] %v1135_v53  ;;  %v1136_v59 = vadd.f32 %v940_v57, %v378_v50  ;;  %v2888_v60 = vpop.f32.mrb[67].mxu0  ;;  %1246 = vst [vmem:[#allocation2 + $0x230] sm:$0xff] %v1173_v55  ;;  %v1174_v61 = vadd.f32 %v1092_v58, %v416_v52  ;;  %v2964_v62 = vpop.f32.mrb[67].mxu1 }
 0x1ae   : > { %1209 = vst [vmem:[#allocation2 + $0x108] sm:$0xff] %v1136_v59  ;;  %1247 = vst [vmem:[#allocation2 + $0x238] sm:$0xff] %v1174_v61 }
 0x1b1   : > { %v945_v1 = vpop.f32.mrb[68].mxu0  ;;  %v1097_v3 = vpop.f32.mrb[68].mxu1 }
 0x1b2   : > { %v1137_v4 = vadd.f32 %v945_v1, %v379_v63  ;;  %v2891_v5 = vpop.f32.mrb[69].mxu0  ;;  %v1175_v6 = vadd.f32 %v1097_v3, %v417_v0  ;;  %v2967_v7 = vpop.f32.mrb[69].mxu1 }
 0x1b3   : > { %v948_v8 = vpop.f32.mrb[70].mxu0  ;;  %v1100_v9 = vpop.f32.mrb[70].mxu1 }
 0x1b4   : > { %1210 = vst [vmem:[#allocation2 + $0x110] sm:$0xff] %v1137_v4  ;;  %v1138_v10 = vadd.f32 %v948_v8, %v380_v2  ;;  %v2892_v11 = vpop.f32.mrb[71].mxu0  ;;  %1248 = vst [vmem:[#allocation2 + $0x240] sm:$0x3] %v1175_v6  ;;  %v2968_v12 = vpop.f32.mrb[71].mxu1 }
 0x1b6   : > { %1211 = vst [vmem:[#allocation2 + $0x118] sm:$0xff] %v1138_v10 }
 0x1b8   : > { %1252 = sbr.rel (%p2394_p6) target bundleno = 855 (0x357), region = 44 }
 0x1b9   : > { %v953_v14 = vpop.f32.mrb[72].mxu0 }
 0x1ba   : > { %v1139_v16 = vadd.f32 %v953_v14, %v381_v13  ;;  %v2895_v17 = vpop.f32.mrb[73].mxu0 }
 0x1bb   : > { %v956_v18 = vpop.f32.mrb[74].mxu0 }
 0x1bc   : > { %1212 = vst [vmem:[#allocation2 + $0x120] sm:$0xff] %v1139_v16  ;;  %v1140_v19 = vadd.f32 %v956_v18, %v382_v15  ;;  %v2896_v20 = vpop.f32.mrb[75].mxu0 }
 0x1be   : > { %1213 = vst [vmem:[#allocation2 + $0x128] sm:$0xff] %v1140_v19 }
 0x1bf   : > { %v3363_v21 = vld [vmem:[#allocation2] sm:$0xff]  ;;  %v3365_v22 = vld [vmem:[#allocation2 + $0x8] sm:$0xff]  ;;  %v3367_v23 = vld [vmem:[#allocation2 + $0x10] sm:$0xff]  ;;  %vm1397_vm1 = vcmask 1041408  }
 0x1c0   : > { %4127 = vst [vmem:[#allocation3_spill] sm:$0xff] %v3363_v21  ;;  %4128 = vst [vmem:[#allocation4_spill] sm:$0xff] %v3365_v22  ;;  %v1326_v24 = vadd.f32 %v3365_v22, %v3363_v21  ;;  %v3371_v25 = vld [vmem:[#allocation2 + $0x18] sm:$0xff]  ;;  %v3374_v27 = vld [vmem:[#allocation2 + $0x20] sm:$0xff] }
 0x1c1   : > { %4129 = vst [vmem:[#allocation5_spill] sm:$0xff] %v3367_v23  ;;  %4130 = vst [vmem:[#allocation6_spill] sm:$0xff] %v3371_v25  ;;  %v3377_v29 = vld [vmem:[#allocation2 + $0x28] sm:$0xff]  ;;  %v3380_v31 = vld [vmem:[#allocation2 + $0x30] sm:$0xff] }
 0x1c2   : > { %v1327_v26 = vadd.f32 %v1326_v24, %v3367_v23  ;;  %4131 = vst [vmem:[#allocation7_spill] sm:$0xff] %v3374_v27  ;;  %4132 = vst [vmem:[#allocation8_spill] sm:$0xff] %v3377_v29  ;;  %v3383_v33 = vld [vmem:[#allocation2 + $0x38] sm:$0xff]  ;;  %v3386_v35 = vld [vmem:[#allocation2 + $0x40] sm:$0xff] }
 0x1c3   : > { %v3389_v37 = vld [vmem:[#allocation2 + $0x48] sm:$0xff]  ;;  %v3392_v39 = vld [vmem:[#allocation2 + $0x50] sm:$0xff]  ;;  %v3395_v41 = vld [vmem:[#allocation2 + $0x58] sm:$0xff] }
 0x1c4   : > { %v1328_v28 = vadd.f32 %v1327_v26, %v3371_v25  ;;  %v3398_v43 = vld [vmem:[#allocation2 + $0x60] sm:$0xff]  ;;  %v3401_v45 = vld [vmem:[#allocation2 + $0x68] sm:$0xff]  ;;  %v3404_v47 = vld [vmem:[#allocation2 + $0x70] sm:$0xff] }
 0x1c5   : > { %v3407_v49 = vld [vmem:[#allocation2 + $0x78] sm:$0xff]  ;;  %v3410_v51 = vld [vmem:[#allocation2 + $0x80] sm:$0xff]  ;;  %v3413_v53 = vld [vmem:[#allocation2 + $0x88] sm:$0xff] }
 0x1c6   : > { %v1329_v30 = vadd.f32 %v1328_v28, %v3374_v27  ;;  %v3416_v55 = vld [vmem:[#allocation2 + $0x90] sm:$0xff]  ;;  %v3419_v57 = vld [vmem:[#allocation2 + $0x98] sm:$0xff]  ;;  %v3422_v59 = vld [vmem:[#allocation2 + $0xa0] sm:$0xff] }
 0x1c7   : > { %v3425_v61 = vld [vmem:[#allocation2 + $0xa8] sm:$0xff]  ;;  %v3428_v63 = vld [vmem:[#allocation2 + $0xb0] sm:$0xff]  ;;  %v3431_v1 = vld [vmem:[#allocation2 + $0xb8] sm:$0xff] }
 0x1c8   : > { %v1330_v32 = vadd.f32 %v1329_v30, %v3377_v29  ;;  %v3434_v3 = vld [vmem:[#allocation2 + $0xc0] sm:$0xff]  ;;  %v3437_v5 = vld [vmem:[#allocation2 + $0xc8] sm:$0xff]  ;;  %v3440_v7 = vld [vmem:[#allocation2 + $0xd0] sm:$0xff] }
 0x1c9   : > { %v3443_v9 = vld [vmem:[#allocation2 + $0xd8] sm:$0xff]  ;;  %v3446_v11 = vld [vmem:[#allocation2 + $0xe0] sm:$0xff]  ;;  %v3449_v13 = vld [vmem:[#allocation2 + $0xe8] sm:$0xff] }
 0x1ca   : > { %v1331_v34 = vadd.f32 %v1330_v32, %v3380_v31  ;;  %v3452_v15 = vld [vmem:[#allocation2 + $0xf0] sm:$0xff]  ;;  %v3455_v17 = vld [vmem:[#allocation2 + $0xf8] sm:$0xff]  ;;  %v3458_v19 = vld [vmem:[#allocation2 + $0x100] sm:$0xff] }
 0x1cb   : > { %v3461_v24 = vld [vmem:[#allocation2 + $0x108] sm:$0xff]  ;;  %v3464_v28 = vld [vmem:[#allocation2 + $0x110] sm:$0xff]  ;;  %v3467_v32 = vld [vmem:[#allocation2 + $0x118] sm:$0xff] }
 0x1cc   : > { %v1332_v36 = vadd.f32 %v1331_v34, %v3383_v33 }
 0x1ce   : > { %v1333_v38 = vadd.f32 %v1332_v36, %v3386_v35  ;;  %v3470_v36 = vld [vmem:[#allocation2 + $0x120] sm:$0xff] }
 0x1d0   : > { %v1334_v40 = vadd.f32 %v1333_v38, %v3389_v37 }
 0x1d2   : > { %v1335_v42 = vadd.f32 %v1334_v40, %v3392_v39  ;;  %v3473_v40 = vld [vmem:[#allocation2 + $0x128] sm:$0xff] }
 0x1d4   : > { %v1336_v44 = vadd.f32 %v1335_v42, %v3395_v41 }
 0x1d6   : > { %v1337_v46 = vadd.f32 %v1336_v44, %v3398_v43  ;;  %v3476_v44 = vld [vmem:[#allocation2 + $0x130] sm:$0xff] }
 0x1d8   : > { %v1338_v48 = vadd.f32 %v1337_v46, %v3401_v45 }
 0x1da   : > { %v1339_v50 = vadd.f32 %v1338_v48, %v3404_v47  ;;  %v3479_v48 = vld [vmem:[#allocation2 + $0x138] sm:$0xff] }
 0x1dc   : > { %v1340_v52 = vadd.f32 %v1339_v50, %v3407_v49 }
 0x1de   : > { %v1341_v54 = vadd.f32 %v1340_v52, %v3410_v51  ;;  %v3482_v52 = vld [vmem:[#allocation2 + $0x140] sm:$0xff] }
 0x1e0   : > { %v1342_v56 = vadd.f32 %v1341_v54, %v3413_v53 }
 0x1e2   : > { %v1343_v58 = vadd.f32 %v1342_v56, %v3416_v55  ;;  %v3485_v56 = vld [vmem:[#allocation2 + $0x148] sm:$0xff] }
 0x1e4   : > { %v1344_v60 = vadd.f32 %v1343_v58, %v3419_v57 }
 0x1e6   : > { %v1345_v62 = vadd.f32 %v1344_v60, %v3422_v59  ;;  %v3488_v60 = vld [vmem:[#allocation2 + $0x150] sm:$0xff] }
 0x1e8   : > { %v1346_v0 = vadd.f32 %v1345_v62, %v3425_v61 }
 0x1ea   : > { %v1347_v2 = vadd.f32 %v1346_v0, %v3428_v63  ;;  %v3491_v0 = vld [vmem:[#allocation2 + $0x158] sm:$0xff] }
 0x1eb   : > { %4133 = vst [vmem:[#allocation9_spill] sm:$0xff] %v3491_v0 }
 0x1ec   : > { %v1348_v4 = vadd.f32 %v1347_v2, %v3431_v1 }
 0x1ee   : > { %v1349_v6 = vadd.f32 %v1348_v4, %v3434_v3  ;;  %v3494_v4 = vld [vmem:[#allocation2 + $0x160] sm:$0xff] }
 0x1ef   : > { %4134 = vst [vmem:[#allocation10_spill] sm:$0xff] %v3494_v4 }
 0x1f0   : > { %v1350_v8 = vadd.f32 %v1349_v6, %v3437_v5 }
 0x1f2   : > { %v1351_v10 = vadd.f32 %v1350_v8, %v3440_v7  ;;  %v3497_v8 = vld [vmem:[#allocation2 + $0x168] sm:$0xff] }
 0x1f3   : > { %4135 = vst [vmem:[#allocation11_spill] sm:$0xff] %v3497_v8 }
 0x1f4   : > { %v1352_v12 = vadd.f32 %v1351_v10, %v3443_v9 }
 0x1f6   : > { %v1353_v14 = vadd.f32 %v1352_v12, %v3446_v11  ;;  %v3500_v12 = vld [vmem:[#allocation2 + $0x170] sm:$0xff] }
 0x1f7   : > { %4136 = vst [vmem:[#allocation12_spill] sm:$0xff] %v3500_v12 }
 0x1f8   : > { %v1354_v16 = vadd.f32 %v1353_v14, %v3449_v13 }
 0x1fa   : > { %v1355_v18 = vadd.f32 %v1354_v16, %v3452_v15  ;;  %v3503_v16 = vld [vmem:[#allocation2 + $0x178] sm:$0xff] }
 0x1fb   : > { %4137 = vst [vmem:[#allocation13_spill] sm:$0xff] %v3503_v16 }
 0x1fc   : > { %v1356_v20 = vadd.f32 %v1355_v18, %v3455_v17 }
 0x1fe   : > { %v1357_v26 = vadd.f32 %v1356_v20, %v3458_v19  ;;  %v3506_v20 = vld [vmem:[#allocation2 + $0x180] sm:$0xff] }
 0x1ff   : > { %4138 = vst [vmem:[#allocation14_spill] sm:$0xff] %v3506_v20 }
 0x200   : > { %v1358_v30 = vadd.f32 %v1357_v26, %v3461_v24 }
 0x202   : > { %v1359_v34 = vadd.f32 %v1358_v30, %v3464_v28  ;;  %v3509_v30 = vld [vmem:[#allocation2 + $0x188] sm:$0xff] }
 0x203   : > { %4139 = vst [vmem:[#allocation15_spill] sm:$0xff] %v3509_v30 }
 0x204   : > { %v1360_v38 = vadd.f32 %v1359_v34, %v3467_v32 }
 0x206   : > { %v1361_v42 = vadd.f32 %v1360_v38, %v3470_v36  ;;  %v3512_v38 = vld [vmem:[#allocation2 + $0x190] sm:$0xff] }
 0x207   : > { %4140 = vst [vmem:[#allocation16_spill] sm:$0xff] %v3512_v38 }
 0x208   : > { %v1362_v46 = vadd.f32 %v1361_v42, %v3473_v40 }
 0x20a   : > { %v1363_v50 = vadd.f32 %v1362_v46, %v3476_v44  ;;  %v3515_v46 = vld [vmem:[#allocation2 + $0x198] sm:$0xff] }
 0x20b   : > { %4141 = vst [vmem:[#allocation17_spill] sm:$0xff] %v3515_v46 }
 0x20c   : > { %v1364_v54 = vadd.f32 %v1363_v50, %v3479_v48 }
 0x20e   : > { %v1365_v58 = vadd.f32 %v1364_v54, %v3482_v52  ;;  %v3518_v54 = vld [vmem:[#allocation2 + $0x1a0] sm:$0xff] }
 0x20f   : > { %4142 = vst [vmem:[#allocation18_spill] sm:$0xff] %v3518_v54 }
 0x210   : > { %v1366_v62 = vadd.f32 %v1365_v58, %v3485_v56 }
 0x212   : > { %v1367_v2 = vadd.f32 %v1366_v62, %v3488_v60  ;;  %v3521_v62 = vld [vmem:[#allocation2 + $0x1a8] sm:$0xff] }
 0x213   : > { %4143 = vst [vmem:[#allocation19_spill] sm:$0xff] %v3521_v62 }
 0x214   : > { %v1368_v6 = vadd.f32 %v1367_v2, %v3491_v0 }
 0x216   : > { %v1369_v10 = vadd.f32 %v1368_v6, %v3494_v4  ;;  %v3524_v6 = vld [vmem:[#allocation2 + $0x1b0] sm:$0xff] }
 0x217   : > { %4144 = vst [vmem:[#allocation20_spill] sm:$0xff] %v3524_v6 }
 0x218   : > { %v1370_v14 = vadd.f32 %v1369_v10, %v3497_v8 }
 0x21a   : > { %v1371_v18 = vadd.f32 %v1370_v14, %v3500_v12  ;;  %v3527_v14 = vld [vmem:[#allocation2 + $0x1b8] sm:$0xff] }
 0x21b   : > { %4145 = vst [vmem:[#allocation21_spill] sm:$0xff] %v3527_v14 }
 0x21c   : > { %v1372_v26 = vadd.f32 %v1371_v18, %v3503_v16 }
 0x21e   : > { %v1373_v34 = vadd.f32 %v1372_v26, %v3506_v20  ;;  %v3530_v26 = vld [vmem:[#allocation2 + $0x1c0] sm:$0xff] }
 0x21f   : > { %4146 = vst [vmem:[#allocation22_spill] sm:$0xff] %v3530_v26 }
 0x220   : > { %v1374_v42 = vadd.f32 %v1373_v34, %v3509_v30 }
 0x222   : > { %v1375_v50 = vadd.f32 %v1374_v42, %v3512_v38  ;;  %v3533_v42 = vld [vmem:[#allocation2 + $0x1c8] sm:$0xff]  ;;  %v3564_v38 = vld [vmem:[#allocation2 + $0x218] sm:$0xff] }
 0x223   : > { %4147 = vst [vmem:[#allocation23_spill] sm:$0xff] %v3533_v42  ;;  %4157 = vst [vmem:[#allocation33_spill] sm:$0xff] %v3564_v38 }
 0x224   : > { %v1376_v58 = vadd.f32 %v1375_v50, %v3515_v46  ;;  %v3536_v46 = vld [vmem:[#allocation2 + $0x1d0] sm:$0xff] }
 0x225   : > { %4148 = vst [vmem:[#allocation24_spill] sm:$0xff] %v3536_v46 }
 0x226   : > { %v1377_v2 = vadd.f32 %v1376_v58, %v3518_v54  ;;  %v3539_v54 = vld [vmem:[#allocation2 + $0x1d8] sm:$0xff] }
 0x227   : > { %4149 = vst [vmem:[#allocation25_spill] sm:$0xff] %v3539_v54 }
 0x228   : > { %v1378_v10 = vadd.f32 %v1377_v2, %v3521_v62  ;;  %v3542_v62 = vld [vmem:[#allocation2 + $0x1e0] sm:$0xff] }
 0x229   : > { %4150 = vst [vmem:[#allocation26_spill] sm:$0xff] %v3542_v62 }
 0x22a   : > { %v1379_v18 = vadd.f32 %v1378_v10, %v3524_v6  ;;  %v3545_v6 = vld [vmem:[#allocation2 + $0x1e8] sm:$0xff] }
 0x22b   : > { %4151 = vst [vmem:[#allocation27_spill] sm:$0xff] %v3545_v6 }
 0x22c   : > { %v1380_v34 = vadd.f32 %v1379_v18, %v3527_v14  ;;  %v3548_v14 = vld [vmem:[#allocation2 + $0x1f0] sm:$0xff] }
 0x22d   : > { %4152 = vst [vmem:[#allocation28_spill] sm:$0xff] %v3548_v14 }
 0x22e   : > { %v1381_v50 = vadd.f32 %v1380_v34, %v3530_v26  ;;  %v3551_v26 = vld [vmem:[#allocation2 + $0x1f8] sm:$0xff] }
 0x22f   : > { %4153 = vst [vmem:[#allocation29_spill] sm:$0xff] %v3551_v26 }
 0x230   : > { %v1382_v58 = vadd.f32 %v1381_v50, %v3533_v42  ;;  %v3554_v42 = vld [vmem:[#allocation2 + $0x200] sm:$0xff] }
 0x231   : > { %4154 = vst [vmem:[#allocation30_spill] sm:$0xff] %v3554_v42 }
 0x232   : > { %v1383_v2 = vadd.f32 %v1382_v58, %v3536_v46  ;;  %v3557_v46 = vld [vmem:[#allocation2 + $0x208] sm:$0xff] }
 0x233   : > { %4155 = vst [vmem:[#allocation31_spill] sm:$0xff] %v3557_v46 }
 0x234   : > { %v1384_v10 = vadd.f32 %v1383_v2, %v3539_v54  ;;  %v3560_v54 = vld [vmem:[#allocation2 + $0x210] sm:$0xff] }
 0x235   : > { %4156 = vst [vmem:[#allocation32_spill] sm:$0xff] %v3560_v54 }
 0x236   : > { %v1385_v18 = vadd.f32 %v1384_v10, %v3542_v62 }
 0x238   : > { %v1386_v34 = vadd.f32 %v1385_v18, %v3545_v6  ;;  %v3567_v6 = vld [vmem:[#allocation2 + $0x220] sm:$0xff] }
 0x239   : > { %4158 = vst [vmem:[#allocation34_spill] sm:$0xff] %v3567_v6 }
 0x23a   : > { %v1387_v50 = vadd.f32 %v1386_v34, %v3548_v14  ;;  %v3570_v14 = vld [vmem:[#allocation2 + $0x228] sm:$0xff] }
 0x23b   : > { %4159 = vst [vmem:[#allocation35_spill] sm:$0xff] %v3570_v14 }
 0x23c   : > { %v1388_v58 = vadd.f32 %v1387_v50, %v3551_v26  ;;  %v3573_v26 = vld [vmem:[#allocation2 + $0x230] sm:$0xff] }
 0x23d   : > { %4160 = vst [vmem:[#allocation36_spill] sm:$0xff] %v3573_v26 }
 0x23e   : > { %v1389_v2 = vadd.f32 %v1388_v58, %v3554_v42  ;;  %v3576_v42 = vld [vmem:[#allocation2 + $0x238] sm:$0xff] }
 0x240   : > { %v1390_v10 = vadd.f32 %v1389_v2, %v3557_v46  ;;  %v3578_v2 = vld [vmem:[#allocation2 + $0x240] sm:$0x3] }
 0x242   : > { %v1391_v62 = vadd.f32 %v1390_v10, %v3560_v54 }
 0x244   : > { %v1392_v18 = vadd.f32 %v1391_v62, %v3564_v38  ;;  %v1398_v62 = vsel %vm1397_vm1, %v3578_v2, 0.0 }
 0x246   : > { %v1393_v34 = vadd.f32 %v1392_v18, %v3567_v6 }
 0x248   : > { %v1394_v50 = vadd.f32 %v1393_v34, %v3570_v14 }
 0x24a   : > { %v1395_v58 = vadd.f32 %v1394_v50, %v3573_v26 }
 0x24c   : > { %v1396_v10 = vadd.f32 %v1395_v58, %v3576_v42 }
 0x24e   : > { %v1399_v38 = vadd.f32 %v1398_v62, %v1396_v10 }
 0x250   : > { %v1400_v18 = vrot.slane %v1399_v38, 4 }
 0x252   : > { %v1401_v6 = vadd.f32 %v1400_v18, %v1399_v38 }
 0x254   : > { %v1402_v54 = vrot.slane %v1401_v6, 2 }
 0x256   : > { %v1403_v46 = vadd.f32 %v1402_v54, %v1401_v6 }
 0x258   : > { %v1404_v34 = vrot.slane %v1403_v46, 1 }
 0x25a   : > { %v1405_v14 = vadd.f32 %v1404_v34, %v1403_v46 }
 0x25c   : > { %v3583_v30 = vmul.f32 0.0017301039, %v1405_v14 }
 0x25e   : > { %v1408_v50 = vsub.f32 %v3363_v21, %v3583_v30  ;;  %v1409_v26 = vsub.f32 %v3365_v22, %v3583_v30  ;;  %v1410_v58 = vsub.f32 %v3367_v23, %v3583_v30  ;;  %v1411_v10 = vsub.f32 %v3371_v25, %v3583_v30 }
 0x25f   : > { %v1412_v54 = vsub.f32 %v3374_v27, %v3583_v30  ;;  %v1413_v6 = vsub.f32 %v3377_v29, %v3583_v30  ;;  %v1414_v34 = vsub.f32 %v3380_v31, %v3583_v30  ;;  %v1415_v23 = vsub.f32 %v3383_v33, %v3583_v30 }
 0x260   : > { %v1481_v62 = vmul.f32 %v1408_v50, %v1408_v50  ;;  %v1482_v38 = vmul.f32 %v1409_v26, %v1409_v26  ;;  %v1483_v46 = vmul.f32 %v1410_v58, %v1410_v58  ;;  %v1484_v14 = vmul.f32 %v1411_v10, %v1411_v10 }
 0x261   : > { %v1485_v22 = vmul.f32 %v1412_v54, %v1412_v54  ;;  %v1486_v25 = vmul.f32 %v1413_v6, %v1413_v6  ;;  %v1416_v26 = vsub.f32 %v3386_v35, %v3583_v30  ;;  %v1487_v27 = vmul.f32 %v1414_v34, %v1414_v34 }
 0x262   : > { %v1554_v18 = vadd.f32 %v1482_v38, %v1481_v62  ;;  %v1417_v29 = vsub.f32 %v3389_v37, %v3583_v30  ;;  %v1488_v10 = vmul.f32 %v1415_v23, %v1415_v23  ;;  %v1418_v38 = vsub.f32 %v3392_v39, %v3583_v30 }
 0x263   : > { %v1489_v54 = vmul.f32 %v1416_v26, %v1416_v26 }
 0x264   : > { %v1555_v21 = vadd.f32 %v1554_v18, %v1483_v46  ;;  %v1419_v18 = vsub.f32 %v3395_v41, %v3583_v30  ;;  %v1490_v6 = vmul.f32 %v1417_v29, %v1417_v29  ;;  %v1491_v34 = vmul.f32 %v1418_v38, %v1418_v38 }
 0x266   : > { %v1556_v50 = vadd.f32 %v1555_v21, %v1484_v14  ;;  %v1420_v14 = vsub.f32 %v3398_v43, %v3583_v30  ;;  %v1492_v23 = vmul.f32 %v1419_v18, %v1419_v18 }
 0x268   : > { %v1557_v58 = vadd.f32 %v1556_v50, %v1485_v22  ;;  %v1421_v50 = vsub.f32 %v3401_v45, %v3583_v30  ;;  %v1493_v26 = vmul.f32 %v1420_v14, %v1420_v14 }
 0x26a   : > { %v1558_v62 = vadd.f32 %v1557_v58, %v1486_v25  ;;  %v1422_v58 = vsub.f32 %v3404_v47, %v3583_v30  ;;  %v1494_v29 = vmul.f32 %v1421_v50, %v1421_v50 }
 0x26c   : > { %v1559_v46 = vadd.f32 %v1558_v62, %v1487_v27  ;;  %v1423_v62 = vsub.f32 %v3407_v49, %v3583_v30  ;;  %v1495_v38 = vmul.f32 %v1422_v58, %v1422_v58 }
 0x26e   : > { %v1560_v21 = vadd.f32 %v1559_v46, %v1488_v10  ;;  %v1424_v46 = vsub.f32 %v3410_v51, %v3583_v30  ;;  %v1496_v18 = vmul.f32 %v1423_v62, %v1423_v62 }
 0x270   : > { %v1561_v22 = vadd.f32 %v1560_v21, %v1489_v54  ;;  %v1425_v21 = vsub.f32 %v3413_v53, %v3583_v30  ;;  %v1497_v14 = vmul.f32 %v1424_v46, %v1424_v46 }
 0x272   : > { %v1562_v25 = vadd.f32 %v1561_v22, %v1490_v6  ;;  %v1426_v22 = vsub.f32 %v3416_v55, %v3583_v30  ;;  %v1498_v50 = vmul.f32 %v1425_v21, %v1425_v21 }
 0x274   : > { %v1563_v27 = vadd.f32 %v1562_v25, %v1491_v34  ;;  %v1427_v25 = vsub.f32 %v3419_v57, %v3583_v30  ;;  %v1499_v58 = vmul.f32 %v1426_v22, %v1426_v22 }
 0x276   : > { %v1564_v10 = vadd.f32 %v1563_v27, %v1492_v23  ;;  %v1428_v27 = vsub.f32 %v3422_v59, %v3583_v30  ;;  %v1500_v62 = vmul.f32 %v1427_v25, %v1427_v25 }
 0x278   : > { %v1565_v54 = vadd.f32 %v1564_v10, %v1493_v26  ;;  %v1429_v10 = vsub.f32 %v3425_v61, %v3583_v30  ;;  %v1501_v46 = vmul.f32 %v1428_v27, %v1428_v27 }
 0x27a   : > { %v1566_v6 = vadd.f32 %v1565_v54, %v1494_v29  ;;  %v1430_v54 = vsub.f32 %v3428_v63, %v3583_v30  ;;  %v1502_v21 = vmul.f32 %v1429_v10, %v1429_v10 }
 0x27c   : > { %v1567_v34 = vadd.f32 %v1566_v6, %v1495_v38  ;;  %v1431_v6 = vsub.f32 %v3431_v1, %v3583_v30  ;;  %v1503_v22 = vmul.f32 %v1430_v54, %v1430_v54 }
 0x27e   : > { %v1568_v23 = vadd.f32 %v1567_v34, %v1496_v18  ;;  %v1432_v34 = vsub.f32 %v3434_v3, %v3583_v30  ;;  %v1504_v25 = vmul.f32 %v1431_v6, %v1431_v6 }
 0x280   : > { %v1569_v26 = vadd.f32 %v1568_v23, %v1497_v14  ;;  %v1433_v23 = vsub.f32 %v3437_v5, %v3583_v30  ;;  %v1505_v27 = vmul.f32 %v1432_v34, %v1432_v34 }
 0x282   : > { %v1570_v29 = vadd.f32 %v1569_v26, %v1498_v50  ;;  %v1434_v26 = vsub.f32 %v3440_v7, %v3583_v30  ;;  %v1506_v10 = vmul.f32 %v1433_v23, %v1433_v23 }
 0x284   : > { %v1571_v38 = vadd.f32 %v1570_v29, %v1499_v58  ;;  %v1435_v29 = vsub.f32 %v3443_v9, %v3583_v30  ;;  %v1507_v54 = vmul.f32 %v1434_v26, %v1434_v26 }
 0x286   : > { %v1572_v18 = vadd.f32 %v1571_v38, %v1500_v62  ;;  %v1436_v38 = vsub.f32 %v3446_v11, %v3583_v30  ;;  %v1508_v6 = vmul.f32 %v1435_v29, %v1435_v29 }
 0x288   : > { %v1573_v14 = vadd.f32 %v1572_v18, %v1501_v46  ;;  %v1437_v18 = vsub.f32 %v3449_v13, %v3583_v30  ;;  %v1509_v34 = vmul.f32 %v1436_v38, %v1436_v38 }
 0x28a   : > { %v1574_v50 = vadd.f32 %v1573_v14, %v1502_v21  ;;  %v1438_v14 = vsub.f32 %v3452_v15, %v3583_v30  ;;  %v1510_v23 = vmul.f32 %v1437_v18, %v1437_v18 }
 0x28c   : > { %v1575_v58 = vadd.f32 %v1574_v50, %v1503_v22  ;;  %v1439_v50 = vsub.f32 %v3455_v17, %v3583_v30  ;;  %v1511_v26 = vmul.f32 %v1438_v14, %v1438_v14 }
 0x28e   : > { %v1576_v62 = vadd.f32 %v1575_v58, %v1504_v25  ;;  %v1440_v58 = vsub.f32 %v3458_v19, %v3583_v30  ;;  %v1512_v29 = vmul.f32 %v1439_v50, %v1439_v50 }
 0x290   : > { %v1577_v46 = vadd.f32 %v1576_v62, %v1505_v27  ;;  %v1441_v62 = vsub.f32 %v3461_v24, %v3583_v30  ;;  %v1513_v38 = vmul.f32 %v1440_v58, %v1440_v58 }
 0x292   : > { %v1578_v21 = vadd.f32 %v1577_v46, %v1506_v10  ;;  %v1442_v46 = vsub.f32 %v3464_v28, %v3583_v30  ;;  %v1514_v18 = vmul.f32 %v1441_v62, %v1441_v62 }
 0x294   : > { %v1579_v22 = vadd.f32 %v1578_v21, %v1507_v54  ;;  %v1443_v21 = vsub.f32 %v3467_v32, %v3583_v30  ;;  %v1515_v14 = vmul.f32 %v1442_v46, %v1442_v46 }
 0x296   : > { %v1580_v25 = vadd.f32 %v1579_v22, %v1508_v6  ;;  %v1444_v22 = vsub.f32 %v3470_v36, %v3583_v30  ;;  %v1516_v50 = vmul.f32 %v1443_v21, %v1443_v21 }
 0x298   : > { %v1581_v27 = vadd.f32 %v1580_v25, %v1509_v34  ;;  %v1445_v25 = vsub.f32 %v3473_v40, %v3583_v30  ;;  %v1517_v58 = vmul.f32 %v1444_v22, %v1444_v22 }
 0x29a   : > { %v1582_v10 = vadd.f32 %v1581_v27, %v1510_v23  ;;  %v1446_v27 = vsub.f32 %v3476_v44, %v3583_v30  ;;  %v1518_v62 = vmul.f32 %v1445_v25, %v1445_v25 }
 0x29c   : > { %v1583_v54 = vadd.f32 %v1582_v10, %v1511_v26  ;;  %v1447_v10 = vsub.f32 %v3479_v48, %v3583_v30  ;;  %v1519_v46 = vmul.f32 %v1446_v27, %v1446_v27 }
 0x29e   : > { %v1584_v6 = vadd.f32 %v1583_v54, %v1512_v29  ;;  %v1448_v54 = vsub.f32 %v3482_v52, %v3583_v30  ;;  %v1520_v21 = vmul.f32 %v1447_v10, %v1447_v10 }
 0x2a0   : > { %v1585_v34 = vadd.f32 %v1584_v6, %v1513_v38  ;;  %v1449_v6 = vsub.f32 %v3485_v56, %v3583_v30  ;;  %v1521_v22 = vmul.f32 %v1448_v54, %v1448_v54 }
 0x2a2   : > { %v1586_v23 = vadd.f32 %v1585_v34, %v1514_v18  ;;  %v1450_v34 = vsub.f32 %v3488_v60, %v3583_v30  ;;  %v1522_v25 = vmul.f32 %v1449_v6, %v1449_v6 }
 0x2a4   : > { %v1587_v26 = vadd.f32 %v1586_v23, %v1515_v14  ;;  %v1451_v23 = vsub.f32 %v3491_v0, %v3583_v30  ;;  %v1523_v27 = vmul.f32 %v1450_v34, %v1450_v34 }
 0x2a6   : > { %v1588_v29 = vadd.f32 %v1587_v26, %v1516_v50  ;;  %v1452_v26 = vsub.f32 %v3494_v4, %v3583_v30  ;;  %v1524_v10 = vmul.f32 %v1451_v23, %v1451_v23 }
 0x2a8   : > { %v1589_v38 = vadd.f32 %v1588_v29, %v1517_v58  ;;  %v1453_v29 = vsub.f32 %v3497_v8, %v3583_v30  ;;  %v1525_v54 = vmul.f32 %v1452_v26, %v1452_v26 }
 0x2aa   : > { %v1590_v18 = vadd.f32 %v1589_v38, %v1518_v62  ;;  %v1454_v38 = vsub.f32 %v3500_v12, %v3583_v30  ;;  %v1526_v6 = vmul.f32 %v1453_v29, %v1453_v29 }
 0x2ac   : > { %v1591_v14 = vadd.f32 %v1590_v18, %v1519_v46  ;;  %v1455_v18 = vsub.f32 %v3503_v16, %v3583_v30  ;;  %v1527_v34 = vmul.f32 %v1454_v38, %v1454_v38 }
 0x2ae   : > { %v1592_v50 = vadd.f32 %v1591_v14, %v1520_v21  ;;  %v1456_v14 = vsub.f32 %v3506_v20, %v3583_v30  ;;  %v1528_v23 = vmul.f32 %v1455_v18, %v1455_v18 }
 0x2b0   : > { %v1593_v58 = vadd.f32 %v1592_v50, %v1521_v22  ;;  %v4161_v50 = vld [vmem:[#allocation15_spill] sm:$0xff]  ;;  %v1529_v26 = vmul.f32 %v1456_v14, %v1456_v14 }
 0x2b1   : > { %v1457_v8 = vsub.f32 %v4161_v50, %v3583_v30 }
 0x2b2   : > { %v1594_v62 = vadd.f32 %v1593_v58, %v1522_v25  ;;  %v4162_v58 = vld [vmem:[#allocation16_spill] sm:$0xff] }
 0x2b3   : > { %v1458_v12 = vsub.f32 %v4162_v58, %v3583_v30  ;;  %v1530_v29 = vmul.f32 %v1457_v8, %v1457_v8 }
 0x2b4   : > { %v1595_v46 = vadd.f32 %v1594_v62, %v1523_v27  ;;  %v4163_v62 = vld [vmem:[#allocation17_spill] sm:$0xff] }
 0x2b5   : > { %v1459_v16 = vsub.f32 %v4163_v62, %v3583_v30  ;;  %v1531_v38 = vmul.f32 %v1458_v12, %v1458_v12 }
 0x2b6   : > { %v1596_v21 = vadd.f32 %v1595_v46, %v1524_v10  ;;  %v4164_v46 = vld [vmem:[#allocation18_spill] sm:$0xff] }
 0x2b7   : > { %v1460_v20 = vsub.f32 %v4164_v46, %v3583_v30  ;;  %v1532_v18 = vmul.f32 %v1459_v16, %v1459_v16 }
 0x2b8   : > { %v1597_v22 = vadd.f32 %v1596_v21, %v1525_v54  ;;  %v4165_v21 = vld [vmem:[#allocation19_spill] sm:$0xff] }
 0x2b9   : > { %v1461_v50 = vsub.f32 %v4165_v21, %v3583_v30  ;;  %v1533_v14 = vmul.f32 %v1460_v20, %v1460_v20 }
 0x2ba   : > { %v1598_v25 = vadd.f32 %v1597_v22, %v1526_v6  ;;  %v4166_v22 = vld [vmem:[#allocation20_spill] sm:$0xff] }
 0x2bb   : > { %v1462_v58 = vsub.f32 %v4166_v22, %v3583_v30  ;;  %v1534_v8 = vmul.f32 %v1461_v50, %v1461_v50 }
 0x2bc   : > { %v1599_v27 = vadd.f32 %v1598_v25, %v1527_v34  ;;  %v4167_v25 = vld [vmem:[#allocation21_spill] sm:$0xff] }
 0x2bd   : > { %v1463_v62 = vsub.f32 %v4167_v25, %v3583_v30  ;;  %v1535_v12 = vmul.f32 %v1462_v58, %v1462_v58 }
 0x2be   : > { %v1600_v10 = vadd.f32 %v1599_v27, %v1528_v23  ;;  %v4168_v27 = vld [vmem:[#allocation22_spill] sm:$0xff] }
 0x2bf   : > { %v1464_v46 = vsub.f32 %v4168_v27, %v3583_v30  ;;  %v1536_v16 = vmul.f32 %v1463_v62, %v1463_v62 }
 0x2c0   : > { %v1601_v54 = vadd.f32 %v1600_v10, %v1529_v26  ;;  %v4169_v10 = vld [vmem:[#allocation23_spill] sm:$0xff] }
 0x2c1   : > { %v1465_v21 = vsub.f32 %v4169_v10, %v3583_v30  ;;  %v1537_v20 = vmul.f32 %v1464_v46, %v1464_v46 }
 0x2c2   : > { %v1602_v6 = vadd.f32 %v1601_v54, %v1530_v29  ;;  %v4170_v54 = vld [vmem:[#allocation24_spill] sm:$0xff] }
 0x2c3   : > { %v1466_v22 = vsub.f32 %v4170_v54, %v3583_v30  ;;  %v1538_v50 = vmul.f32 %v1465_v21, %v1465_v21 }
 0x2c4   : > { %v1603_v34 = vadd.f32 %v1602_v6, %v1531_v38  ;;  %v4171_v6 = vld [vmem:[#allocation25_spill] sm:$0xff] }
 0x2c5   : > { %v1467_v25 = vsub.f32 %v4171_v6, %v3583_v30  ;;  %v1539_v58 = vmul.f32 %v1466_v22, %v1466_v22 }
 0x2c6   : > { %v1604_v23 = vadd.f32 %v1603_v34, %v1532_v18  ;;  %v4172_v34 = vld [vmem:[#allocation26_spill] sm:$0xff] }
 0x2c7   : > { %v1468_v27 = vsub.f32 %v4172_v34, %v3583_v30  ;;  %v1540_v62 = vmul.f32 %v1467_v25, %v1467_v25 }
 0x2c8   : > { %v1605_v26 = vadd.f32 %v1604_v23, %v1533_v14  ;;  %v4173_v23 = vld [vmem:[#allocation27_spill] sm:$0xff] }
 0x2c9   : > { %v1469_v10 = vsub.f32 %v4173_v23, %v3583_v30  ;;  %v1541_v46 = vmul.f32 %v1468_v27, %v1468_v27 }
 0x2ca   : > { %v1606_v29 = vadd.f32 %v1605_v26, %v1534_v8  ;;  %v4174_v26 = vld [vmem:[#allocation28_spill] sm:$0xff] }
 0x2cb   : > { %v1470_v54 = vsub.f32 %v4174_v26, %v3583_v30  ;;  %v1542_v21 = vmul.f32 %v1469_v10, %v1469_v10 }
 0x2cc   : > { %v1607_v38 = vadd.f32 %v1606_v29, %v1535_v12  ;;  %v4175_v29 = vld [vmem:[#allocation29_spill] sm:$0xff] }
 0x2cd   : > { %v1471_v6 = vsub.f32 %v4175_v29, %v3583_v30  ;;  %v1543_v22 = vmul.f32 %v1470_v54, %v1470_v54 }
 0x2ce   : > { %v1608_v18 = vadd.f32 %v1607_v38, %v1536_v16  ;;  %v4176_v38 = vld [vmem:[#allocation30_spill] sm:$0xff] }
 0x2cf   : > { %v1472_v34 = vsub.f32 %v4176_v38, %v3583_v30  ;;  %v1544_v25 = vmul.f32 %v1471_v6, %v1471_v6 }
 0x2d0   : > { %v1609_v14 = vadd.f32 %v1608_v18, %v1537_v20  ;;  %v4177_v18 = vld [vmem:[#allocation31_spill] sm:$0xff] }
 0x2d1   : > { %v1473_v23 = vsub.f32 %v4177_v18, %v3583_v30  ;;  %v1545_v27 = vmul.f32 %v1472_v34, %v1472_v34 }
 0x2d2   : > { %v1610_v8 = vadd.f32 %v1609_v14, %v1538_v50  ;;  %v4178_v14 = vld [vmem:[#allocation32_spill] sm:$0xff] }
 0x2d3   : > { %v1474_v26 = vsub.f32 %v4178_v14, %v3583_v30  ;;  %v1546_v10 = vmul.f32 %v1473_v23, %v1473_v23  ;;  %v1479_v23 = vsub.f32 %v3576_v42, %v3583_v30 }
 0x2d4   : > { %v1611_v12 = vadd.f32 %v1610_v8, %v1539_v58  ;;  %v4179_v8 = vld [vmem:[#allocation33_spill] sm:$0xff] }
 0x2d5   : > { %v1475_v29 = vsub.f32 %v4179_v8, %v3583_v30  ;;  %v1547_v54 = vmul.f32 %v1474_v26, %v1474_v26 }
 0x2d6   : > { %v1612_v16 = vadd.f32 %v1611_v12, %v1540_v62  ;;  %v4180_v12 = vld [vmem:[#allocation34_spill] sm:$0xff] }
 0x2d7   : > { %v1476_v38 = vsub.f32 %v4180_v12, %v3583_v30  ;;  %v1548_v6 = vmul.f32 %v1475_v29, %v1475_v29 }
 0x2d8   : > { %v1613_v20 = vadd.f32 %v1612_v16, %v1541_v46  ;;  %v4181_v16 = vld [vmem:[#allocation35_spill] sm:$0xff] }
 0x2d9   : > { %v1477_v18 = vsub.f32 %v4181_v16, %v3583_v30  ;;  %v1549_v34 = vmul.f32 %v1476_v38, %v1476_v38 }
 0x2da   : > { %v1614_v50 = vadd.f32 %v1613_v20, %v1542_v21  ;;  %v4182_v20 = vld [vmem:[#allocation36_spill] sm:$0xff] }
 0x2db   : > { %v1478_v14 = vsub.f32 %v4182_v20, %v3583_v30 }
 0x2dc   : > { %v1615_v58 = vadd.f32 %v1614_v50, %v1543_v22  ;;  %v1480_v50 = vsub.f32 %v3578_v2, %v3583_v30 }
 0x2dd   : > { %v1551_v26 = vmul.f32 %v1478_v14, %v1478_v14  ;;  %v1634_v14 = vld [vmem:[%s4075_s2] sm:$0x1] }
 0x2de   : > { %v1616_v62 = vadd.f32 %v1615_v58, %v1544_v25  ;;  %v1550_v25 = vmul.f32 %v1477_v18, %v1477_v18  ;;  %v1553_v8 = vmul.f32 %v1480_v50, %v1480_v50  ;;  %v1642_v18 = vlaneseq }
 0x2e0   : > { %v1617_v46 = vadd.f32 %v1616_v62, %v1545_v27  ;;  %v1552_v62 = vmul.f32 %v1479_v23, %v1479_v23  ;;  %v1638_v23 = vld [vmem:[%s4076_s3] sm:$0x1] }
 0x2e2   : > { %v1618_v21 = vadd.f32 %v1617_v46, %v1546_v10  ;;  %v1625_v10 = vsel %vm1397_vm1, %v1553_v8, 0.0 }
 0x2e4   : > { %v1619_v22 = vadd.f32 %v1618_v21, %v1547_v54 }
 0x2e6   : > { %v1620_v58 = vadd.f32 %v1619_v22, %v1548_v6  ;;  %v1643_v6 = vshrl.u32 %v1642_v18, 7 }
 0x2e8   : > { %v1621_v27 = vadd.f32 %v1620_v58, %v1549_v34  ;;  %v1644_v34 = vsub.s32 0, %v1643_v6 }
 0x2ea   : > { %v1622_v12 = vadd.f32 %v1621_v27, %v1550_v25  ;;  %v4184_v27 = vld [vmem:[#allocation4_spill] sm:$0xff] }
 0x2ec   : > { %v1623_v29 = vadd.f32 %v1622_v12, %v1551_v26 }
 0x2ee   : > { %v1624_v46 = vadd.f32 %v1623_v29, %v1552_v62  ;;  %v4185_v62 = vld [vmem:[#allocation5_spill] sm:$0xff]  ;;  %v4186_v29 = vld [vmem:[#allocation6_spill] sm:$0xff] }
 0x2f0   : > { %v1626_v16 = vadd.f32 %v1625_v10, %v1624_v46  ;;  %v4187_v46 = vld [vmem:[#allocation7_spill] sm:$0xff] }
 0x2f2   : > { %v1627_v38 = vrot.slane %v1626_v16, 4 }
 0x2f4   : > { %v1628_v54 = vadd.f32 %v1627_v38, %v1626_v16  ;;  %v4188_v38 = vld [vmem:[#allocation8_spill] sm:$0xff] }
 0x2f6   : > { %v1629_v21 = vrot.slane %v1628_v54, 2 }
 0x2f8   : > { %v1630_v20 = vadd.f32 %v1629_v21, %v1628_v54 }
 0x2fa   : > { %v1631_v2 = vrot.slane %v1630_v20, 1 }
 0x2fc   : > { %v1632_v4 = vadd.f32 %v1631_v2, %v1630_v20 }
 0x2fe   : > { %v1633_v0 = vmul.f32 0.0017301039, %v1632_v4 }
 0x300   : > { %v1635_v42 = vadd.f32 1e-05, %v1633_v0  ;;  %v4183_v0 = vld [vmem:[#allocation3_spill] sm:$0xff] }
 0x302   : > { %3058 = vrsqrt.f32 %v1635_v42 }
 0x30c   : > { %v3059_v22 = vpop.eup %3058 }
 0x30d   : > { %v1637_v50 = vmul.f32 %v3059_v22, %v1634_v14 }
 0x30f   : > { %v1639_v25 = vmul.f32 %v1637_v50, %v3583_v30  ;;  %v3739_v58 = vrot.slane %v1637_v50, %v1644_v34 }
 0x311   : > { %v1640_v4 = vsub.f32 %v1638_v23, %v1639_v25  ;;  %v1647_v26 = vmul.f32 %v3739_v58, %v4183_v0  ;;  %v1648_v8 = vmul.f32 %v3739_v58, %v4184_v27  ;;  %v1649_v12 = vmul.f32 %v3739_v58, %v4185_v62 }
 0x312   : > { %v1650_v10 = vmul.f32 %v3739_v58, %v4186_v29  ;;  %v1651_v16 = vmul.f32 %v3739_v58, %v4187_v46  ;;  %v1652_v30 = vmul.f32 %v3739_v58, %v4188_v38  ;;  %v1653_v54 = vmul.f32 %v3739_v58, %v3380_v31 }
 0x313   : > { %v3755_v21 = vrot.slane %v1640_v4, %v1644_v34  ;;  %v1654_v20 = vmul.f32 %v3739_v58, %v3383_v33  ;;  %v1655_v2 = vmul.f32 %v3739_v58, %v3386_v35  ;;  %v1656_v42 = vmul.f32 %v3739_v58, %v3389_v37 }
 0x314   : > { %v1657_v18 = vmul.f32 %v3739_v58, %v3392_v39  ;;  %v1658_v6 = vmul.f32 %v3739_v58, %v3395_v41  ;;  %v1659_v31 = vmul.f32 %v3739_v58, %v3398_v43  ;;  %v1660_v14 = vmul.f32 %v3739_v58, %v3401_v45 }
 0x315   : > { %v1726_v33 = vadd.f32 %v3755_v21, %v1647_v26  ;;  %v1727_v34 = vadd.f32 %v3755_v21, %v1648_v8  ;;  %v1728_v35 = vadd.f32 %v3755_v21, %v1649_v12  ;;  %v1729_v37 = vadd.f32 %v3755_v21, %v1650_v10 }
 0x316   : > { %v1730_v22 = vadd.f32 %v3755_v21, %v1651_v16  ;;  %v1731_v39 = vadd.f32 %v3755_v21, %v1652_v30  ;;  %v1732_v41 = vadd.f32 %v3755_v21, %v1653_v54  ;;  %v1733_v50 = vadd.f32 %v3755_v21, %v1654_v20 }
 0x317   : > { %v1799_v43 = vmax.f32 %v1726_v33, 0.0  ;;  %v1800_v23 = vmax.f32 %v1727_v34, 0.0  ;;  %v1801_v25 = vmax.f32 %v1728_v35, 0.0  ;;  %v1802_v45 = vmax.f32 %v1729_v37, 0.0 }
 0x318   : > { %v1803_v4 = vmax.f32 %v1730_v22, 0.0  ;;  %v1804_v0 = vmax.f32 %v1731_v39, 0.0  ;;  %v1805_v26 = vmax.f32 %v1732_v41, 0.0  ;;  %v1806_v27 = vmax.f32 %v1733_v50, 0.0 }
 0x319   : > { %v2548_v8 = vpack.c.bf16 %v1800_v23, %v1799_v43  ;;  %v2553_v62 = vpack.c.bf16 %v1802_v45, %v1801_v25  ;;  %v1734_v12 = vadd.f32 %v3755_v21, %v1655_v2  ;;  %v1735_v29 = vadd.f32 %v3755_v21, %v1656_v42 }
 0x31a   : > { %v2558_v10 = vpack.c.bf16 %v1804_v0, %v1803_v4  ;;  %v2563_v46 = vpack.c.bf16 %v1806_v27, %v1805_v26  ;;  %v1736_v16 = vadd.f32 %v3755_v21, %v1657_v18  ;;  %v1737_v38 = vadd.f32 %v3755_v21, %v1658_v6 }
 0x31b   : > { %2549 = vst [vmem:[%s4077_s4] sm:$0xff] %v2548_v8   ;;  %2725 = vst [vmem:[%s4077_s4 + $0x8] sm:$0xff] %v2553_v62   ;;  %v1807_v30 = vmax.f32 %v1734_v12, 0.0  ;;  %v1808_v54 = vmax.f32 %v1735_v29, 0.0  ;;  %v1738_v20 = vadd.f32 %v3755_v21, %v1659_v31  ;;  %v1739_v2 = vadd.f32 %v3755_v21, %v1660_v14 }
 0x31c   : > { %2726 = vst [vmem:[%s4077_s4 + $0x10] sm:$0xff] %v2558_v10   ;;  %2727 = vst [vmem:[%s4077_s4 + $0x18] sm:$0xff] %v2563_v46   ;;  %v1809_v42 = vmax.f32 %v1736_v16, 0.0  ;;  %v1810_v18 = vmax.f32 %v1737_v38, 0.0  ;;  %v1661_v6 = vmul.f32 %v3739_v58, %v3404_v47  ;;  %v1662_v33 = vmul.f32 %v3739_v58, %v3407_v49 }
 0x31d   : > { %v2568_v34 = vpack.c.bf16 %v1808_v54, %v1807_v30  ;;  %v1811_v31 = vmax.f32 %v1738_v20, 0.0  ;;  %v1812_v35 = vmax.f32 %v1739_v2, 0.0  ;;  %v1663_v14 = vmul.f32 %v3739_v58, %v3410_v51 }
 0x31e   : > { %v2573_v37 = vpack.c.bf16 %v1810_v18, %v1809_v42  ;;  %v1740_v22 = vadd.f32 %v3755_v21, %v1661_v6  ;;  %v1741_v39 = vadd.f32 %v3755_v21, %v1662_v33  ;;  %v1664_v41 = vmul.f32 %v3739_v58, %v3413_v53 }
 0x31f   : > { %2728 = vst [vmem:[%s4077_s4 + $0x20] sm:$0xff] %v2568_v34   ;;  %v2578_v47 = vpack.c.bf16 %v1812_v35, %v1811_v31  ;;  %v1742_v49 = vadd.f32 %v3755_v21, %v1663_v14  ;;  %v1665_v50 = vmul.f32 %v3739_v58, %v3416_v55  ;;  %v1666_v51 = vmul.f32 %v3739_v58, %v3419_v57 }
 0x320   : > { %2729 = vst [vmem:[%s4077_s4 + $0x28] sm:$0xff] %v2573_v37   ;;  %v1813_v43 = vmax.f32 %v1740_v22, 0.0  ;;  %v1814_v23 = vmax.f32 %v1741_v39, 0.0  ;;  %v1743_v53 = vadd.f32 %v3755_v21, %v1664_v41  ;;  %v1667_v25 = vmul.f32 %v3739_v58, %v3422_v59 }
 0x321   : > { %2730 = vst [vmem:[%s4077_s4 + $0x30] sm:$0xff] %v2578_v47   ;;  %v1815_v45 = vmax.f32 %v1742_v49, 0.0  ;;  %v1744_v55 = vadd.f32 %v3755_v21, %v1665_v50  ;;  %v1745_v57 = vadd.f32 %v3755_v21, %v1666_v51  ;;  %v1668_v4 = vmul.f32 %v3739_v58, %v3425_v61 }
 0x322   : > { %v2583_v0 = vpack.c.bf16 %v1814_v23, %v1813_v43  ;;  %v1816_v26 = vmax.f32 %v1743_v53, 0.0  ;;  %v1746_v27 = vadd.f32 %v3755_v21, %v1667_v25  ;;  %v1669_v8 = vmul.f32 %v3739_v58, %v3428_v63 }
 0x323   : > { %v1817_v59 = vmax.f32 %v1744_v55, 0.0  ;;  %v1818_v62 = vmax.f32 %v1745_v57, 0.0  ;;  %v1747_v12 = vadd.f32 %v3755_v21, %v1668_v4  ;;  %v1670_v29 = vmul.f32 %v3739_v58, %v3431_v1 }
 0x324   : > { %2731 = vst [vmem:[%s4077_s4 + $0x38] sm:$0xff] %v2583_v0   ;;  %v2588_v10 = vpack.c.bf16 %v1816_v26, %v1815_v45  ;;  %v1819_v61 = vmax.f32 %v1746_v27, 0.0  ;;  %v1748_v46 = vadd.f32 %v3755_v21, %v1669_v8  ;;  %v1671_v16 = vmul.f32 %v3739_v58, %v3434_v3 }
 0x325   : > { %v2593_v38 = vpack.c.bf16 %v1818_v62, %v1817_v59  ;;  %v1820_v63 = vmax.f32 %v1747_v12, 0.0  ;;  %v1749_v30 = vadd.f32 %v3755_v21, %v1670_v29  ;;  %v1672_v54 = vmul.f32 %v3739_v58, %v3437_v5 }
 0x326   : > { %2732 = vst [vmem:[%s4077_s4 + $0x40] sm:$0xff] %v2588_v10   ;;  %v1821_v1 = vmax.f32 %v1748_v46, 0.0  ;;  %v1750_v20 = vadd.f32 %v3755_v21, %v1671_v16  ;;  %v1673_v2 = vmul.f32 %v3739_v58, %v3440_v7  ;;  %v1674_v3 = vmul.f32 %v3739_v58, %v3443_v9 }
 0x327   : > { %2733 = vst [vmem:[%s4077_s4 + $0x48] sm:$0xff] %v2593_v38   ;;  %v2598_v42 = vpack.c.bf16 %v1820_v63, %v1819_v61  ;;  %v1822_v18 = vmax.f32 %v1749_v30, 0.0  ;;  %v1751_v5 = vadd.f32 %v3755_v21, %v1672_v54  ;;  %v1675_v6 = vmul.f32 %v3739_v58, %v3446_v11 }
 0x328   : > { %v1823_v33 = vmax.f32 %v1750_v20, 0.0  ;;  %v1752_v34 = vadd.f32 %v3755_v21, %v1673_v2  ;;  %v1753_v31 = vadd.f32 %v3755_v21, %v1674_v3  ;;  %v1676_v7 = vmul.f32 %v3739_v58, %v3449_v13  ;;  %v4190_v3 = vld [vmem:[#allocation10_spill] sm:$0xff] }
 0x329   : > { %2734 = vst [vmem:[%s4077_s4 + $0x50] sm:$0xff] %v2598_v42   ;;  %v2603_v9 = vpack.c.bf16 %v1822_v18, %v1821_v1  ;;  %v1824_v35 = vmax.f32 %v1751_v5, 0.0  ;;  %v1754_v14 = vadd.f32 %v3755_v21, %v1675_v6  ;;  %v1677_v37 = vmul.f32 %v3739_v58, %v3452_v15  ;;  %v4189_v1 = vld [vmem:[#allocation9_spill] sm:$0xff] }
 0x32a   : > { %v1825_v11 = vmax.f32 %v1752_v34, 0.0  ;;  %v1826_v22 = vmax.f32 %v1753_v31, 0.0  ;;  %v1755_v39 = vadd.f32 %v3755_v21, %v1676_v7  ;;  %v1678_v41 = vmul.f32 %v3739_v58, %v3455_v17 }
 0x32b   : > { %2735 = vst [vmem:[%s4077_s4 + $0x58] sm:$0xff] %v2603_v9   ;;  %v2608_v13 = vpack.c.bf16 %v1824_v35, %v1823_v33  ;;  %v1827_v47 = vmax.f32 %v1754_v14, 0.0  ;;  %v1756_v49 = vadd.f32 %v3755_v21, %v1677_v37  ;;  %v1679_v50 = vmul.f32 %v3739_v58, %v3458_v19  ;;  %v4192_v9 = vld [vmem:[#allocation12_spill] sm:$0xff] }
 0x32c   : > { %v2613_v51 = vpack.c.bf16 %v1826_v22, %v1825_v11  ;;  %v1828_v15 = vmax.f32 %v1755_v39, 0.0  ;;  %v1757_v43 = vadd.f32 %v3755_v21, %v1678_v41  ;;  %v1680_v23 = vmul.f32 %v3739_v58, %v3461_v24  ;;  %v4193_v22 = vld [vmem:[#allocation13_spill] sm:$0xff] }
 0x32d   : > { %2736 = vst [vmem:[%s4077_s4 + $0x60] sm:$0xff] %v2608_v13   ;;  %v1829_v17 = vmax.f32 %v1756_v49, 0.0  ;;  %v1758_v53 = vadd.f32 %v3755_v21, %v1679_v50  ;;  %v1681_v25 = vmul.f32 %v3739_v58, %v3464_v28  ;;  %v1682_v19 = vmul.f32 %v3739_v58, %v3467_v32  ;;  %v4194_v49 = vld [vmem:[#allocation14_spill] sm:$0xff] }
 0x32e   : > { %2737 = vst [vmem:[%s4077_s4 + $0x68] sm:$0xff] %v2613_v51   ;;  %v2618_v45 = vpack.c.bf16 %v1828_v15, %v1827_v47  ;;  %v1830_v55 = vmax.f32 %v1757_v43, 0.0  ;;  %v1759_v24 = vadd.f32 %v3755_v21, %v1680_v23  ;;  %v1683_v57 = vmul.f32 %v3739_v58, %v3470_v36  ;;  %v4195_v23 = vld [vmem:[#allocation15_spill] sm:$0xff] }
 0x32f   : > { %v1831_v4 = vmax.f32 %v1758_v53, 0.0  ;;  %v1760_v0 = vadd.f32 %v3755_v21, %v1681_v25  ;;  %v1761_v26 = vadd.f32 %v3755_v21, %v1682_v19  ;;  %v1684_v28 = vmul.f32 %v3739_v58, %v3473_v40  ;;  %v4196_v19 = vld [vmem:[#allocation16_spill] sm:$0xff] }
 0x330   : > { %2738 = vst [vmem:[%s4077_s4 + $0x70] sm:$0xff] %v2618_v45   ;;  %v2623_v32 = vpack.c.bf16 %v1830_v55, %v1829_v17  ;;  %v1832_v27 = vmax.f32 %v1759_v24, 0.0  ;;  %v1762_v8 = vadd.f32 %v3755_v21, %v1683_v57  ;;  %v1685_v59 = vmul.f32 %v3739_v58, %v3476_v44  ;;  %v4197_v55 = vld [vmem:[#allocation17_spill] sm:$0xff] }
 0x331   : > { %v1833_v36 = vmax.f32 %v1760_v0, 0.0  ;;  %v1834_v62 = vmax.f32 %v1761_v26, 0.0  ;;  %v1763_v12 = vadd.f32 %v3755_v21, %v1684_v28  ;;  %v1686_v29 = vmul.f32 %v3739_v58, %v3479_v48  ;;  %v4198_v26 = vld [vmem:[#allocation18_spill] sm:$0xff] }
 0x332   : > { %2739 = vst [vmem:[%s4077_s4 + $0x78] sm:$0xff] %v2623_v32   ;;  %v2628_v40 = vpack.c.bf16 %v1832_v27, %v1831_v4  ;;  %v1835_v10 = vmax.f32 %v1762_v8, 0.0  ;;  %v1764_v61 = vadd.f32 %v3755_v21, %v1685_v59  ;;  %v1687_v46 = vmul.f32 %v3739_v58, %v3482_v52  ;;  %v4199_v59 = vld [vmem:[#allocation19_spill] sm:$0xff] }
 0x333   : > { %v2633_v16 = vpack.c.bf16 %v1834_v62, %v1833_v36  ;;  %v1836_v44 = vmax.f32 %v1763_v12, 0.0  ;;  %v1765_v38 = vadd.f32 %v3755_v21, %v1686_v29  ;;  %v1688_v63 = vmul.f32 %v3739_v58, %v3485_v56 }
 0x334   : > { %2740 = vst [vmem:[%s4077_s4 + $0x80] sm:$0xff] %v2628_v40   ;;  %v1837_v48 = vmax.f32 %v1764_v61, 0.0  ;;  %v1766_v30 = vadd.f32 %v3755_v21, %v1687_v46  ;;  %v1689_v54 = vmul.f32 %v3739_v58, %v3488_v60  ;;  %v1690_v52 = vmul.f32 %v3739_v58, %v4189_v1  ;;  %v4191_v60 = vld [vmem:[#allocation11_spill] sm:$0xff]  ;;  %v4200_v40 = vld [vmem:[#allocation20_spill] sm:$0xff] }
 0x335   : > { %2741 = vst [vmem:[%s4077_s4 + $0x88] sm:$0xff] %v2633_v16   ;;  %v2638_v20 = vpack.c.bf16 %v1836_v44, %v1835_v10  ;;  %v1838_v2 = vmax.f32 %v1765_v38, 0.0  ;;  %v1767_v56 = vadd.f32 %v3755_v21, %v1688_v63  ;;  %v1691_v42 = vmul.f32 %v3739_v58, %v4190_v3  ;;  %v4201_v44 = vld [vmem:[#allocation21_spill] sm:$0xff] }
 0x336   : > { %v1839_v18 = vmax.f32 %v1766_v30, 0.0  ;;  %v1768_v5 = vadd.f32 %v3755_v21, %v1689_v54  ;;  %v1769_v6 = vadd.f32 %v3755_v21, %v1690_v52  ;;  %v1692_v33 = vmul.f32 %v3739_v58, %v4191_v60  ;;  %v4202_v54 = vld [vmem:[#allocation22_spill] sm:$0xff]  ;;  %v4205_v60 = vld [vmem:[#allocation25_spill] sm:$0xff] }
 0x337   : > { %2742 = vst [vmem:[%s4077_s4 + $0x90] sm:$0xff] %v2638_v20   ;;  %v2643_v34 = vpack.c.bf16 %v1838_v2, %v1837_v48  ;;  %v1840_v31 = vmax.f32 %v1767_v56, 0.0  ;;  %v1770_v7 = vadd.f32 %v3755_v21, %v1691_v42  ;;  %v1693_v35 = vmul.f32 %v3739_v58, %v4192_v9  ;;  %v4203_v56 = vld [vmem:[#allocation23_spill] sm:$0xff]  ;;  %v4206_v9 = vld [vmem:[#allocation26_spill] sm:$0xff] }
 0x338   : > { %v1841_v14 = vmax.f32 %v1768_v5, 0.0  ;;  %v1842_v37 = vmax.f32 %v1769_v6, 0.0  ;;  %v1771_v11 = vadd.f32 %v3755_v21, %v1692_v33  ;;  %v1694_v39 = vmul.f32 %v3739_v58, %v4193_v22  ;;  %v4204_v5 = vld [vmem:[#allocation24_spill] sm:$0xff]  ;;  %v4207_v22 = vld [vmem:[#allocation27_spill] sm:$0xff] }
 0x339   : > { %2743 = vst [vmem:[%s4077_s4 + $0x98] sm:$0xff] %v2643_v34   ;;  %v2648_v41 = vpack.c.bf16 %v1840_v31, %v1839_v18  ;;  %v1843_v13 = vmax.f32 %v1770_v7, 0.0  ;;  %v1772_v47 = vadd.f32 %v3755_v21, %v1693_v35  ;;  %v1695_v50 = vmul.f32 %v3739_v58, %v4194_v49  ;;  %v4208_v49 = vld [vmem:[#allocation28_spill] sm:$0xff] }
 0x33a   : > { %v2653_v51 = vpack.c.bf16 %v1842_v37, %v1841_v14  ;;  %v1844_v15 = vmax.f32 %v1771_v11, 0.0  ;;  %v1773_v43 = vadd.f32 %v3755_v21, %v1694_v39  ;;  %v1696_v17 = vmul.f32 %v3739_v58, %v4195_v23  ;;  %v4209_v23 = vld [vmem:[#allocation29_spill] sm:$0xff] }
 0x33b   : > { %2744 = vst [vmem:[%s4077_s4 + $0xa0] sm:$0xff] %v2648_v41   ;;  %v1845_v53 = vmax.f32 %v1772_v47, 0.0  ;;  %v1774_v25 = vadd.f32 %v3755_v21, %v1695_v50  ;;  %v1697_v45 = vmul.f32 %v3739_v58, %v4196_v19  ;;  %v1698_v24 = vmul.f32 %v3739_v58, %v4197_v55 }
 0x33c   : > { %2745 = vst [vmem:[%s4077_s4 + $0xa8] sm:$0xff] %v2653_v51   ;;  %v2658_v57 = vpack.c.bf16 %v1844_v15, %v1843_v13  ;;  %v1846_v4 = vmax.f32 %v1773_v43, 0.0  ;;  %v1775_v0 = vadd.f32 %v3755_v21, %v1696_v17  ;;  %v1699_v28 = vmul.f32 %v3739_v58, %v4198_v26 }
 0x33d   : > { %v1847_v32 = vmax.f32 %v1774_v25, 0.0  ;;  %v1776_v27 = vadd.f32 %v3755_v21, %v1697_v45  ;;  %v1777_v8 = vadd.f32 %v3755_v21, %v1698_v24  ;;  %v1700_v36 = vmul.f32 %v3739_v58, %v4199_v59  ;;  %v3060_v45 = vld [vmem:[#allocation2 + $0x200] sm:$0xff]  ;;  %v3063_v59 = vld [vmem:[#allocation2 + $0x218] sm:$0xff] }
 0x33e   : > { %2746 = vst [vmem:[%s4077_s4 + $0xb0] sm:$0xff] %v2658_v57   ;;  %v2663_v62 = vpack.c.bf16 %v1846_v4, %v1845_v53  ;;  %v1848_v12 = vmax.f32 %v1775_v0, 0.0  ;;  %v1778_v29 = vadd.f32 %v3755_v21, %v1699_v28  ;;  %v1701_v10 = vmul.f32 %v3739_v58, %v4200_v40  ;;  %v3061_v0 = vld [vmem:[#allocation2 + $0x208] sm:$0xff]  ;;  %v3064_v40 = vld [vmem:[#allocation2 + $0x220] sm:$0xff] }
 0x33f   : > { %v1849_v61 = vmax.f32 %v1776_v27, 0.0  ;;  %v1850_v46 = vmax.f32 %v1777_v8, 0.0  ;;  %v1779_v16 = vadd.f32 %v3755_v21, %v1700_v36  ;;  %v1702_v38 = vmul.f32 %v3739_v58, %v4201_v44  ;;  %v3062_v27 = vld [vmem:[#allocation2 + $0x210] sm:$0xff]  ;;  %v3065_v44 = vld [vmem:[#allocation2 + $0x228] sm:$0xff] }
 0x340   : > { %2747 = vst [vmem:[%s4077_s4 + $0xb8] sm:$0xff] %v2663_v62   ;;  %v2668_v63 = vpack.c.bf16 %v1848_v12, %v1847_v32  ;;  %v1851_v48 = vmax.f32 %v1778_v29, 0.0  ;;  %v1780_v30 = vadd.f32 %v3755_v21, %v1701_v10  ;;  %v1703_v1 = vmul.f32 %v3739_v58, %v4202_v54  ;;  %v3066_v54 = vld [vmem:[#allocation2 + $0x230] sm:$0xff] }
 0x341   : > { %v2673_v52 = vpack.c.bf16 %v1850_v46, %v1849_v61  ;;  %v1852_v20 = vmax.f32 %v1779_v16, 0.0  ;;  %v1781_v2 = vadd.f32 %v3755_v21, %v1702_v38  ;;  %v1704_v3 = vmul.f32 %v3739_v58, %v4203_v56  ;;  %v3067_v56 = vld [vmem:[#allocation2 + $0x238] sm:$0xff] }
 0x342   : > { %2748 = vst [vmem:[%s4077_s4 + $0xc0] sm:$0xff] %v2668_v63   ;;  %v1853_v42 = vmax.f32 %v1780_v30, 0.0  ;;  %v1782_v18 = vadd.f32 %v3755_v21, %v1703_v1  ;;  %v1705_v6 = vmul.f32 %v3739_v58, %v4204_v5  ;;  %v1706_v33 = vmul.f32 %v3739_v58, %v4205_v60 }
 0x343   : > { %2749 = vst [vmem:[%s4077_s4 + $0xc8] sm:$0xff] %v2673_v52   ;;  %v2678_v34 = vpack.c.bf16 %v1852_v20, %v1851_v48  ;;  %v1854_v31 = vmax.f32 %v1781_v2, 0.0  ;;  %v1783_v7 = vadd.f32 %v3755_v21, %v1704_v3  ;;  %v1707_v35 = vmul.f32 %v3739_v58, %v4206_v9 }
 0x344   : > { %v1855_v14 = vmax.f32 %v1782_v18, 0.0  ;;  %v1784_v37 = vadd.f32 %v3755_v21, %v1705_v6  ;;  %v1785_v11 = vadd.f32 %v3755_v21, %v1706_v33  ;;  %v1708_v39 = vmul.f32 %v3739_v58, %v4207_v22  ;;  %v3068_v6 = vld [vmem:[#allocation2 + $0x240] sm:$0x3] }
 0x345   : > { %2750 = vst [vmem:[%s4077_s4 + $0xd0] sm:$0xff] %v2678_v34   ;;  %v2683_v41 = vpack.c.bf16 %v1854_v31, %v1853_v42  ;;  %v1856_v13 = vmax.f32 %v1783_v7, 0.0  ;;  %v1786_v47 = vadd.f32 %v3755_v21, %v1707_v35  ;;  %v1709_v50 = vmul.f32 %v3739_v58, %v4208_v49 }
 0x346   : > { %v1857_v51 = vmax.f32 %v1784_v37, 0.0  ;;  %v1858_v15 = vmax.f32 %v1785_v11, 0.0  ;;  %v1787_v43 = vadd.f32 %v3755_v21, %v1708_v39  ;;  %v1710_v17 = vmul.f32 %v3739_v58, %v4209_v23 }
 0x347   : > { %2751 = vst [vmem:[%s4077_s4 + $0xd8] sm:$0xff] %v2683_v41   ;;  %v2688_v53 = vpack.c.bf16 %v1856_v13, %v1855_v14  ;;  %v1859_v25 = vmax.f32 %v1786_v47, 0.0  ;;  %v1788_v19 = vadd.f32 %v3755_v21, %v1709_v50  ;;  %v1711_v55 = vmul.f32 %v3060_v45, %v3739_v58 }
 0x348   : > { %v2693_v24 = vpack.c.bf16 %v1858_v15, %v1857_v51  ;;  %v1860_v57 = vmax.f32 %v1787_v43, 0.0  ;;  %v1789_v4 = vadd.f32 %v3755_v21, %v1710_v17  ;;  %v1712_v26 = vmul.f32 %v3061_v0, %v3739_v58 }
 0x349   : > { %2752 = vst [vmem:[%s4077_s4 + $0xe0] sm:$0xff] %v2688_v53   ;;  %v1861_v28 = vmax.f32 %v1788_v19, 0.0  ;;  %v1790_v32 = vadd.f32 %v3755_v21, %v1711_v55  ;;  %v1713_v8 = vmul.f32 %v3062_v27, %v3739_v58  ;;  %v1714_v36 = vmul.f32 %v3063_v59, %v3739_v58 }
 0x34a   : > { %2753 = vst [vmem:[%s4077_s4 + $0xe8] sm:$0xff] %v2693_v24   ;;  %v2698_v62 = vpack.c.bf16 %v1860_v57, %v1859_v25  ;;  %v1862_v12 = vmax.f32 %v1789_v4, 0.0  ;;  %v1791_v29 = vadd.f32 %v3755_v21, %v1712_v26  ;;  %v1715_v10 = vmul.f32 %v3064_v40, %v3739_v58 }
 0x34b   : > { %v1863_v61 = vmax.f32 %v1790_v32, 0.0  ;;  %v1792_v46 = vadd.f32 %v3755_v21, %v1713_v8  ;;  %v1793_v16 = vadd.f32 %v3755_v21, %v1714_v36  ;;  %v1716_v38 = vmul.f32 %v3065_v44, %v3739_v58 }
 0x34c   : > { %2754 = vst [vmem:[%s4077_s4 + $0xf0] sm:$0xff] %v2698_v62   ;;  %v2703_v63 = vpack.c.bf16 %v1862_v12, %v1861_v28  ;;  %v1864_v48 = vmax.f32 %v1791_v29, 0.0  ;;  %v1794_v30 = vadd.f32 %v3755_v21, %v1715_v10  ;;  %v1717_v1 = vmul.f32 %v3066_v54, %v3739_v58 }
 0x34d   : > { %v1865_v52 = vmax.f32 %v1792_v46, 0.0  ;;  %v1866_v20 = vmax.f32 %v1793_v16, 0.0  ;;  %v1795_v2 = vadd.f32 %v3755_v21, %v1716_v38  ;;  %v1718_v3 = vmul.f32 %v3067_v56, %v3739_v58 }
 0x34e   : > { %2755 = vst [vmem:[%s4077_s4 + $0xf8] sm:$0xff] %v2703_v63   ;;  %v2708_v42 = vpack.c.bf16 %v1864_v48, %v1863_v61  ;;  %v1867_v18 = vmax.f32 %v1794_v30, 0.0  ;;  %v1796_v5 = vadd.f32 %v3755_v21, %v1717_v1  ;;  %v1719_v60 = vmul.f32 %v3068_v6, %v3739_v58 }
 0x34f   : > { %v2713_v33 = vpack.c.bf16 %v1866_v20, %v1865_v52  ;;  %v1868_v34 = vmax.f32 %v1795_v2, 0.0  ;;  %v1797_v31 = vadd.f32 %v3755_v21, %v1718_v3 }
 0x350   : > { %2756 = vst [vmem:[%s4077_s4 + $0x100] sm:$0xff] %v2708_v42   ;;  %v1869_v7 = vmax.f32 %v1796_v5, 0.0  ;;  %v1798_v9 = vadd.f32 %v3755_v21, %v1719_v60 }
 0x351   : > { %2757 = vst [vmem:[%s4077_s4 + $0x108] sm:$0xff] %v2713_v33   ;;  %v2718_v35 = vpack.c.bf16 %v1868_v34, %v1867_v18  ;;  %v1870_v14 = vmax.f32 %v1797_v31, 0.0 }
 0x352   : > { %v1871_v37 = vmax.f32 %v1798_v9, 0.0 }
 0x353   : > { %2758 = vst [vmem:[%s4077_s4 + $0x110] sm:$0xff] %v2718_v35   ;;  %v2723_v58 = vpack.c.bf16 %v1870_v14, %v1869_v7 }
 0x354   : > { %v2544_v11 = vpack.c.bf16 %v1871_v37, %v1871_v37 }
 0x355   : > { %2759 = vst [vmem:[%s4077_s4 + $0x118] sm:$0xff] %v2723_v58  }
 0x356   : > { %2237 = vst [vmem:[%s4077_s4 + $0x120] sm:$0x1] %v2544_v11 }
 0x357 PF: > { %s14_s17 = sadd.s32 1, %s3091_s17   ;;  %s4210_s15 = smov %s3087_s16 }
 0x358   : > { %p11_p7 = scmp.ge.s32.totalorder %s14_s17, 11   ;;  %s4211_s16 = smov %s4213_s18 }
 0x35a   :  { %13 = sbr.rel (!%p11_p7) target bundleno = 2 (0x2), region = 83 }

// kernel: inception_block_b.9
= control target key start
LH: loop header
LB: loop body
LE: loop exit
PB: predicated region body
PF: predicated region fallthrough
CT: control target
= control target key end

     0   :  { %s1032_s15 = smov 0   ;;  %s1034_s16 = smov 0   ;;  %s1244_s0 = inlined_call_operand.vmem [shape: bf16[9,128,128], index: 0, kind: input, shape index: {}]   ;;  %s1245_s1 = inlined_call_operand.vmem [shape: bf16[9,128,128], index: 1, kind: input, shape index: {}]   ;;  %s1246_s2 = inlined_call_operand.vmem [shape: f32[1,128], index: 2, kind: input, shape index: {}]   ;;  %s1247_s3 = inlined_call_operand.vmem [shape: f32[1,128], index: 3, kind: input, shape index: {}]   ;;  %s1248_s4 = inlined_call_operand.vmem [shape: f32[128,128], index: 4, kind: output, shape index: {}]  }
   0x1   :  { %s1036_s17 = smov 0  }
   0x2 LB: > { %s23_s18 = sadd.s32 1, %s1000_s16  ;;  %p847_p0 = scmp.ge.s32.totalorder %s1004_s17, 1  ;;  %s1004_s17 = sphi %s1036_s17, %s14_s17   ;;  %s1000_s16 = sphi %s1034_s16, %s1250_s16   ;;  %s996_s15 = sphi %s1032_s15, %s1249_s15  }
   0x3   : > { %p24_p1 = scmp.ge.s32.totalorder %s23_s18, 9  ;;  %p205_p2 = scmp.lt.s32.totalorder %s1004_s17, 10 }
   0x5   : > { %s1252_s18 = smov (%p24_p1, %s23_s18), 0  ;;  %p206_p3 = pnand %p847_p0, %p205_p2 }
   0x6   : > { %p244_p4 = scmp.lt.s32.totalorder (!%p206_p3), %s996_s15, 8  ;;  %p852_p5 = scmp.ne.s32.totalorder (!%p206_p3), %s996_s15, 0 }
   0x7   : > { %209 = sbr.rel (%p206_p3) target bundleno = 408 (0x198), region = 36 }
   0xe   : > { %s245_s19 = scalar_select %p244_p4, %s996_s15, 8 }
   0xf   : > { %271 = sbr.rel (%p852_p5) target bundleno = 24 (0x18), region = 40  ;;  %v1006_v0 = vmov (!%p852_p5), 0.0  }
  0x10   : > { %s873_s20 = sshll.u32 %s245_s19, 6  ;;  %272 = vst [vmem:[#allocation2] sm:$0xff] (!%p852_p5), %v1006_v0  ;;  %273 = vst [vmem:[#allocation2 + $0x8] sm:$0xff] (!%p852_p5), %v1006_v0 }
  0x11   : > { %s1057_s23 = scalar_lea.vmem %s1244_s0, %s873_s20  ;;  %s1062_s26 = scalar_lea.vmem %s1245_s1, %s873_s20  ;;  %274 = vst [vmem:[#allocation2 + $0x10] sm:$0xff] (!%p852_p5), %v1006_v0  ;;  %275 = vst [vmem:[#allocation2 + $0x18] sm:$0xff] (!%p852_p5), %v1006_v0 }
  0x12   : > { %276 = vst [vmem:[#allocation2 + $0x20] sm:$0xff] (!%p852_p5), %v1006_v0  ;;  %277 = vst [vmem:[#allocation2 + $0x28] sm:$0xff] (!%p852_p5), %v1006_v0 }
  0x13   : > { %278 = vst [vmem:[#allocation2 + $0x30] sm:$0xff] (!%p852_p5), %v1006_v0  ;;  %279 = vst [vmem:[#allocation2 + $0x38] sm:$0xff] (!%p852_p5), %v1006_v0 }
  0x14   : > { %280 = vst [vmem:[#allocation2 + $0x40] sm:$0xff] (!%p852_p5), %v1006_v0  ;;  %281 = vst [vmem:[#allocation2 + $0x48] sm:$0xff] (!%p852_p5), %v1006_v0 }
  0x15   : > { %282 = vst [vmem:[#allocation2 + $0x50] sm:$0xff] (!%p852_p5), %v1006_v0  ;;  %283 = vst [vmem:[#allocation2 + $0x58] sm:$0xff] (!%p852_p5), %v1006_v0 }
  0x16   : > { %284 = vst [vmem:[#allocation2 + $0x60] sm:$0xff] %v1006_v0  ;;  %285 = vst [vmem:[#allocation2 + $0x68] sm:$0xff] %v1006_v0 }
  0x17   : > { %286 = vst [vmem:[#allocation2 + $0x70] sm:$0xff] %v1006_v0  ;;  %287 = vst [vmem:[#allocation2 + $0x78] sm:$0xff] %v1006_v0 }
  0x18 PF: > { %v964_v1 = vld [vmem:[%s1062_s26] sm:$0xff]   ;;  %v965_v2 = vld [vmem:[%s1062_s26 + $0x8] sm:$0xff]   ;;  %v966_v3 = vld [vmem:[%s1062_s26 + $0x10] sm:$0xff]   ;;  %p869_p6 = scmp.ne.s32.totalorder %s996_s15, 8 }
  0x19   : > { %891 = vmatprep.subr.bf16.mxu0 %v964_v1  ;;  %923 = vmatprep.subr.bf16.mxu1 %v964_v1  ;;  %v967_v4 = vld [vmem:[%s1062_s26 + $0x18] sm:$0xff]   ;;  %v972_v5 = vld [vmem:[%s1057_s23] sm:$0xff]   ;;  %v969_v8 = vld [vmem:[%s1062_s26 + $0x28] sm:$0xff]  }
  0x1a   : > { %892 = vmatpush3.bf16.msra.mxu0 %v964_v1  ;;  %931 = vmatpush3.bf16.msra.mxu1 %v964_v1  ;;  %v973_v6 = vld [vmem:[%s1057_s23 + $0x20] sm:$0xff]   ;;  %v970_v9 = vld [vmem:[%s1062_s26 + $0x30] sm:$0xff]   ;;  %v971_v10 = vld [vmem:[%s1062_s26 + $0x38] sm:$0xff]  }
  0x1b   : > { %893 = vmatprep.subr.bf16.mxu0 %v965_v2  ;;  %924 = vmatprep.subr.bf16.mxu1 %v965_v2  ;;  %v968_v7 = vld [vmem:[%s1062_s26 + $0x20] sm:$0xff]   ;;  %v974_v11 = vld [vmem:[%s1057_s23 + $0x8] sm:$0xff]   ;;  %v976_v13 = vld [vmem:[%s1057_s23 + $0x10] sm:$0xff]  }
  0x1c   : > { %907 = vmatprep.mubr.bf16.mxu0 %v972_v5  ;;  %915 = vmatprep.mubr.bf16.mxu1 %v973_v6  ;;  %v975_v12 = vld [vmem:[%s1057_s23 + $0x28] sm:$0xff]   ;;  %v977_v14 = vld [vmem:[%s1057_s23 + $0x30] sm:$0xff]   ;;  %v978_v15 = vld [vmem:[%s1057_s23 + $0x18] sm:$0xff]  }
  0x1d   : > { %v979_v16 = vld [vmem:[%s1057_s23 + $0x38] sm:$0xff]   ;;  %v290_v17 = vld [vmem:[#allocation2 + $0x10] sm:$0xff]  ;;  %v288_v19 = vld [vmem:[#allocation2] sm:$0xff] }
  0x1e   : > { %894 = vmatpush3.bf16.msra.mxu0 %v965_v2  ;;  %932 = vmatpush3.bf16.msra.mxu1 %v965_v2  ;;  %v298_v18 = vld [vmem:[#allocation2 + $0x50] sm:$0xff]  ;;  %v296_v20 = vld [vmem:[#allocation2 + $0x40] sm:$0xff]  ;;  %v291_v23 = vld [vmem:[#allocation2 + $0x18] sm:$0xff] }
  0x1f   : > { %895 = vmatprep.subr.bf16.mxu0 %v966_v3  ;;  %925 = vmatprep.subr.bf16.mxu1 %v966_v3  ;;  %v299_v24 = vld [vmem:[#allocation2 + $0x58] sm:$0xff]  ;;  %v289_v29 = vld [vmem:[#allocation2 + $0x8] sm:$0xff]  ;;  %v294_v41 = vld [vmem:[#allocation2 + $0x30] sm:$0xff] }
  0x20   : > { %v297_v30 = vld [vmem:[#allocation2 + $0x48] sm:$0xff]  ;;  %v302_v42 = vld [vmem:[#allocation2 + $0x70] sm:$0xff]  ;;  %v292_v43 = vld [vmem:[#allocation2 + $0x20] sm:$0xff] }
  0x21   : > { %v300_v44 = vld [vmem:[#allocation2 + $0x60] sm:$0xff]  ;;  %v295_v47 = vld [vmem:[#allocation2 + $0x38] sm:$0xff]  ;;  %v293_v53 = vld [vmem:[#allocation2 + $0x28] sm:$0xff] }
  0x22   : > { %896 = vmatpush3.bf16.msra.mxu0 %v966_v3  ;;  %933 = vmatpush3.bf16.msra.mxu1 %v966_v3  ;;  %v303_v48 = vld [vmem:[#allocation2 + $0x78] sm:$0xff]  ;;  %v301_v54 = vld [vmem:[#allocation2 + $0x68] sm:$0xff] }
  0x23   : > { %897 = vmatprep.subr.bf16.mxu0 %v967_v4  ;;  %926 = vmatprep.subr.bf16.mxu1 %v967_v4 }
  0x26   : > { %898 = vmatpush3.bf16.msra.mxu0 %v967_v4  ;;  %934 = vmatpush3.bf16.msra.mxu1 %v967_v4 }
  0x27   : > { %899 = vmatprep.subr.bf16.mxu0 %v968_v7  ;;  %927 = vmatprep.subr.bf16.mxu1 %v968_v7 }
  0x2a   : > { %900 = vmatpush3.bf16.msra.mxu0 %v968_v7  ;;  %935 = vmatpush3.bf16.msra.mxu1 %v968_v7 }
  0x2b   : > { %901 = vmatprep.subr.bf16.mxu0 %v969_v8  ;;  %928 = vmatprep.subr.bf16.mxu1 %v969_v8 }
  0x2e   : > { %902 = vmatpush3.bf16.msra.mxu0 %v969_v8  ;;  %936 = vmatpush3.bf16.msra.mxu1 %v969_v8 }
  0x2f   : > { %903 = vmatprep.subr.bf16.mxu0 %v970_v9  ;;  %929 = vmatprep.subr.bf16.mxu1 %v970_v9 }
  0x32   : > { %904 = vmatpush3.bf16.msra.mxu0 %v970_v9  ;;  %937 = vmatpush3.bf16.msra.mxu1 %v970_v9 }
  0x33   : > { %905 = vmatprep.subr.bf16.mxu0 %v971_v10  ;;  %930 = vmatprep.subr.bf16.mxu1 %v971_v10 }
  0x36   : > { %906 = vmatpush3.bf16.msra.mxu0 %v971_v10  ;;  %938 = vmatpush3.bf16.msra.mxu1 %v971_v10 }
  0x39   : > { %908 = vmatmul.mubr.bf16.vlgmr.msra.gmra.mrb[0].mxu0 %v974_v11  ;;  %916 = vmatmul.mubr.bf16.vlgmr.msra.gmra.mrb[0].mxu1 %v975_v12 }
  0x3a   : > { %911 = vmatprep.mubr.bf16.mxu0 %v976_v13  ;;  %919 = vmatprep.mubr.bf16.mxu1 %v977_v14 }
  0x41   : > { %912 = vmatmul.mubr.bf16.gmra.mrb[4].mxu0 %v978_v15  ;;  %920 = vmatmul.mubr.bf16.gmra.mrb[4].mxu1 %v979_v16 }
 0x10c   : > { %v909_v21 = vpop.f32.mrb[0].mxu0  ;;  %v917_v22 = vpop.f32.mrb[0].mxu1 }
 0x10d   : > { %v531_v25 = vadd.f32 %v909_v21, %v290_v17  ;;  %v539_v26 = vadd.f32 %v917_v22, %v298_v18  ;;  %v466_v27 = vpop.f32.mrb[1].mxu0  ;;  %v498_v28 = vpop.f32.mrb[1].mxu1 }
 0x10e   : > { %v529_v31 = vadd.f32 %v466_v27, %v288_v19  ;;  %v537_v32 = vadd.f32 %v498_v28, %v296_v20  ;;  %v910_v33 = vpop.f32.mrb[2].mxu0  ;;  %v918_v34 = vpop.f32.mrb[2].mxu1 }
 0x10f   : > { %547 = vst [vmem:[#allocation2 + $0x10] sm:$0xff] %v531_v25  ;;  %555 = vst [vmem:[#allocation2 + $0x50] sm:$0xff] %v539_v26  ;;  %v532_v35 = vadd.f32 %v910_v33, %v291_v23  ;;  %v540_v36 = vadd.f32 %v918_v34, %v299_v24  ;;  %v469_v37 = vpop.f32.mrb[3].mxu0  ;;  %v501_v38 = vpop.f32.mrb[3].mxu1 }
 0x110   : > { %545 = vst [vmem:[#allocation2] sm:$0xff] %v529_v31  ;;  %553 = vst [vmem:[#allocation2 + $0x40] sm:$0xff] %v537_v32  ;;  %v530_v39 = vadd.f32 %v469_v37, %v289_v29  ;;  %v538_v40 = vadd.f32 %v501_v38, %v297_v30 }
 0x111   : > { %548 = vst [vmem:[#allocation2 + $0x18] sm:$0xff] %v532_v35  ;;  %556 = vst [vmem:[#allocation2 + $0x58] sm:$0xff] %v540_v36 }
 0x112   : > { %546 = vst [vmem:[#allocation2 + $0x8] sm:$0xff] %v530_v39  ;;  %554 = vst [vmem:[#allocation2 + $0x48] sm:$0xff] %v538_v40 }
 0x114   : > { %v913_v45 = vpop.f32.mrb[4].mxu0  ;;  %v921_v46 = vpop.f32.mrb[4].mxu1  ;;  %564 = sbr.rel (%p869_p6) target bundleno = 408 (0x198), region = 44 }
 0x115   : > { %v535_v49 = vadd.f32 %v913_v45, %v294_v41  ;;  %v543_v50 = vadd.f32 %v921_v46, %v302_v42  ;;  %v482_v51 = vpop.f32.mrb[5].mxu0  ;;  %v514_v52 = vpop.f32.mrb[5].mxu1 }
 0x116   : > { %v533_v55 = vadd.f32 %v482_v51, %v292_v43  ;;  %v541_v56 = vadd.f32 %v514_v52, %v300_v44  ;;  %v914_v57 = vpop.f32.mrb[6].mxu0  ;;  %v922_v58 = vpop.f32.mrb[6].mxu1  ;;  %v1086_v3 = vld [vmem:[#allocation2 + $0x10] sm:$0xff] (!%p869_p6) }
 0x117   : > { %551 = vst [vmem:[#allocation2 + $0x30] sm:$0xff] %v535_v49  ;;  %559 = vst [vmem:[#allocation2 + $0x70] sm:$0xff] %v543_v50  ;;  %v536_v59 = vadd.f32 %v914_v57, %v295_v47  ;;  %v544_v60 = vadd.f32 %v922_v58, %v303_v48  ;;  %v485_v61 = vpop.f32.mrb[7].mxu0  ;;  %v517_v62 = vpop.f32.mrb[7].mxu1  ;;  %v1082_v1 = vld [vmem:[#allocation2] sm:$0xff] (!%p869_p6)  ;;  %v1111_v19 = vld [vmem:[#allocation2 + $0x50] sm:$0xff] (!%p869_p6) }
 0x118   : > { %549 = vst [vmem:[#allocation2 + $0x20] sm:$0xff] %v533_v55  ;;  %557 = vst [vmem:[#allocation2 + $0x60] sm:$0xff] %v541_v56  ;;  %v534_v63 = vadd.f32 %v485_v61, %v293_v53  ;;  %v542_v0 = vadd.f32 %v517_v62, %v301_v54  ;;  %v1090_v5 = vld [vmem:[#allocation2 + $0x18] sm:$0xff] (!%p869_p6)  ;;  %v1105_v15 = vld [vmem:[#allocation2 + $0x40] sm:$0xff] (!%p869_p6) }
 0x119   : > { %552 = vst [vmem:[#allocation2 + $0x38] sm:$0xff] %v536_v59  ;;  %560 = vst [vmem:[#allocation2 + $0x78] sm:$0xff] %v544_v60  ;;  %v1084_v2 = vld [vmem:[#allocation2 + $0x8] sm:$0xff] (!%p869_p6)  ;;  %v1114_v21 = vld [vmem:[#allocation2 + $0x58] sm:$0xff] (!%p869_p6) }
 0x11a   : > { %550 = vst [vmem:[#allocation2 + $0x28] sm:$0xff] %v534_v63  ;;  %558 = vst [vmem:[#allocation2 + $0x68] sm:$0xff] %v542_v0  ;;  %v581_v4 = vadd.f32 (!%p869_p6), %v1084_v2, %v1082_v1  ;;  %v1108_v17 = vld [vmem:[#allocation2 + $0x48] sm:$0xff] (!%p869_p6) }
 0x11c   : > { %v582_v6 = vadd.f32 %v581_v4, %v1086_v3 }
 0x11e   : > { %v583_v8 = vadd.f32 %v582_v6, %v1090_v5  ;;  %v1099_v11 = vld [vmem:[#allocation2 + $0x30] sm:$0xff] }
 0x11f   : > { %v1093_v7 = vld [vmem:[#allocation2 + $0x20] sm:$0xff]  ;;  %v1123_v27 = vld [vmem:[#allocation2 + $0x70] sm:$0xff] }
 0x120   : > { %v584_v10 = vadd.f32 %v583_v8, %v1093_v7  ;;  %v1102_v13 = vld [vmem:[#allocation2 + $0x38] sm:$0xff]  ;;  %v1117_v23 = vld [vmem:[#allocation2 + $0x60] sm:$0xff] }
 0x121   : > { %v1096_v9 = vld [vmem:[#allocation2 + $0x28] sm:$0xff]  ;;  %v1126_v29 = vld [vmem:[#allocation2 + $0x78] sm:$0xff] }
 0x122   : > { %v585_v12 = vadd.f32 %v584_v10, %v1096_v9  ;;  %v1120_v25 = vld [vmem:[#allocation2 + $0x68] sm:$0xff] }
 0x124   : > { %v586_v14 = vadd.f32 %v585_v12, %v1099_v11 }
 0x126   : > { %v587_v16 = vadd.f32 %v586_v14, %v1102_v13 }
 0x128   : > { %v588_v18 = vadd.f32 %v587_v16, %v1105_v15 }
 0x12a   : > { %v589_v20 = vadd.f32 %v588_v18, %v1108_v17 }
 0x12c   : > { %v590_v22 = vadd.f32 %v589_v20, %v1111_v19 }
 0x12e   : > { %v591_v24 = vadd.f32 %v590_v22, %v1114_v21 }
 0x130   : > { %v592_v26 = vadd.f32 %v591_v24, %v1117_v23 }
 0x132   : > { %v593_v28 = vadd.f32 %v592_v26, %v1120_v25 }
 0x134   : > { %v594_v30 = vadd.f32 %v593_v28, %v1123_v27 }
 0x136   : > { %v595_v31 = vadd.f32 %v594_v30, %v1126_v29 }
 0x138   : > { %v596_v32 = vrot.slane %v595_v31, 4 }
 0x13a   : > { %v597_v33 = vadd.f32 %v596_v32, %v595_v31 }
 0x13c   : > { %v598_v34 = vrot.slane %v597_v33, 2 }
 0x13e   : > { %v599_v35 = vadd.f32 %v598_v34, %v597_v33 }
 0x140   : > { %v600_v36 = vrot.slane %v599_v35, 1 }
 0x142   : > { %v601_v37 = vadd.f32 %v600_v36, %v599_v35 }
 0x144   : > { %v1130_v38 = vmul.f32 0.0078125, %v601_v37 }
 0x146   : > { %v604_v39 = vsub.f32 %v1082_v1, %v1130_v38  ;;  %v605_v40 = vsub.f32 %v1084_v2, %v1130_v38  ;;  %v606_v41 = vsub.f32 %v1086_v3, %v1130_v38  ;;  %v607_v42 = vsub.f32 %v1090_v5, %v1130_v38 }
 0x147   : > { %v608_v45 = vsub.f32 %v1093_v7, %v1130_v38  ;;  %v609_v47 = vsub.f32 %v1096_v9, %v1130_v38  ;;  %v610_v50 = vsub.f32 %v1099_v11, %v1130_v38  ;;  %v611_v53 = vsub.f32 %v1102_v13, %v1130_v38 }
 0x148   : > { %v620_v43 = vmul.f32 %v604_v39, %v604_v39  ;;  %v621_v44 = vmul.f32 %v605_v40, %v605_v40  ;;  %v622_v46 = vmul.f32 %v606_v41, %v606_v41  ;;  %v623_v48 = vmul.f32 %v607_v42, %v607_v42 }
 0x149   : > { %v624_v51 = vmul.f32 %v608_v45, %v608_v45  ;;  %v625_v54 = vmul.f32 %v609_v47, %v609_v47  ;;  %v612_v56 = vsub.f32 %v1105_v15, %v1130_v38  ;;  %v626_v57 = vmul.f32 %v610_v50, %v610_v50 }
 0x14a   : > { %v636_v49 = vadd.f32 %v621_v44, %v620_v43  ;;  %v613_v59 = vsub.f32 %v1108_v17, %v1130_v38  ;;  %v627_v60 = vmul.f32 %v611_v53, %v611_v53  ;;  %v614_v62 = vsub.f32 %v1111_v19, %v1130_v38  ;;  %v662_v53 = vld [vmem:[%s1247_s3] sm:$0x1] }
 0x14b   : > { %v628_v63 = vmul.f32 %v612_v56, %v612_v56  ;;  %v615_v4 = vsub.f32 %v1114_v21, %v1130_v38  ;;  %v616_v10 = vsub.f32 %v1117_v23, %v1130_v38  ;;  %v617_v16 = vsub.f32 %v1120_v25, %v1130_v38 }
 0x14c   : > { %v637_v52 = vadd.f32 %v636_v49, %v622_v46  ;;  %v629_v6 = vmul.f32 %v613_v59, %v613_v59  ;;  %v630_v12 = vmul.f32 %v614_v62, %v614_v62  ;;  %v618_v22 = vsub.f32 %v1123_v27, %v1130_v38  ;;  %v658_v49 = vld [vmem:[%s1246_s2] sm:$0x1] }
 0x14d   : > { %v631_v18 = vmul.f32 %v615_v4, %v615_v4  ;;  %v632_v24 = vmul.f32 %v616_v10, %v616_v10  ;;  %v619_v28 = vsub.f32 %v1126_v29, %v1130_v38  ;;  %v633_v30 = vmul.f32 %v617_v16, %v617_v16 }
 0x14e   : > { %v638_v55 = vadd.f32 %v637_v52, %v623_v48  ;;  %v634_v32 = vmul.f32 %v618_v22, %v618_v22  ;;  %v666_v47 = vlaneseq }
 0x14f   : > { %v635_v34 = vmul.f32 %v619_v28, %v619_v28 }
 0x150   : > { %v639_v58 = vadd.f32 %v638_v55, %v624_v51  ;;  %v667_v48 = vshrl.u32 %v666_v47, 7 }
 0x152   : > { %v640_v61 = vadd.f32 %v639_v58, %v625_v54  ;;  %v668_v50 = vsub.s32 0, %v667_v48 }
 0x154   : > { %v641_v0 = vadd.f32 %v640_v61, %v626_v57 }
 0x156   : > { %v642_v8 = vadd.f32 %v641_v0, %v627_v60 }
 0x158   : > { %v643_v14 = vadd.f32 %v642_v8, %v628_v63 }
 0x15a   : > { %v644_v20 = vadd.f32 %v643_v14, %v629_v6 }
 0x15c   : > { %v645_v26 = vadd.f32 %v644_v20, %v630_v12 }
 0x15e   : > { %v646_v31 = vadd.f32 %v645_v26, %v631_v18 }
 0x160   : > { %v647_v33 = vadd.f32 %v646_v31, %v632_v24 }
 0x162   : > { %v648_v35 = vadd.f32 %v647_v33, %v633_v30 }
 0x164   : > { %v649_v36 = vadd.f32 %v648_v35, %v634_v32 }
 0x166   : > { %v650_v37 = vadd.f32 %v649_v36, %v635_v34 }
 0x168   : > { %v651_v39 = vrot.slane %v650_v37, 4 }
 0x16a   : > { %v652_v40 = vadd.f32 %v651_v39, %v650_v37 }
 0x16c   : > { %v653_v41 = vrot.slane %v652_v40, 2 }
 0x16e   : > { %v654_v42 = vadd.f32 %v653_v41, %v652_v40 }
 0x170   : > { %v655_v43 = vrot.slane %v654_v42, 1 }
 0x172   : > { %v656_v44 = vadd.f32 %v655_v43, %v654_v42 }
 0x174   : > { %v657_v45 = vmul.f32 0.0078125, %v656_v44 }
 0x176   : > { %v659_v46 = vadd.f32 1e-05, %v657_v45 }
 0x178   : > { %980 = vrsqrt.f32 %v659_v46 }
 0x182   : > { %v981_v51 = vpop.eup %980 }
 0x183   : > { %v661_v52 = vmul.f32 %v981_v51, %v658_v49 }
 0x185   : > { %v663_v54 = vmul.f32 %v661_v52, %v1130_v38  ;;  %v669_v55 = vrot.slane %v661_v52, %v668_v50 }
 0x187   : > { %v664_v56 = vsub.f32 %v662_v53, %v663_v54  ;;  %v671_v57 = vmul.f32 %v669_v55, %v1082_v1  ;;  %v672_v58 = vmul.f32 %v669_v55, %v1084_v2  ;;  %v673_v59 = vmul.f32 %v669_v55, %v1086_v3 }
 0x188   : > { %v674_v60 = vmul.f32 %v669_v55, %v1090_v5  ;;  %v675_v61 = vmul.f32 %v669_v55, %v1093_v7  ;;  %v676_v62 = vmul.f32 %v669_v55, %v1096_v9  ;;  %v677_v63 = vmul.f32 %v669_v55, %v1099_v11 }
 0x189   : > { %v691_v0 = vrot.slane %v664_v56, %v668_v50  ;;  %v678_v4 = vmul.f32 %v669_v55, %v1102_v13  ;;  %v679_v38 = vmul.f32 %v669_v55, %v1105_v15  ;;  %v680_v6 = vmul.f32 %v669_v55, %v1108_v17 }
 0x18a   : > { %v681_v1 = vmul.f32 %v669_v55, %v1111_v19  ;;  %v682_v2 = vmul.f32 %v669_v55, %v1114_v21  ;;  %v683_v3 = vmul.f32 %v669_v55, %v1117_v23  ;;  %v684_v5 = vmul.f32 %v669_v55, %v1120_v25 }
 0x18b   : > { %v693_v7 = vadd.f32 %v691_v0, %v671_v57  ;;  %v694_v8 = vadd.f32 %v691_v0, %v672_v58  ;;  %v695_v9 = vadd.f32 %v691_v0, %v673_v59  ;;  %v696_v10 = vadd.f32 %v691_v0, %v674_v60 }
 0x18c   : > { %v697_v11 = vadd.f32 %v691_v0, %v675_v61  ;;  %v698_v12 = vadd.f32 %v691_v0, %v676_v62  ;;  %v699_v14 = vadd.f32 %v691_v0, %v677_v63  ;;  %v700_v13 = vadd.f32 %v691_v0, %v678_v4 }
 0x18d   : > { %v709_v16 = vmax.f32 %v693_v7, 0.0  ;;  %v710_v15 = vmax.f32 %v694_v8, 0.0  ;;  %v711_v18 = vmax.f32 %v695_v9, 0.0  ;;  %v712_v17 = vmax.f32 %v696_v10, 0.0 }
 0x18e   : > { %v713_v20 = vmax.f32 %v697_v11, 0.0  ;;  %v714_v19 = vmax.f32 %v698_v12, 0.0  ;;  %v715_v22 = vmax.f32 %v699_v14, 0.0  ;;  %v716_v21 = vmax.f32 %v700_v13, 0.0 }
 0x18f   : > { %725 = vst [vmem:[%s1248_s4] sm:$0xff] %v709_v16  ;;  %726 = vst [vmem:[%s1248_s4 + $0x8] sm:$0xff] %v710_v15  ;;  %v701_v23 = vadd.f32 %v691_v0, %v679_v38  ;;  %v702_v25 = vadd.f32 %v691_v0, %v680_v6  ;;  %v703_v24 = vadd.f32 %v691_v0, %v681_v1 }
 0x190   : > { %727 = vst [vmem:[%s1248_s4 + $0x10] sm:$0xff] %v711_v18  ;;  %728 = vst [vmem:[%s1248_s4 + $0x18] sm:$0xff] %v712_v17  ;;  %v704_v26 = vadd.f32 %v691_v0, %v682_v2  ;;  %v705_v28 = vadd.f32 %v691_v0, %v683_v3  ;;  %v706_v30 = vadd.f32 %v691_v0, %v684_v5 }
 0x191   : > { %729 = vst [vmem:[%s1248_s4 + $0x20] sm:$0xff] %v713_v20  ;;  %730 = vst [vmem:[%s1248_s4 + $0x28] sm:$0xff] %v714_v19  ;;  %v685_v31 = vmul.f32 %v669_v55, %v1123_v27  ;;  %v686_v32 = vmul.f32 %v669_v55, %v1126_v29  ;;  %v717_v33 = vmax.f32 %v701_v23, 0.0  ;;  %v718_v34 = vmax.f32 %v702_v25, 0.0 }
 0x192   : > { %731 = vst [vmem:[%s1248_s4 + $0x30] sm:$0xff] %v715_v22  ;;  %732 = vst [vmem:[%s1248_s4 + $0x38] sm:$0xff] %v716_v21  ;;  %v719_v35 = vmax.f32 %v703_v24, 0.0  ;;  %v720_v36 = vmax.f32 %v704_v26, 0.0  ;;  %v721_v37 = vmax.f32 %v705_v28, 0.0  ;;  %v722_v39 = vmax.f32 %v706_v30, 0.0 }
 0x193   : > { %v707_v40 = vadd.f32 %v691_v0, %v685_v31  ;;  %v708_v41 = vadd.f32 %v691_v0, %v686_v32  ;;  %733 = vst [vmem:[%s1248_s4 + $0x40] sm:$0xff] %v717_v33  ;;  %734 = vst [vmem:[%s1248_s4 + $0x48] sm:$0xff] %v718_v34 }
 0x194   : > { %735 = vst [vmem:[%s1248_s4 + $0x50] sm:$0xff] %v719_v35  ;;  %736 = vst [vmem:[%s1248_s4 + $0x58] sm:$0xff] %v720_v36 }
 0x195   : > { %737 = vst [vmem:[%s1248_s4 + $0x60] sm:$0xff] %v721_v37  ;;  %738 = vst [vmem:[%s1248_s4 + $0x68] sm:$0xff] %v722_v39  ;;  %v723_v27 = vmax.f32 %v707_v40, 0.0  ;;  %v724_v29 = vmax.f32 %v708_v41, 0.0 }
 0x197   : > { %739 = vst [vmem:[%s1248_s4 + $0x70] sm:$0xff] %v723_v27  ;;  %740 = vst [vmem:[%s1248_s4 + $0x78] sm:$0xff] %v724_v29 }
 0x198 PF: > { %s14_s17 = sadd.s32 1, %s1004_s17   ;;  %s1249_s15 = smov %s1000_s16 }
 0x199   : > { %p11_p7 = scmp.ge.s32.totalorder %s14_s17, 11   ;;  %s1250_s16 = smov %s1252_s18 }
 0x19b   :  { %13 = sbr.rel (!%p11_p7) target bundleno = 2 (0x2), region = 83 }

// kernel: inception_block_b.6
= control target key start
LH: loop header
LB: loop body
LE: loop exit
PB: predicated region body
PF: predicated region fallthrough
CT: control target
= control target key end

     0   :  { %s1644_s0 = inlined_call_operand.vmem [shape: bf16[9,128,128], index: 0, kind: input, shape index: {}]   ;;  %s1645_s1 = inlined_call_operand.vmem [shape: bf16[9,128,384], index: 1, kind: input, shape index: {}]   ;;  %s1646_s2 = inlined_call_operand.vmem [shape: f32[1,384], index: 2, kind: input, shape index: {}]   ;;  %s1647_s3 = inlined_call_operand.vmem [shape: f32[1,384], index: 3, kind: input, shape index: {}]   ;;  %s1648_s4 = inlined_call_operand.vmem [shape: f32[128,384], index: 4, kind: output, shape index: {}]  }
   0x1   :  { %1650 = sst [smem:[#allocation6_spill]] %s1645_s1 }
   0x2   :  { %s1320_s15 = smov 0   ;;  %s1322_s16 = smov 0  }
   0x3   :  { %s1324_s17 = smov 0   ;;  %s1326_s18 = smov 0  }
   0x4   :  { %s1328_s19 = smov 0   ;;  %s1330_s20 = smov 0  }
   0x5   :  { %s1332_s21 = smov 0   ;;  %s1334_s22 = smov 0  }
   0x6   :  { %s1336_s23 = smov 0  }
   0x7 LB: > { %s23_s24 = sadd.s32 1, %s1284_s21  ;;  %s26_s25 = sadd.s32 1, %s1288_s22  ;;  %s1292_s23 = sphi %s1336_s23, %s14_s23   ;;  %s1288_s22 = sphi %s1334_s22, %s1663_s22   ;;  %s1284_s21 = sphi %s1332_s21, %s1662_s21   ;;  %s1280_s20 = sphi %s1330_s20, %s1661_s20   ;;  %s1276_s19 = sphi %s1328_s19, %s1660_s19   ;;  %s1272_s18 = sphi %s1326_s18, %s1659_s18   ;;  %s1268_s17 = sphi %s1324_s17, %s1658_s17   ;;  %s1264_s16 = sphi %s1322_s16, %s1657_s16   ;;  %s1260_s15 = sphi %s1320_s15, %s1656_s15  }
   0x8   : > { %p24_p0 = scmp.ge.s32.totalorder %s23_s24, 9  ;;  %p68_p1 = scmp.ne.s32.totalorder %s1272_s18, %s1268_s17 }
   0x9   : > { %s1032_s26 = sadd.s32 4294967295, %s1292_s23   ;;  %p69_p2 = scmp.eq.s32.totalorder %s1292_s23, 0 }
   0xa   : > { %s1665_s24 = smov (%p24_p0, %s23_s24), 0  ;;  %s1667_s25 = smov (!%p24_p0, %s26_s25), %s1288_s22 }
   0xb   : > { %p28_p3 = scmp.ge.s32.totalorder %s1667_s25, 3  ;;  %s56_s27 = ssub.s32 %s1284_s21, %s1665_s24 }
   0xc   : > { %p1376_p4 = por %p69_p2, %p68_p1  ;;  %p149_p5 = scmp.ne.s32.totalorder %s1264_s16, %s1260_s15 }
   0xd   : > { %s1669_s25 = smov (%p28_p3, %s1667_s25), 0  ;;  %s61_s29 = sadd.s32 1, %s1272_s18 }
   0xe   : > { %1652 = sst [smem:[#allocation5_spill]] %s1669_s25  ;;  %p150_p6 = scmp.eq.s32.totalorder %s1032_s26, 26 }
   0xf   : > { %s57_s30 = ssub.s32 %s1288_s22, %s1669_s25  ;;  %s139_s5 = sadd.s32 1, %s1264_s16 }
  0x10   : > { %s58_s6 = sor.u32 %s57_s30, %s56_s27  ;;  %p137_p7 = scmp.eq.s32.totalorder %s57_s30, 0 }
  0x11   : > { %p59_p8 = scmp.eq.s32.totalorder %s58_s6, 0  ;;  %p1388_p9 = por %p150_p6, %p149_p5 }
  0x12   : > { %s1393_s8 = scalar_select %p137_p7, %s1264_s16, %s139_s5  }
  0x13   : > { %s1396_s9 = scalar_select %p59_p8, %s1272_s18, %s61_s29  }
  0x14   : > { %p1035_p10 = scmp.ge.s32.totalorder %s1292_s23, 27 }
  0x16   : > { %172 = sbr.rel (%p1035_p10) target bundleno = 49 (0x31), region = 16 }
  0x1d   : > { %183 = sbr.rel (!%p1376_p4) target bundleno = 49 (0x31), region = 24  ;;  %s185_s10 = sand.u32 (%p1376_p4), 1, %s1272_s18  }
  0x1e   : > { %s1130_s11 = smul.u32 (%p1376_p4), 48, %s1284_s21  ;;  %s1036_s12 = sshll.u32 (%p1376_p4), %s185_s10, 6 }
  0x1f   : > { %s1654_s1 = sld [smem:[#allocation6_spill]] (%p1376_p4)  ;;  %s187_s28 = scalar_lea.vmem (%p1376_p4), [#allocation3], %s1036_s12 }
  0x20   : > { %s189_s13 = sadd.s32 (%p1376_p4), %s1288_s22, %s1130_s11 }
  0x21   : > { %s1037_s14 = sshll.u32 (%p1376_p4), %s189_s13, 2 }
  0x25   : > { %s1407_s30 = scalar_lea.vmem %s1654_s1, %s1037_s14 }
  0x26   : > { %v207_v0 = vld [vmem:[%s1407_s30] sm:$0xf]  ;;  %v209_v1 = vld [vmem:[%s1407_s30 + $0xc] sm:$0xf]  ;;  %v211_v2 = vld [vmem:[%s1407_s30 + $0x18] sm:$0xf] }
  0x27   : > { %208 = vst [vmem:[%s187_s28] sm:$0xf] %v207_v0  ;;  %210 = vst [vmem:[%s187_s28 + $0x4] sm:$0xf] %v209_v1  ;;  %v213_v3 = vld [vmem:[%s1407_s30 + $0x24] sm:$0xf] }
  0x28   : > { %212 = vst [vmem:[%s187_s28 + $0x8] sm:$0xf] %v211_v2  ;;  %v215_v4 = vld [vmem:[%s1407_s30 + $0x30] sm:$0xf]  ;;  %v217_v5 = vld [vmem:[%s1407_s30 + $0x3c] sm:$0xf] }
  0x29   : > { %214 = vst [vmem:[%s187_s28 + $0xc] sm:$0xf] %v213_v3  ;;  %216 = vst [vmem:[%s187_s28 + $0x10] sm:$0xf] %v215_v4  ;;  %v219_v6 = vld [vmem:[%s1407_s30 + $0x48] sm:$0xf] }
  0x2a   : > { %218 = vst [vmem:[%s187_s28 + $0x14] sm:$0xf] %v217_v5  ;;  %v221_v7 = vld [vmem:[%s1407_s30 + $0x54] sm:$0xf]  ;;  %v223_v8 = vld [vmem:[%s1407_s30 + $0x60] sm:$0xf] }
  0x2b   : > { %220 = vst [vmem:[%s187_s28 + $0x18] sm:$0xf] %v219_v6  ;;  %222 = vst [vmem:[%s187_s28 + $0x1c] sm:$0xf] %v221_v7  ;;  %v225_v9 = vld [vmem:[%s1407_s30 + $0x6c] sm:$0xf] }
  0x2c   : > { %224 = vst [vmem:[%s187_s28 + $0x20] sm:$0xf] %v223_v8  ;;  %v227_v10 = vld [vmem:[%s1407_s30 + $0x78] sm:$0xf]  ;;  %v229_v11 = vld [vmem:[%s1407_s30 + $0x84] sm:$0xf] }
  0x2d   : > { %226 = vst [vmem:[%s187_s28 + $0x24] sm:$0xf] %v225_v9  ;;  %228 = vst [vmem:[%s187_s28 + $0x28] sm:$0xf] %v227_v10  ;;  %v231_v12 = vld [vmem:[%s1407_s30 + $0x90] sm:$0xf] }
  0x2e   : > { %230 = vst [vmem:[%s187_s28 + $0x2c] sm:$0xf] %v229_v11  ;;  %v233_v13 = vld [vmem:[%s1407_s30 + $0x9c] sm:$0xf]  ;;  %v235_v14 = vld [vmem:[%s1407_s30 + $0xa8] sm:$0xf] }
  0x2f   : > { %232 = vst [vmem:[%s187_s28 + $0x30] sm:$0xf] %v231_v12  ;;  %234 = vst [vmem:[%s187_s28 + $0x34] sm:$0xf] %v233_v13  ;;  %v237_v15 = vld [vmem:[%s1407_s30 + $0xb4] sm:$0xf] }
  0x30   : > { %236 = vst [vmem:[%s187_s28 + $0x38] sm:$0xf] %v235_v14  ;;  %238 = vst [vmem:[%s187_s28 + $0x3c] sm:$0xf] %v237_v15 }
  0x31 PF: > { %p1038_p11 = scmp.ge.s32.totalorder %s1292_s23, 1  ;;  %p304_p12 = scmp.lt.s32.totalorder %s1292_s23, 28 }
  0x33   : > { %p305_p13 = pnand %p1038_p11, %p304_p12 }
  0x34   : > { %s311_s29 = sand.u32 (!%p305_p13), 1, %s1268_s17   ;;  %s343_s5 = sand.u32 (!%p305_p13), 1, %s1260_s15  }
  0x35   : > { %308 = sbr.rel (%p305_p13) target bundleno = 465 (0x1d1), region = 73  ;;  %s1039_s6 = sshll.u32 (!%p305_p13), %s311_s29, 6 }
  0x36   : > { %s1040_s10 = sshll.u32 (!%p305_p13), %s343_s5, 7  ;;  %p346_p0 = scmp.lt.s32.totalorder (!%p305_p13), %s1276_s19, 8 }
  0x37   : > { %p351_p1 = scmp.lt.s32.totalorder (!%p305_p13), %s1280_s20, 2  ;;  %s1448_s1 = scalar_lea.vmem (!%p305_p13), [#allocation3], %s1039_s6 }
  0x38   : > { %s1450_s25 = scalar_lea.vmem (!%p305_p13), [#allocation4], %s1040_s10  ;;  %p1043_p2 = scmp.ne.s32.totalorder (!%p305_p13), %s1276_s19, 0 }
  0x3c   : > { %s347_s11 = scalar_select %p346_p0, %s1276_s19, 8 }
  0x3d   : > { %s1433_s12 = scalar_select %p351_p1, %s1280_s20, 2 }
  0x3e   : > { %s1065_s13 = sshll.u32 %s347_s11, 6  ;;  %361 = sbr.rel (%p1043_p2) target bundleno = 71 (0x47), region = 81  ;;  %v1294_v16 = vmov (!%p1043_p2), 0.0  }
  0x3f   : > { %s1438_s27 = scalar_lea.vmem %s1644_s0, %s1065_s13  ;;  %s353_s17 = scalar_lea.vmem %s1646_s2, %s1433_s12  ;;  %362 = vst [vmem:[#allocation2] sm:$0xff] (!%p1043_p2), %v1294_v16  ;;  %363 = vst [vmem:[#allocation2 + $0x8] sm:$0xff] (!%p1043_p2), %v1294_v16 }
  0x40   : > { %s356_s5 = scalar_lea.vmem %s1647_s3, %s1433_s12  ;;  %364 = vst [vmem:[#allocation2 + $0x10] sm:$0xff] (!%p1043_p2), %v1294_v16  ;;  %365 = vst [vmem:[#allocation2 + $0x18] sm:$0xff] (!%p1043_p2), %v1294_v16 }
  0x41   : > { %366 = vst [vmem:[#allocation2 + $0x20] sm:$0xff] (!%p1043_p2), %v1294_v16  ;;  %367 = vst [vmem:[#allocation2 + $0x28] sm:$0xff] (!%p1043_p2), %v1294_v16 }
  0x42   : > { %368 = vst [vmem:[#allocation2 + $0x30] sm:$0xff] (!%p1043_p2), %v1294_v16  ;;  %369 = vst [vmem:[#allocation2 + $0x38] sm:$0xff] (!%p1043_p2), %v1294_v16 }
  0x43   : > { %370 = vst [vmem:[#allocation2 + $0x40] sm:$0xff] (!%p1043_p2), %v1294_v16  ;;  %371 = vst [vmem:[#allocation2 + $0x48] sm:$0xff] (!%p1043_p2), %v1294_v16 }
  0x44   : > { %372 = vst [vmem:[#allocation2 + $0x50] sm:$0xff] (!%p1043_p2), %v1294_v16  ;;  %373 = vst [vmem:[#allocation2 + $0x58] sm:$0xff] (!%p1043_p2), %v1294_v16 }
  0x45   : > { %374 = vst [vmem:[#allocation2 + $0x60] sm:$0xff] %v1294_v16  ;;  %375 = vst [vmem:[#allocation2 + $0x68] sm:$0xff] %v1294_v16 }
  0x46   : > { %376 = vst [vmem:[#allocation2 + $0x70] sm:$0xff] %v1294_v16  ;;  %377 = vst [vmem:[#allocation2 + $0x78] sm:$0xff] %v1294_v16 }
  0x47 PF: > { %v1204_v17 = vld [vmem:[%s1448_s1] sm:$0xff]   ;;  %v1205_v18 = vld [vmem:[%s1448_s1 + $0x8] sm:$0xff]   ;;  %v1206_v19 = vld [vmem:[%s1448_s1 + $0x10] sm:$0xff]   ;;  %p1060_p3 = scmp.ne.s32.totalorder %s1276_s19, 8 }
  0x48   : > { %1082 = vmatprep.subr.bf16.mxu0 %v1204_v17  ;;  %1114 = vmatprep.subr.bf16.mxu1 %v1204_v17  ;;  %v1207_v20 = vld [vmem:[%s1448_s1 + $0x18] sm:$0xff]   ;;  %v1212_v21 = vld [vmem:[%s1438_s27] sm:$0xff]   ;;  %v1209_v24 = vld [vmem:[%s1448_s1 + $0x28] sm:$0xff]  }
  0x49   : > { %1083 = vmatpush3.bf16.msra.mxu0 %v1204_v17  ;;  %1122 = vmatpush3.bf16.msra.mxu1 %v1204_v17  ;;  %v1213_v22 = vld [vmem:[%s1438_s27 + $0x20] sm:$0xff]   ;;  %v1210_v25 = vld [vmem:[%s1448_s1 + $0x30] sm:$0xff]   ;;  %v1211_v26 = vld [vmem:[%s1448_s1 + $0x38] sm:$0xff]  }
  0x4a   : > { %1084 = vmatprep.subr.bf16.mxu0 %v1205_v18  ;;  %1115 = vmatprep.subr.bf16.mxu1 %v1205_v18  ;;  %v1208_v23 = vld [vmem:[%s1448_s1 + $0x20] sm:$0xff]   ;;  %v1214_v27 = vld [vmem:[%s1438_s27 + $0x8] sm:$0xff]   ;;  %v1216_v29 = vld [vmem:[%s1438_s27 + $0x10] sm:$0xff]  }
  0x4b   : > { %1098 = vmatprep.mubr.bf16.mxu0 %v1212_v21  ;;  %1106 = vmatprep.mubr.bf16.mxu1 %v1213_v22  ;;  %v1215_v28 = vld [vmem:[%s1438_s27 + $0x28] sm:$0xff]   ;;  %v1217_v30 = vld [vmem:[%s1438_s27 + $0x30] sm:$0xff]   ;;  %v1218_v31 = vld [vmem:[%s1438_s27 + $0x18] sm:$0xff]  }
  0x4c   : > { %v1219_v32 = vld [vmem:[%s1438_s27 + $0x38] sm:$0xff]   ;;  %v380_v33 = vld [vmem:[#allocation2 + $0x10] sm:$0xff]  ;;  %v378_v35 = vld [vmem:[#allocation2] sm:$0xff] }
  0x4d   : > { %1085 = vmatpush3.bf16.msra.mxu0 %v1205_v18  ;;  %1123 = vmatpush3.bf16.msra.mxu1 %v1205_v18  ;;  %v388_v34 = vld [vmem:[#allocation2 + $0x50] sm:$0xff]  ;;  %v386_v36 = vld [vmem:[#allocation2 + $0x40] sm:$0xff]  ;;  %v381_v39 = vld [vmem:[#allocation2 + $0x18] sm:$0xff] }
  0x4e   : > { %1086 = vmatprep.subr.bf16.mxu0 %v1206_v19  ;;  %1116 = vmatprep.subr.bf16.mxu1 %v1206_v19  ;;  %v389_v40 = vld [vmem:[#allocation2 + $0x58] sm:$0xff]  ;;  %v379_v45 = vld [vmem:[#allocation2 + $0x8] sm:$0xff]  ;;  %v384_v57 = vld [vmem:[#allocation2 + $0x30] sm:$0xff] }
  0x4f   : > { %v387_v46 = vld [vmem:[#allocation2 + $0x48] sm:$0xff]  ;;  %v392_v58 = vld [vmem:[#allocation2 + $0x70] sm:$0xff]  ;;  %v382_v59 = vld [vmem:[#allocation2 + $0x20] sm:$0xff] }
  0x50   : > { %v390_v60 = vld [vmem:[#allocation2 + $0x60] sm:$0xff]  ;;  %v385_v63 = vld [vmem:[#allocation2 + $0x38] sm:$0xff]  ;;  %v383_v5 = vld [vmem:[#allocation2 + $0x28] sm:$0xff] }
  0x51   : > { %1087 = vmatpush3.bf16.msra.mxu0 %v1206_v19  ;;  %1124 = vmatpush3.bf16.msra.mxu1 %v1206_v19  ;;  %v393_v0 = vld [vmem:[#allocation2 + $0x78] sm:$0xff]  ;;  %v391_v6 = vld [vmem:[#allocation2 + $0x68] sm:$0xff] }
  0x52   : > { %1088 = vmatprep.subr.bf16.mxu0 %v1207_v20  ;;  %1117 = vmatprep.subr.bf16.mxu1 %v1207_v20 }
  0x55   : > { %1089 = vmatpush3.bf16.msra.mxu0 %v1207_v20  ;;  %1125 = vmatpush3.bf16.msra.mxu1 %v1207_v20 }
  0x56   : > { %1090 = vmatprep.subr.bf16.mxu0 %v1208_v23  ;;  %1118 = vmatprep.subr.bf16.mxu1 %v1208_v23 }
  0x59   : > { %1091 = vmatpush3.bf16.msra.mxu0 %v1208_v23  ;;  %1126 = vmatpush3.bf16.msra.mxu1 %v1208_v23 }
  0x5a   : > { %1092 = vmatprep.subr.bf16.mxu0 %v1209_v24  ;;  %1119 = vmatprep.subr.bf16.mxu1 %v1209_v24 }
  0x5d   : > { %1093 = vmatpush3.bf16.msra.mxu0 %v1209_v24  ;;  %1127 = vmatpush3.bf16.msra.mxu1 %v1209_v24 }
  0x5e   : > { %1094 = vmatprep.subr.bf16.mxu0 %v1210_v25  ;;  %1120 = vmatprep.subr.bf16.mxu1 %v1210_v25 }
  0x61   : > { %1095 = vmatpush3.bf16.msra.mxu0 %v1210_v25  ;;  %1128 = vmatpush3.bf16.msra.mxu1 %v1210_v25 }
  0x62   : > { %1096 = vmatprep.subr.bf16.mxu0 %v1211_v26  ;;  %1121 = vmatprep.subr.bf16.mxu1 %v1211_v26 }
  0x65   : > { %1097 = vmatpush3.bf16.msra.mxu0 %v1211_v26  ;;  %1129 = vmatpush3.bf16.msra.mxu1 %v1211_v26 }
  0x68   : > { %1099 = vmatmul.mubr.bf16.vlgmr.msra.gmra.mrb[0].mxu0 %v1214_v27  ;;  %1107 = vmatmul.mubr.bf16.vlgmr.msra.gmra.mrb[0].mxu1 %v1215_v28 }
  0x69   : > { %1102 = vmatprep.mubr.bf16.mxu0 %v1216_v29  ;;  %1110 = vmatprep.mubr.bf16.mxu1 %v1217_v30 }
  0x70   : > { %1103 = vmatmul.mubr.bf16.gmra.mrb[4].mxu0 %v1218_v31  ;;  %1111 = vmatmul.mubr.bf16.gmra.mrb[4].mxu1 %v1219_v32 }
 0x13b   : > { %v1100_v37 = vpop.f32.mrb[0].mxu0  ;;  %v1108_v38 = vpop.f32.mrb[0].mxu1 }
 0x13c   : > { %v621_v41 = vadd.f32 %v1100_v37, %v380_v33  ;;  %v629_v42 = vadd.f32 %v1108_v38, %v388_v34  ;;  %v556_v43 = vpop.f32.mrb[1].mxu0  ;;  %v588_v44 = vpop.f32.mrb[1].mxu1 }
 0x13d   : > { %v619_v47 = vadd.f32 %v556_v43, %v378_v35  ;;  %v627_v48 = vadd.f32 %v588_v44, %v386_v36  ;;  %v1101_v49 = vpop.f32.mrb[2].mxu0  ;;  %v1109_v50 = vpop.f32.mrb[2].mxu1 }
 0x13e   : > { %637 = vst [vmem:[#allocation2 + $0x10] sm:$0xff] %v621_v41  ;;  %645 = vst [vmem:[#allocation2 + $0x50] sm:$0xff] %v629_v42  ;;  %v622_v51 = vadd.f32 %v1101_v49, %v381_v39  ;;  %v630_v52 = vadd.f32 %v1109_v50, %v389_v40  ;;  %v559_v53 = vpop.f32.mrb[3].mxu0  ;;  %v591_v54 = vpop.f32.mrb[3].mxu1 }
 0x13f   : > { %635 = vst [vmem:[#allocation2] sm:$0xff] %v619_v47  ;;  %643 = vst [vmem:[#allocation2 + $0x40] sm:$0xff] %v627_v48  ;;  %v620_v55 = vadd.f32 %v559_v53, %v379_v45  ;;  %v628_v56 = vadd.f32 %v591_v54, %v387_v46 }
 0x140   : > { %638 = vst [vmem:[#allocation2 + $0x18] sm:$0xff] %v622_v51  ;;  %646 = vst [vmem:[#allocation2 + $0x58] sm:$0xff] %v630_v52 }
 0x141   : > { %636 = vst [vmem:[#allocation2 + $0x8] sm:$0xff] %v620_v55  ;;  %644 = vst [vmem:[#allocation2 + $0x48] sm:$0xff] %v628_v56 }
 0x143   : > { %v1104_v61 = vpop.f32.mrb[4].mxu0  ;;  %v1112_v62 = vpop.f32.mrb[4].mxu1  ;;  %654 = sbr.rel (%p1060_p3) target bundleno = 455 (0x1c7), region = 85 }
 0x144   : > { %v625_v1 = vadd.f32 %v1104_v61, %v384_v57  ;;  %v633_v2 = vadd.f32 %v1112_v62, %v392_v58  ;;  %v572_v3 = vpop.f32.mrb[5].mxu0  ;;  %v604_v4 = vpop.f32.mrb[5].mxu1 }
 0x145   : > { %v623_v7 = vadd.f32 %v572_v3, %v382_v59  ;;  %v631_v8 = vadd.f32 %v604_v4, %v390_v60  ;;  %v1105_v9 = vpop.f32.mrb[6].mxu0  ;;  %v1113_v10 = vpop.f32.mrb[6].mxu1  ;;  %v1474_v19 = vld [vmem:[#allocation2 + $0x10] sm:$0xff] (!%p1060_p3) }
 0x146   : > { %641 = vst [vmem:[#allocation2 + $0x30] sm:$0xff] %v625_v1  ;;  %649 = vst [vmem:[#allocation2 + $0x70] sm:$0xff] %v633_v2  ;;  %v626_v11 = vadd.f32 %v1105_v9, %v385_v63  ;;  %v634_v12 = vadd.f32 %v1113_v10, %v393_v0  ;;  %v575_v13 = vpop.f32.mrb[7].mxu0  ;;  %v607_v14 = vpop.f32.mrb[7].mxu1  ;;  %v1470_v17 = vld [vmem:[#allocation2] sm:$0xff] (!%p1060_p3)  ;;  %v1499_v35 = vld [vmem:[#allocation2 + $0x50] sm:$0xff] (!%p1060_p3) }
 0x147   : > { %639 = vst [vmem:[#allocation2 + $0x20] sm:$0xff] %v623_v7  ;;  %647 = vst [vmem:[#allocation2 + $0x60] sm:$0xff] %v631_v8  ;;  %v624_v15 = vadd.f32 %v575_v13, %v383_v5  ;;  %v632_v16 = vadd.f32 %v607_v14, %v391_v6  ;;  %v1478_v21 = vld [vmem:[#allocation2 + $0x18] sm:$0xff] (!%p1060_p3)  ;;  %v1493_v31 = vld [vmem:[#allocation2 + $0x40] sm:$0xff] (!%p1060_p3) }
 0x148   : > { %642 = vst [vmem:[#allocation2 + $0x38] sm:$0xff] %v626_v11  ;;  %650 = vst [vmem:[#allocation2 + $0x78] sm:$0xff] %v634_v12  ;;  %v1472_v18 = vld [vmem:[#allocation2 + $0x8] sm:$0xff] (!%p1060_p3)  ;;  %v1502_v37 = vld [vmem:[#allocation2 + $0x58] sm:$0xff] (!%p1060_p3) }
 0x149   : > { %640 = vst [vmem:[#allocation2 + $0x28] sm:$0xff] %v624_v15  ;;  %648 = vst [vmem:[#allocation2 + $0x68] sm:$0xff] %v632_v16  ;;  %v671_v20 = vadd.f32 (!%p1060_p3), %v1472_v18, %v1470_v17  ;;  %v1496_v33 = vld [vmem:[#allocation2 + $0x48] sm:$0xff] (!%p1060_p3) }
 0x14b   : > { %v672_v22 = vadd.f32 %v671_v20, %v1474_v19 }
 0x14d   : > { %v673_v24 = vadd.f32 %v672_v22, %v1478_v21  ;;  %v1487_v27 = vld [vmem:[#allocation2 + $0x30] sm:$0xff] }
 0x14e   : > { %v1481_v23 = vld [vmem:[#allocation2 + $0x20] sm:$0xff]  ;;  %v1511_v43 = vld [vmem:[#allocation2 + $0x70] sm:$0xff] }
 0x14f   : > { %v674_v26 = vadd.f32 %v673_v24, %v1481_v23  ;;  %v1490_v29 = vld [vmem:[#allocation2 + $0x38] sm:$0xff]  ;;  %v1505_v39 = vld [vmem:[#allocation2 + $0x60] sm:$0xff] }
 0x150   : > { %v1484_v25 = vld [vmem:[#allocation2 + $0x28] sm:$0xff]  ;;  %v1514_v45 = vld [vmem:[#allocation2 + $0x78] sm:$0xff] }
 0x151   : > { %v675_v28 = vadd.f32 %v674_v26, %v1484_v25  ;;  %v1508_v41 = vld [vmem:[#allocation2 + $0x68] sm:$0xff] }
 0x153   : > { %v676_v30 = vadd.f32 %v675_v28, %v1487_v27 }
 0x155   : > { %v677_v32 = vadd.f32 %v676_v30, %v1490_v29 }
 0x157   : > { %v678_v34 = vadd.f32 %v677_v32, %v1493_v31 }
 0x159   : > { %v679_v36 = vadd.f32 %v678_v34, %v1496_v33 }
 0x15b   : > { %v680_v38 = vadd.f32 %v679_v36, %v1499_v35 }
 0x15d   : > { %v681_v40 = vadd.f32 %v680_v38, %v1502_v37 }
 0x15f   : > { %v682_v42 = vadd.f32 %v681_v40, %v1505_v39 }
 0x161   : > { %v683_v44 = vadd.f32 %v682_v42, %v1508_v41 }
 0x163   : > { %v684_v46 = vadd.f32 %v683_v44, %v1511_v43 }
 0x165   : > { %v685_v47 = vadd.f32 %v684_v46, %v1514_v45 }
 0x167   : > { %v686_v48 = vrot.slane %v685_v47, 4 }
 0x169   : > { %v687_v49 = vadd.f32 %v686_v48, %v685_v47 }
 0x16b   : > { %v688_v50 = vrot.slane %v687_v49, 2 }
 0x16d   : > { %v689_v51 = vadd.f32 %v688_v50, %v687_v49 }
 0x16f   : > { %v690_v52 = vrot.slane %v689_v51, 1 }
 0x171   : > { %v691_v53 = vadd.f32 %v690_v52, %v689_v51 }
 0x173   : > { %v1518_v54 = vmul.f32 0.0078125, %v691_v53 }
 0x175   : > { %v694_v55 = vsub.f32 %v1470_v17, %v1518_v54  ;;  %v695_v56 = vsub.f32 %v1472_v18, %v1518_v54  ;;  %v696_v57 = vsub.f32 %v1474_v19, %v1518_v54  ;;  %v697_v58 = vsub.f32 %v1478_v21, %v1518_v54 }
 0x176   : > { %v698_v61 = vsub.f32 %v1481_v23, %v1518_v54  ;;  %v699_v63 = vsub.f32 %v1484_v25, %v1518_v54  ;;  %v700_v2 = vsub.f32 %v1487_v27, %v1518_v54  ;;  %v701_v5 = vsub.f32 %v1490_v29, %v1518_v54 }
 0x177   : > { %v710_v59 = vmul.f32 %v694_v55, %v694_v55  ;;  %v711_v60 = vmul.f32 %v695_v56, %v695_v56  ;;  %v712_v62 = vmul.f32 %v696_v57, %v696_v57  ;;  %v713_v0 = vmul.f32 %v697_v58, %v697_v58 }
 0x178   : > { %v714_v3 = vmul.f32 %v698_v61, %v698_v61  ;;  %v715_v6 = vmul.f32 %v699_v63, %v699_v63  ;;  %v702_v8 = vsub.f32 %v1493_v31, %v1518_v54  ;;  %v716_v9 = vmul.f32 %v700_v2, %v700_v2 }
 0x179   : > { %v726_v1 = vadd.f32 %v711_v60, %v710_v59  ;;  %v703_v11 = vsub.f32 %v1496_v33, %v1518_v54  ;;  %v717_v12 = vmul.f32 %v701_v5, %v701_v5  ;;  %v704_v14 = vsub.f32 %v1499_v35, %v1518_v54  ;;  %v752_v5 = vld [vmem:[%s356_s5] sm:$0x1] }
 0x17a   : > { %v718_v15 = vmul.f32 %v702_v8, %v702_v8  ;;  %v705_v20 = vsub.f32 %v1502_v37, %v1518_v54  ;;  %v706_v26 = vsub.f32 %v1505_v39, %v1518_v54  ;;  %v707_v32 = vsub.f32 %v1508_v41, %v1518_v54 }
 0x17b   : > { %v727_v4 = vadd.f32 %v726_v1, %v712_v62  ;;  %v719_v22 = vmul.f32 %v703_v11, %v703_v11  ;;  %v720_v28 = vmul.f32 %v704_v14, %v704_v14  ;;  %v708_v38 = vsub.f32 %v1511_v43, %v1518_v54  ;;  %v748_v1 = vld [vmem:[%s353_s17] sm:$0x1] }
 0x17c   : > { %v721_v34 = vmul.f32 %v705_v20, %v705_v20  ;;  %v722_v40 = vmul.f32 %v706_v26, %v706_v26  ;;  %v709_v44 = vsub.f32 %v1514_v45, %v1518_v54  ;;  %v723_v46 = vmul.f32 %v707_v32, %v707_v32 }
 0x17d   : > { %v728_v7 = vadd.f32 %v727_v4, %v713_v0  ;;  %v724_v48 = vmul.f32 %v708_v38, %v708_v38  ;;  %v756_v63 = vlaneseq }
 0x17e   : > { %v725_v50 = vmul.f32 %v709_v44, %v709_v44 }
 0x17f   : > { %v729_v10 = vadd.f32 %v728_v7, %v714_v3  ;;  %v757_v0 = vshrl.u32 %v756_v63, 7 }
 0x181   : > { %v730_v13 = vadd.f32 %v729_v10, %v715_v6  ;;  %v758_v2 = vsub.s32 0, %v757_v0 }
 0x183   : > { %v731_v16 = vadd.f32 %v730_v13, %v716_v9 }
 0x185   : > { %v732_v24 = vadd.f32 %v731_v16, %v717_v12 }
 0x187   : > { %v733_v30 = vadd.f32 %v732_v24, %v718_v15 }
 0x189   : > { %v734_v36 = vadd.f32 %v733_v30, %v719_v22 }
 0x18b   : > { %v735_v42 = vadd.f32 %v734_v36, %v720_v28 }
 0x18d   : > { %v736_v47 = vadd.f32 %v735_v42, %v721_v34 }
 0x18f   : > { %v737_v49 = vadd.f32 %v736_v47, %v722_v40 }
 0x191   : > { %v738_v51 = vadd.f32 %v737_v49, %v723_v46 }
 0x193   : > { %v739_v52 = vadd.f32 %v738_v51, %v724_v48 }
 0x195   : > { %v740_v53 = vadd.f32 %v739_v52, %v725_v50 }
 0x197   : > { %v741_v55 = vrot.slane %v740_v53, 4 }
 0x199   : > { %v742_v56 = vadd.f32 %v741_v55, %v740_v53 }
 0x19b   : > { %v743_v57 = vrot.slane %v742_v56, 2 }
 0x19d   : > { %v744_v58 = vadd.f32 %v743_v57, %v742_v56 }
 0x19f   : > { %v745_v59 = vrot.slane %v744_v58, 1 }
 0x1a1   : > { %v746_v60 = vadd.f32 %v745_v59, %v744_v58 }
 0x1a3   : > { %v747_v61 = vmul.f32 0.0078125, %v746_v60 }
 0x1a5   : > { %v749_v62 = vadd.f32 1e-05, %v747_v61 }
 0x1a7   : > { %1220 = vrsqrt.f32 %v749_v62 }
 0x1b1   : > { %v1221_v3 = vpop.eup %1220 }
 0x1b2   : > { %v751_v4 = vmul.f32 %v1221_v3, %v748_v1 }
 0x1b4   : > { %v753_v6 = vmul.f32 %v751_v4, %v1518_v54  ;;  %v759_v7 = vrot.slane %v751_v4, %v758_v2 }
 0x1b6   : > { %v754_v8 = vsub.f32 %v752_v5, %v753_v6  ;;  %v761_v9 = vmul.f32 %v759_v7, %v1470_v17  ;;  %v762_v10 = vmul.f32 %v759_v7, %v1472_v18  ;;  %v763_v11 = vmul.f32 %v759_v7, %v1474_v19 }
 0x1b7   : > { %v764_v12 = vmul.f32 %v759_v7, %v1478_v21  ;;  %v765_v13 = vmul.f32 %v759_v7, %v1481_v23  ;;  %v766_v14 = vmul.f32 %v759_v7, %v1484_v25  ;;  %v767_v15 = vmul.f32 %v759_v7, %v1487_v27 }
 0x1b8   : > { %v781_v16 = vrot.slane %v754_v8, %v758_v2  ;;  %v768_v20 = vmul.f32 %v759_v7, %v1490_v29  ;;  %v769_v54 = vmul.f32 %v759_v7, %v1493_v31  ;;  %v770_v22 = vmul.f32 %v759_v7, %v1496_v33 }
 0x1b9   : > { %v771_v17 = vmul.f32 %v759_v7, %v1499_v35  ;;  %v772_v18 = vmul.f32 %v759_v7, %v1502_v37  ;;  %v773_v19 = vmul.f32 %v759_v7, %v1505_v39  ;;  %v774_v21 = vmul.f32 %v759_v7, %v1508_v41 }
 0x1ba   : > { %v783_v23 = vadd.f32 %v781_v16, %v761_v9  ;;  %v784_v25 = vadd.f32 %v781_v16, %v762_v10  ;;  %v785_v27 = vadd.f32 %v781_v16, %v763_v11  ;;  %v786_v24 = vadd.f32 %v781_v16, %v764_v12 }
 0x1bb   : > { %v787_v29 = vadd.f32 %v781_v16, %v765_v13  ;;  %v788_v31 = vadd.f32 %v781_v16, %v766_v14  ;;  %v789_v26 = vadd.f32 %v781_v16, %v767_v15  ;;  %v790_v33 = vadd.f32 %v781_v16, %v768_v20 }
 0x1bc   : > { %v799_v28 = vmax.f32 %v783_v23, 0.0  ;;  %v800_v35 = vmax.f32 %v784_v25, 0.0  ;;  %v801_v37 = vmax.f32 %v785_v27, 0.0  ;;  %v802_v39 = vmax.f32 %v786_v24, 0.0 }
 0x1bd   : > { %v803_v41 = vmax.f32 %v787_v29, 0.0  ;;  %v804_v30 = vmax.f32 %v788_v31, 0.0  ;;  %v805_v32 = vmax.f32 %v789_v26, 0.0  ;;  %v806_v34 = vmax.f32 %v790_v33, 0.0 }
 0x1be   : > { %815 = vst [vmem:[%s1450_s25] sm:$0xff] %v799_v28  ;;  %816 = vst [vmem:[%s1450_s25 + $0x8] sm:$0xff] %v800_v35  ;;  %v791_v36 = vadd.f32 %v781_v16, %v769_v54  ;;  %v792_v38 = vadd.f32 %v781_v16, %v770_v22  ;;  %v793_v40 = vadd.f32 %v781_v16, %v771_v17 }
 0x1bf   : > { %817 = vst [vmem:[%s1450_s25 + $0x10] sm:$0xff] %v801_v37  ;;  %818 = vst [vmem:[%s1450_s25 + $0x18] sm:$0xff] %v802_v39  ;;  %v794_v42 = vadd.f32 %v781_v16, %v772_v18  ;;  %v795_v44 = vadd.f32 %v781_v16, %v773_v19  ;;  %v796_v46 = vadd.f32 %v781_v16, %v774_v21 }
 0x1c0   : > { %819 = vst [vmem:[%s1450_s25 + $0x20] sm:$0xff] %v803_v41  ;;  %820 = vst [vmem:[%s1450_s25 + $0x28] sm:$0xff] %v804_v30  ;;  %v775_v47 = vmul.f32 %v759_v7, %v1511_v43  ;;  %v776_v48 = vmul.f32 %v759_v7, %v1514_v45  ;;  %v807_v49 = vmax.f32 %v791_v36, 0.0  ;;  %v808_v50 = vmax.f32 %v792_v38, 0.0 }
 0x1c1   : > { %821 = vst [vmem:[%s1450_s25 + $0x30] sm:$0xff] %v805_v32  ;;  %822 = vst [vmem:[%s1450_s25 + $0x38] sm:$0xff] %v806_v34  ;;  %v809_v51 = vmax.f32 %v793_v40, 0.0  ;;  %v810_v52 = vmax.f32 %v794_v42, 0.0  ;;  %v811_v53 = vmax.f32 %v795_v44, 0.0  ;;  %v812_v55 = vmax.f32 %v796_v46, 0.0 }
 0x1c2   : > { %v797_v56 = vadd.f32 %v781_v16, %v775_v47  ;;  %v798_v57 = vadd.f32 %v781_v16, %v776_v48  ;;  %823 = vst [vmem:[%s1450_s25 + $0x40] sm:$0xff] %v807_v49  ;;  %824 = vst [vmem:[%s1450_s25 + $0x48] sm:$0xff] %v808_v50 }
 0x1c3   : > { %825 = vst [vmem:[%s1450_s25 + $0x50] sm:$0xff] %v809_v51  ;;  %826 = vst [vmem:[%s1450_s25 + $0x58] sm:$0xff] %v810_v52 }
 0x1c4   : > { %827 = vst [vmem:[%s1450_s25 + $0x60] sm:$0xff] %v811_v53  ;;  %828 = vst [vmem:[%s1450_s25 + $0x68] sm:$0xff] %v812_v55  ;;  %v813_v58 = vmax.f32 %v797_v56, 0.0  ;;  %v814_v43 = vmax.f32 %v798_v57, 0.0 }
 0x1c6   : > { %829 = vst [vmem:[%s1450_s25 + $0x70] sm:$0xff] %v813_v58  ;;  %830 = vst [vmem:[%s1450_s25 + $0x78] sm:$0xff] %v814_v43 }
 0x1c7 PF: > { %837 = sbr.rel (!%p1388_p9) target bundleno = 465 (0x1d1), region = 89  ;;  %s1062_s11 = sshll.u32 (%p1388_p9), %s1280_s20, 3  ;;  %v897_v45 = vld [vmem:[%s1450_s25] sm:$0xff] (%p1388_p9)  ;;  %v899_v59 = vld [vmem:[%s1450_s25 + $0x8] sm:$0xff] (%p1388_p9)  ;;  %v901_v60 = vld [vmem:[%s1450_s25 + $0x10] sm:$0xff] (%p1388_p9) }
 0x1c8   : > { %s839_s14 = scalar_lea.vmem (%p1388_p9), %s1648_s4, %s1062_s11  ;;  %v903_v61 = vld [vmem:[%s1450_s25 + $0x18] sm:$0xff] (%p1388_p9)  ;;  %v905_v62 = vld [vmem:[%s1450_s25 + $0x20] sm:$0xff] (%p1388_p9)  ;;  %v907_v63 = vld [vmem:[%s1450_s25 + $0x28] sm:$0xff] (%p1388_p9) }
 0x1c9   : > { %898 = vst [vmem:[%s839_s14] sm:$0xff] (%p1388_p9), %v897_v45  ;;  %900 = vst [vmem:[%s839_s14 + $0x18] sm:$0xff] (%p1388_p9), %v899_v59  ;;  %v909_v0 = vld [vmem:[%s1450_s25 + $0x30] sm:$0xff] (%p1388_p9)  ;;  %v911_v1 = vld [vmem:[%s1450_s25 + $0x38] sm:$0xff] (%p1388_p9) }
 0x1ca   : > { %902 = vst [vmem:[%s839_s14 + $0x30] sm:$0xff] (%p1388_p9), %v901_v60  ;;  %904 = vst [vmem:[%s839_s14 + $0x48] sm:$0xff] (%p1388_p9), %v903_v61  ;;  %v913_v2 = vld [vmem:[%s1450_s25 + $0x40] sm:$0xff] (%p1388_p9)  ;;  %v915_v3 = vld [vmem:[%s1450_s25 + $0x48] sm:$0xff] (%p1388_p9) }
 0x1cb   : > { %906 = vst [vmem:[%s839_s14 + $0x60] sm:$0xff] (%p1388_p9), %v905_v62  ;;  %908 = vst [vmem:[%s839_s14 + $0x78] sm:$0xff] (%p1388_p9), %v907_v63  ;;  %v917_v4 = vld [vmem:[%s1450_s25 + $0x50] sm:$0xff] (%p1388_p9)  ;;  %v919_v5 = vld [vmem:[%s1450_s25 + $0x58] sm:$0xff] (%p1388_p9) }
 0x1cc   : > { %910 = vst [vmem:[%s839_s14 + $0x90] sm:$0xff] (%p1388_p9), %v909_v0  ;;  %912 = vst [vmem:[%s839_s14 + $0xa8] sm:$0xff] (%p1388_p9), %v911_v1  ;;  %v921_v6 = vld [vmem:[%s1450_s25 + $0x60] sm:$0xff] (%p1388_p9)  ;;  %v923_v7 = vld [vmem:[%s1450_s25 + $0x68] sm:$0xff] (%p1388_p9) }
 0x1cd   : > { %914 = vst [vmem:[%s839_s14 + $0xc0] sm:$0xff] (%p1388_p9), %v913_v2  ;;  %916 = vst [vmem:[%s839_s14 + $0xd8] sm:$0xff] (%p1388_p9), %v915_v3  ;;  %v925_v8 = vld [vmem:[%s1450_s25 + $0x70] sm:$0xff] (%p1388_p9)  ;;  %v927_v9 = vld [vmem:[%s1450_s25 + $0x78] sm:$0xff] (%p1388_p9) }
 0x1ce   : > { %918 = vst [vmem:[%s839_s14 + $0xf0] sm:$0xff] %v917_v4  ;;  %920 = vst [vmem:[%s839_s14 + $0x108] sm:$0xff] %v919_v5 }
 0x1cf   : > { %922 = vst [vmem:[%s839_s14 + $0x120] sm:$0xff] %v921_v6  ;;  %924 = vst [vmem:[%s839_s14 + $0x138] sm:$0xff] %v923_v7 }
 0x1d0   : > { %926 = vst [vmem:[%s839_s14 + $0x150] sm:$0xff] %v925_v8  ;;  %928 = vst [vmem:[%s839_s14 + $0x168] sm:$0xff] %v927_v9 }
 0x1d1 PF: > { %s14_s23 = sadd.s32 1, %s1292_s23   ;;  %s1655_s7 = sld [smem:[#allocation5_spill]] }
 0x1d2   : > { %p11_p4 = scmp.ge.s32.totalorder %s14_s23, 29   ;;  %s1656_s15 = smov %s1264_s16 }
 0x1d3   : > { %s1657_s16 = smov %s1393_s8  ;;  %s1658_s17 = smov %s1272_s18 }
 0x1d4   : > { %s1659_s18 = smov %s1396_s9  ;;  %s1660_s19 = smov %s1284_s21 }
 0x1d5   : > { %s1661_s20 = smov %s1288_s22  ;;  %s1662_s21 = smov %s1665_s24 }
 0x1d6   :  { %13 = sbr.rel (!%p11_p4) target bundleno = 7 (0x7), region = 167 }
 0x1d7   : > { %s1663_s22 = smov %s1655_s7 }

// kernel: inception_block_b.5
= control target key start
LH: loop header
LB: loop body
LE: loop exit
PB: predicated region body
PF: predicated region fallthrough
CT: control target
= control target key end

     0   :  { %s790_s0 = inlined_call_operand.vmem [shape: f32[9,128,128], index: 0, kind: input, shape index: {}]   ;;  %s791_s1 = inlined_call_operand.vmem [shape: f32[128,128], index: 1, kind: output, shape index: {}]  }
   0x1   :  { %v8_v0 = vld [vmem:[%s790_s0] sm:$0xff]  ;;  %v9_v6 = vld [vmem:[%s790_s0 + $0x8] sm:$0xff]  ;;  %v10_v15 = vld [vmem:[%s790_s0 + $0x10] sm:$0xff] }
   0x2   :  { %v24_v1 = vld [vmem:[%s790_s0 + $0x80] sm:$0xff]  ;;  %v25_v7 = vld [vmem:[%s790_s0 + $0x88] sm:$0xff]  ;;  %v26_v16 = vld [vmem:[%s790_s0 + $0x90] sm:$0xff] }
   0x3   :  { %v40_v2 = vld [vmem:[%s790_s0 + $0x100] sm:$0xff]  ;;  %v152_v3 = vmax.f32 %v8_v0, %v24_v1  ;;  %v41_v8 = vld [vmem:[%s790_s0 + $0x108] sm:$0xff]  ;;  %v160_v10 = vmax.f32 %v9_v6, %v25_v7  ;;  %v42_v17 = vld [vmem:[%s790_s0 + $0x110] sm:$0xff]  ;;  %v168_v20 = vmax.f32 %v10_v15, %v26_v16 }
   0x4   :  { %v56_v4 = vld [vmem:[%s790_s0 + $0x180] sm:$0xff]  ;;  %v57_v13 = vld [vmem:[%s790_s0 + $0x188] sm:$0xff]  ;;  %v58_v24 = vld [vmem:[%s790_s0 + $0x190] sm:$0xff] }
   0x5   :  { %v153_v5 = vmax.f32 %v152_v3, %v40_v2  ;;  %v72_v9 = vld [vmem:[%s790_s0 + $0x200] sm:$0xff]  ;;  %v161_v14 = vmax.f32 %v160_v10, %v41_v8  ;;  %v73_v19 = vld [vmem:[%s790_s0 + $0x208] sm:$0xff]  ;;  %v169_v26 = vmax.f32 %v168_v20, %v42_v17  ;;  %v11_v27 = vld [vmem:[%s790_s0 + $0x18] sm:$0xff] }
   0x6   :  { %v88_v11 = vld [vmem:[%s790_s0 + $0x280] sm:$0xff]  ;;  %v89_v22 = vld [vmem:[%s790_s0 + $0x288] sm:$0xff]  ;;  %v27_v28 = vld [vmem:[%s790_s0 + $0x98] sm:$0xff] }
   0x7   :  { %v154_v12 = vmax.f32 %v153_v5, %v56_v4  ;;  %v104_v21 = vld [vmem:[%s790_s0 + $0x300] sm:$0xff]  ;;  %v162_v23 = vmax.f32 %v161_v14, %v57_v13  ;;  %v43_v29 = vld [vmem:[%s790_s0 + $0x118] sm:$0xff]  ;;  %v74_v33 = vld [vmem:[%s790_s0 + $0x210] sm:$0xff]  ;;  %v176_v34 = vmax.f32 %v11_v27, %v27_v28  ;;  %v170_v38 = vmax.f32 %v169_v26, %v58_v24 }
   0x8   :  { %v120_v30 = vld [vmem:[%s790_s0 + $0x380] sm:$0xff]  ;;  %v105_v36 = vld [vmem:[%s790_s0 + $0x308] sm:$0xff]  ;;  %v90_v37 = vld [vmem:[%s790_s0 + $0x290] sm:$0xff] }
   0x9   :  { %v155_v18 = vmax.f32 %v154_v12, %v72_v9  ;;  %v136_v31 = vld [vmem:[%s790_s0 + $0x400] sm:$0xff]  ;;  %v163_v32 = vmax.f32 %v162_v23, %v73_v19  ;;  %v59_v39 = vld [vmem:[%s790_s0 + $0x198] sm:$0xff]  ;;  %v177_v41 = vmax.f32 %v176_v34, %v43_v29  ;;  %v121_v46 = vld [vmem:[%s790_s0 + $0x388] sm:$0xff]  ;;  %v171_v48 = vmax.f32 %v170_v38, %v74_v33 }
   0xa   :  { %v12_v42 = vld [vmem:[%s790_s0 + $0x20] sm:$0xff]  ;;  %v137_v47 = vld [vmem:[%s790_s0 + $0x408] sm:$0xff]  ;;  %v75_v49 = vld [vmem:[%s790_s0 + $0x218] sm:$0xff] }
   0xb   :  { %v156_v25 = vmax.f32 %v155_v18, %v88_v11  ;;  %v164_v40 = vmax.f32 %v163_v32, %v89_v22  ;;  %v28_v43 = vld [vmem:[%s790_s0 + $0xa0] sm:$0xff]  ;;  %v106_v52 = vld [vmem:[%s790_s0 + $0x310] sm:$0xff]  ;;  %v91_v53 = vld [vmem:[%s790_s0 + $0x298] sm:$0xff]  ;;  %v178_v54 = vmax.f32 %v177_v41, %v59_v39  ;;  %v172_v57 = vmax.f32 %v171_v48, %v90_v37 }
   0xc   :  { %v44_v44 = vld [vmem:[%s790_s0 + $0x120] sm:$0xff]  ;;  %v184_v50 = vmax.f32 %v12_v42, %v28_v43  ;;  %v13_v59 = vld [vmem:[%s790_s0 + $0x28] sm:$0xff]  ;;  %v122_v63 = vld [vmem:[%s790_s0 + $0x390] sm:$0xff] }
   0xd   :  { %v157_v35 = vmax.f32 %v156_v25, %v104_v21  ;;  %v165_v51 = vmax.f32 %v164_v40, %v105_v36  ;;  %v60_v55 = vld [vmem:[%s790_s0 + $0x1a0] sm:$0xff]  ;;  %v29_v60 = vld [vmem:[%s790_s0 + $0xa8] sm:$0xff]  ;;  %v138_v0 = vld [vmem:[%s790_s0 + $0x410] sm:$0xff]  ;;  %v179_v1 = vmax.f32 %v178_v54, %v75_v49  ;;  %v173_v4 = vmax.f32 %v172_v57, %v106_v52 }
   0xe   :  { %v185_v58 = vmax.f32 %v184_v50, %v44_v44  ;;  %v45_v61 = vld [vmem:[%s790_s0 + $0x128] sm:$0xff]  ;;  %v76_v2 = vld [vmem:[%s790_s0 + $0x220] sm:$0xff]  ;;  %v192_v3 = vmax.f32 %v13_v59, %v29_v60  ;;  %v107_v5 = vld [vmem:[%s790_s0 + $0x318] sm:$0xff] }
   0xf   :  { %v158_v45 = vmax.f32 %v157_v35, %v120_v30  ;;  %v166_v62 = vmax.f32 %v165_v51, %v121_v46  ;;  %v92_v6 = vld [vmem:[%s790_s0 + $0x2a0] sm:$0xff]  ;;  %v61_v8 = vld [vmem:[%s790_s0 + $0x1a8] sm:$0xff]  ;;  %v180_v10 = vmax.f32 %v179_v1, %v91_v53  ;;  %v14_v12 = vld [vmem:[%s790_s0 + $0x30] sm:$0xff]  ;;  %v174_v15 = vmax.f32 %v173_v4, %v122_v63 }
  0x10   :  { %v186_v7 = vmax.f32 %v185_v58, %v60_v55  ;;  %v193_v11 = vmax.f32 %v192_v3, %v45_v61  ;;  %v30_v13 = vld [vmem:[%s790_s0 + $0xb0] sm:$0xff]  ;;  %v123_v16 = vld [vmem:[%s790_s0 + $0x398] sm:$0xff]  ;;  %v77_v19 = vld [vmem:[%s790_s0 + $0x228] sm:$0xff] }
  0x11   :  { %v159_v56 = vmax.f32 %v158_v45, %v136_v31  ;;  %v167_v9 = vmax.f32 %v166_v62, %v137_v47  ;;  %v46_v14 = vld [vmem:[%s790_s0 + $0x130] sm:$0xff]  ;;  %v139_v17 = vld [vmem:[%s790_s0 + $0x418] sm:$0xff]  ;;  %v200_v20 = vmax.f32 %v14_v12, %v30_v13  ;;  %v181_v21 = vmax.f32 %v180_v10, %v107_v5  ;;  %v108_v22 = vld [vmem:[%s790_s0 + $0x320] sm:$0xff] }
  0x12   :  { %v187_v18 = vmax.f32 %v186_v7, %v76_v2  ;;  %v93_v23 = vld [vmem:[%s790_s0 + $0x2a8] sm:$0xff]  ;;  %v194_v24 = vmax.f32 %v193_v11, %v61_v8  ;;  %v62_v25 = vld [vmem:[%s790_s0 + $0x1b0] sm:$0xff]  ;;  %v175_v26 = vmax.f32 %v174_v15, %v138_v0  ;;  %v15_v29 = vld [vmem:[%s790_s0 + $0x38] sm:$0xff] }
  0x13   :  { %280 = vst [vmem:[%s791_s1] sm:$0xff] %v159_v56  ;;  %281 = vst [vmem:[%s791_s1 + $0x8] sm:$0xff] %v167_v9  ;;  %v201_v28 = vmax.f32 %v200_v20, %v46_v14  ;;  %v31_v30 = vld [vmem:[%s790_s0 + $0xb8] sm:$0xff]  ;;  %v182_v32 = vmax.f32 %v181_v21, %v123_v16  ;;  %v124_v33 = vld [vmem:[%s790_s0 + $0x3a0] sm:$0xff] }
  0x14   :  { %v188_v27 = vmax.f32 %v187_v18, %v92_v6  ;;  %v47_v31 = vld [vmem:[%s790_s0 + $0x138] sm:$0xff]  ;;  %v140_v34 = vld [vmem:[%s790_s0 + $0x420] sm:$0xff]  ;;  %v195_v35 = vmax.f32 %v194_v24, %v77_v19  ;;  %v78_v36 = vld [vmem:[%s790_s0 + $0x230] sm:$0xff]  ;;  %v208_v37 = vmax.f32 %v15_v29, %v31_v30  ;;  %282 = vst [vmem:[%s791_s1 + $0x10] sm:$0xff] %v175_v26 }
  0x15   :  { %v109_v39 = vld [vmem:[%s790_s0 + $0x328] sm:$0xff]  ;;  %v94_v40 = vld [vmem:[%s790_s0 + $0x2b0] sm:$0xff]  ;;  %v202_v41 = vmax.f32 %v201_v28, %v62_v25  ;;  %v63_v42 = vld [vmem:[%s790_s0 + $0x1b8] sm:$0xff]  ;;  %v183_v43 = vmax.f32 %v182_v32, %v139_v17 }
  0x16   :  { %v189_v38 = vmax.f32 %v188_v27, %v108_v22  ;;  %v196_v44 = vmax.f32 %v195_v35, %v93_v23  ;;  %v209_v45 = vmax.f32 %v208_v37, %v47_v31  ;;  %v16_v46 = vld [vmem:[%s790_s0 + $0x40] sm:$0xff]  ;;  %v125_v50 = vld [vmem:[%s790_s0 + $0x3a8] sm:$0xff]  ;;  %v79_v53 = vld [vmem:[%s790_s0 + $0x238] sm:$0xff] }
  0x17   :  { %v32_v47 = vld [vmem:[%s790_s0 + $0xc0] sm:$0xff]  ;;  %v141_v51 = vld [vmem:[%s790_s0 + $0x428] sm:$0xff]  ;;  %v203_v52 = vmax.f32 %v202_v41, %v78_v36  ;;  %283 = vst [vmem:[%s791_s1 + $0x18] sm:$0xff] %v183_v43  ;;  %v110_v56 = vld [vmem:[%s790_s0 + $0x330] sm:$0xff] }
  0x18   :  { %v48_v48 = vld [vmem:[%s790_s0 + $0x140] sm:$0xff]  ;;  %v190_v49 = vmax.f32 %v189_v38, %v124_v33  ;;  %v216_v54 = vmax.f32 %v16_v46, %v32_v47  ;;  %v197_v55 = vmax.f32 %v196_v44, %v109_v39  ;;  %v95_v57 = vld [vmem:[%s790_s0 + $0x2b8] sm:$0xff]  ;;  %v210_v58 = vmax.f32 %v209_v45, %v63_v42  ;;  %v17_v63 = vld [vmem:[%s790_s0 + $0x48] sm:$0xff] }
  0x19   :  { %v64_v59 = vld [vmem:[%s790_s0 + $0x1c0] sm:$0xff]  ;;  %v204_v61 = vmax.f32 %v203_v52, %v94_v40  ;;  %v33_v0 = vld [vmem:[%s790_s0 + $0xc8] sm:$0xff]  ;;  %v126_v3 = vld [vmem:[%s790_s0 + $0x3b0] sm:$0xff] }
  0x1a   :  { %v191_v60 = vmax.f32 %v190_v49, %v140_v34  ;;  %v217_v62 = vmax.f32 %v216_v54, %v48_v48  ;;  %v49_v1 = vld [vmem:[%s790_s0 + $0x148] sm:$0xff]  ;;  %v198_v2 = vmax.f32 %v197_v55, %v125_v50  ;;  %v142_v4 = vld [vmem:[%s790_s0 + $0x430] sm:$0xff]  ;;  %v211_v5 = vmax.f32 %v210_v58, %v79_v53  ;;  %v80_v6 = vld [vmem:[%s790_s0 + $0x240] sm:$0xff] }
  0x1b   :  { %v224_v7 = vmax.f32 %v17_v63, %v33_v0  ;;  %v205_v8 = vmax.f32 %v204_v61, %v110_v56  ;;  %v111_v9 = vld [vmem:[%s790_s0 + $0x338] sm:$0xff]  ;;  %v96_v10 = vld [vmem:[%s790_s0 + $0x2c0] sm:$0xff]  ;;  %v65_v12 = vld [vmem:[%s790_s0 + $0x1c8] sm:$0xff] }
  0x1c   :  { %284 = vst [vmem:[%s791_s1 + $0x20] sm:$0xff] %v191_v60  ;;  %v218_v11 = vmax.f32 %v217_v62, %v64_v59  ;;  %v199_v13 = vmax.f32 %v198_v2, %v141_v51  ;;  %v212_v14 = vmax.f32 %v211_v5, %v95_v57  ;;  %v18_v16 = vld [vmem:[%s790_s0 + $0x50] sm:$0xff]  ;;  %v127_v20 = vld [vmem:[%s790_s0 + $0x3b8] sm:$0xff]  ;;  %v81_v23 = vld [vmem:[%s790_s0 + $0x248] sm:$0xff] }
  0x1d   :  { %v225_v15 = vmax.f32 %v224_v7, %v49_v1  ;;  %v34_v17 = vld [vmem:[%s790_s0 + $0xd0] sm:$0xff]  ;;  %v206_v19 = vmax.f32 %v205_v8, %v126_v3  ;;  %v143_v21 = vld [vmem:[%s790_s0 + $0x438] sm:$0xff]  ;;  %v112_v26 = vld [vmem:[%s790_s0 + $0x340] sm:$0xff] }
  0x1e   :  { %v50_v18 = vld [vmem:[%s790_s0 + $0x150] sm:$0xff]  ;;  %v219_v22 = vmax.f32 %v218_v11, %v80_v6  ;;  %v232_v24 = vmax.f32 %v18_v16, %v34_v17  ;;  %285 = vst [vmem:[%s791_s1 + $0x28] sm:$0xff] %v199_v13  ;;  %v213_v25 = vmax.f32 %v212_v14, %v111_v9  ;;  %v97_v27 = vld [vmem:[%s790_s0 + $0x2c8] sm:$0xff]  ;;  %v19_v33 = vld [vmem:[%s790_s0 + $0x58] sm:$0xff] }
  0x1f   :  { %v226_v28 = vmax.f32 %v225_v15, %v65_v12  ;;  %v66_v29 = vld [vmem:[%s790_s0 + $0x1d0] sm:$0xff]  ;;  %v207_v30 = vmax.f32 %v206_v19, %v142_v4  ;;  %v35_v34 = vld [vmem:[%s790_s0 + $0xd8] sm:$0xff]  ;;  %v128_v37 = vld [vmem:[%s790_s0 + $0x3c0] sm:$0xff] }
  0x20   :  { %v220_v31 = vmax.f32 %v219_v22, %v96_v10  ;;  %v233_v32 = vmax.f32 %v232_v24, %v50_v18  ;;  %v51_v35 = vld [vmem:[%s790_s0 + $0x158] sm:$0xff]  ;;  %v214_v36 = vmax.f32 %v213_v25, %v127_v20  ;;  %v144_v38 = vld [vmem:[%s790_s0 + $0x440] sm:$0xff]  ;;  %v82_v40 = vld [vmem:[%s790_s0 + $0x250] sm:$0xff]  ;;  %v240_v41 = vmax.f32 %v19_v33, %v35_v34 }
  0x21   :  { %v227_v39 = vmax.f32 %v226_v28, %v81_v23  ;;  %286 = vst [vmem:[%s791_s1 + $0x30] sm:$0xff] %v207_v30  ;;  %v113_v43 = vld [vmem:[%s790_s0 + $0x348] sm:$0xff]  ;;  %v98_v44 = vld [vmem:[%s790_s0 + $0x2d0] sm:$0xff]  ;;  %v67_v46 = vld [vmem:[%s790_s0 + $0x1d8] sm:$0xff] }
  0x22   :  { %v221_v42 = vmax.f32 %v220_v31, %v112_v26  ;;  %v234_v45 = vmax.f32 %v233_v32, %v66_v29  ;;  %v215_v47 = vmax.f32 %v214_v36, %v143_v21  ;;  %v241_v49 = vmax.f32 %v240_v41, %v51_v35  ;;  %v20_v50 = vld [vmem:[%s790_s0 + $0x60] sm:$0xff]  ;;  %v129_v54 = vld [vmem:[%s790_s0 + $0x3c8] sm:$0xff]  ;;  %v83_v57 = vld [vmem:[%s790_s0 + $0x258] sm:$0xff] }
  0x23   :  { %v228_v48 = vmax.f32 %v227_v39, %v97_v27  ;;  %v36_v51 = vld [vmem:[%s790_s0 + $0xe0] sm:$0xff]  ;;  %v145_v55 = vld [vmem:[%s790_s0 + $0x448] sm:$0xff]  ;;  %v114_v60 = vld [vmem:[%s790_s0 + $0x350] sm:$0xff] }
  0x24   :  { %v52_v52 = vld [vmem:[%s790_s0 + $0x160] sm:$0xff]  ;;  %v222_v53 = vmax.f32 %v221_v42, %v128_v37  ;;  %v235_v56 = vmax.f32 %v234_v45, %v82_v40  ;;  %v248_v58 = vmax.f32 %v20_v50, %v36_v51  ;;  %287 = vst [vmem:[%s791_s1 + $0x38] sm:$0xff] %v215_v47  ;;  %v99_v61 = vld [vmem:[%s790_s0 + $0x2d8] sm:$0xff]  ;;  %v242_v62 = vmax.f32 %v241_v49, %v67_v46  ;;  %v21_v3 = vld [vmem:[%s790_s0 + $0x68] sm:$0xff] }
  0x25   :  { %v229_v59 = vmax.f32 %v228_v48, %v113_v43  ;;  %v68_v63 = vld [vmem:[%s790_s0 + $0x1e0] sm:$0xff]  ;;  %v37_v4 = vld [vmem:[%s790_s0 + $0xe8] sm:$0xff]  ;;  %v130_v7 = vld [vmem:[%s790_s0 + $0x3d0] sm:$0xff] }
  0x26   :  { %v223_v0 = vmax.f32 %v222_v53, %v144_v38  ;;  %v236_v1 = vmax.f32 %v235_v56, %v98_v44  ;;  %v249_v2 = vmax.f32 %v248_v58, %v52_v52  ;;  %v53_v5 = vld [vmem:[%s790_s0 + $0x168] sm:$0xff]  ;;  %v146_v8 = vld [vmem:[%s790_s0 + $0x450] sm:$0xff]  ;;  %v243_v9 = vmax.f32 %v242_v62, %v83_v57  ;;  %v84_v10 = vld [vmem:[%s790_s0 + $0x260] sm:$0xff] }
  0x27   :  { %v230_v6 = vmax.f32 %v229_v59, %v129_v54  ;;  %v256_v11 = vmax.f32 %v21_v3, %v37_v4  ;;  %v115_v13 = vld [vmem:[%s790_s0 + $0x358] sm:$0xff]  ;;  %v100_v14 = vld [vmem:[%s790_s0 + $0x2e0] sm:$0xff]  ;;  %v69_v16 = vld [vmem:[%s790_s0 + $0x1e8] sm:$0xff] }
  0x28   :  { %288 = vst [vmem:[%s791_s1 + $0x40] sm:$0xff] %v223_v0  ;;  %v237_v12 = vmax.f32 %v236_v1, %v114_v60  ;;  %v250_v15 = vmax.f32 %v249_v2, %v68_v63  ;;  %v244_v18 = vmax.f32 %v243_v9, %v99_v61  ;;  %v22_v20 = vld [vmem:[%s790_s0 + $0x70] sm:$0xff]  ;;  %v131_v24 = vld [vmem:[%s790_s0 + $0x3d8] sm:$0xff]  ;;  %v85_v27 = vld [vmem:[%s790_s0 + $0x268] sm:$0xff] }
  0x29   :  { %v231_v17 = vmax.f32 %v230_v6, %v145_v55  ;;  %v257_v19 = vmax.f32 %v256_v11, %v53_v5  ;;  %v38_v21 = vld [vmem:[%s790_s0 + $0xf0] sm:$0xff]  ;;  %v147_v25 = vld [vmem:[%s790_s0 + $0x458] sm:$0xff]  ;;  %v116_v30 = vld [vmem:[%s790_s0 + $0x360] sm:$0xff] }
  0x2a   :  { %v54_v22 = vld [vmem:[%s790_s0 + $0x170] sm:$0xff]  ;;  %v238_v23 = vmax.f32 %v237_v12, %v130_v7  ;;  %v251_v26 = vmax.f32 %v250_v15, %v84_v10  ;;  %v264_v28 = vmax.f32 %v22_v20, %v38_v21  ;;  %v245_v29 = vmax.f32 %v244_v18, %v115_v13  ;;  %v101_v31 = vld [vmem:[%s790_s0 + $0x2e8] sm:$0xff]  ;;  %v23_v37 = vld [vmem:[%s790_s0 + $0x78] sm:$0xff] }
  0x2b   :  { %289 = vst [vmem:[%s791_s1 + $0x48] sm:$0xff] %v231_v17  ;;  %v258_v32 = vmax.f32 %v257_v19, %v69_v16  ;;  %v70_v33 = vld [vmem:[%s790_s0 + $0x1f0] sm:$0xff]  ;;  %v39_v38 = vld [vmem:[%s790_s0 + $0xf8] sm:$0xff]  ;;  %v132_v41 = vld [vmem:[%s790_s0 + $0x3e0] sm:$0xff] }
  0x2c   :  { %v239_v34 = vmax.f32 %v238_v23, %v146_v8  ;;  %v252_v35 = vmax.f32 %v251_v26, %v100_v14  ;;  %v265_v36 = vmax.f32 %v264_v28, %v54_v22  ;;  %v55_v39 = vld [vmem:[%s790_s0 + $0x178] sm:$0xff]  ;;  %v246_v40 = vmax.f32 %v245_v29, %v131_v24  ;;  %v86_v43 = vld [vmem:[%s790_s0 + $0x270] sm:$0xff]  ;;  %v117_v46 = vld [vmem:[%s790_s0 + $0x368] sm:$0xff] }
  0x2d   :  { %v259_v42 = vmax.f32 %v258_v32, %v85_v27  ;;  %v272_v44 = vmax.f32 %v23_v37, %v39_v38  ;;  %v71_v48 = vld [vmem:[%s790_s0 + $0x1f8] sm:$0xff]  ;;  %v148_v50 = vld [vmem:[%s790_s0 + $0x460] sm:$0xff]  ;;  %v102_v52 = vld [vmem:[%s790_s0 + $0x2f0] sm:$0xff] }
  0x2e   :  { %290 = vst [vmem:[%s791_s1 + $0x50] sm:$0xff] %v239_v34  ;;  %v253_v45 = vmax.f32 %v252_v35, %v116_v30  ;;  %v266_v47 = vmax.f32 %v265_v36, %v70_v33  ;;  %v247_v49 = vmax.f32 %v246_v40, %v147_v25  ;;  %v133_v55 = vld [vmem:[%s790_s0 + $0x3e8] sm:$0xff]  ;;  %v87_v57 = vld [vmem:[%s790_s0 + $0x278] sm:$0xff]  ;;  %v118_v59 = vld [vmem:[%s790_s0 + $0x370] sm:$0xff] }
  0x2f   :  { %v260_v51 = vmax.f32 %v259_v42, %v101_v31  ;;  %v273_v53 = vmax.f32 %v272_v44, %v55_v39  ;;  %v149_v62 = vld [vmem:[%s790_s0 + $0x468] sm:$0xff]  ;;  %v103_v0 = vld [vmem:[%s790_s0 + $0x2f8] sm:$0xff]  ;;  %v134_v2 = vld [vmem:[%s790_s0 + $0x3f0] sm:$0xff] }
  0x30   :  { %v254_v54 = vmax.f32 %v253_v45, %v132_v41  ;;  %v267_v56 = vmax.f32 %v266_v47, %v86_v43  ;;  %291 = vst [vmem:[%s791_s1 + $0x58] sm:$0xff] %v247_v49  ;;  %v119_v5 = vld [vmem:[%s790_s0 + $0x378] sm:$0xff]  ;;  %v150_v7 = vld [vmem:[%s790_s0 + $0x470] sm:$0xff] }
  0x31   :  { %v261_v58 = vmax.f32 %v260_v51, %v117_v46  ;;  %v274_v60 = vmax.f32 %v273_v53, %v71_v48  ;;  %v135_v10 = vld [vmem:[%s790_s0 + $0x3f8] sm:$0xff] }
  0x32   :  { %v255_v61 = vmax.f32 %v254_v54, %v148_v50  ;;  %v268_v63 = vmax.f32 %v267_v56, %v102_v52  ;;  %v151_v13 = vld [vmem:[%s790_s0 + $0x478] sm:$0xff] }
  0x33   :  { %v262_v1 = vmax.f32 %v261_v58, %v133_v55  ;;  %v275_v3 = vmax.f32 %v274_v60, %v87_v57 }
  0x34   :  { %292 = vst [vmem:[%s791_s1 + $0x60] sm:$0xff] %v255_v61  ;;  %v269_v4 = vmax.f32 %v268_v63, %v118_v59 }
  0x35   :  { %v263_v6 = vmax.f32 %v262_v1, %v149_v62  ;;  %v276_v8 = vmax.f32 %v275_v3, %v103_v0 }
  0x36   :  { %v270_v9 = vmax.f32 %v269_v4, %v134_v2 }
  0x37   :  { %293 = vst [vmem:[%s791_s1 + $0x68] sm:$0xff] %v263_v6  ;;  %v277_v11 = vmax.f32 %v276_v8, %v119_v5 }
  0x38   :  { %v271_v12 = vmax.f32 %v270_v9, %v150_v7 }
  0x39   :  { %v278_v14 = vmax.f32 %v277_v11, %v135_v10 }
  0x3a   :  { %294 = vst [vmem:[%s791_s1 + $0x70] sm:$0xff] %v271_v12 }
  0x3b   :  { %v279_v15 = vmax.f32 %v278_v14, %v151_v13 }
  0x3d   :  { %295 = vst [vmem:[%s791_s1 + $0x78] sm:$0xff] %v279_v15 }

</bundles_post_ra>
